<compile_context>
chip_gen: v7x
topology: tpu7x:2x2x1
jax: 0.10.0
libtpu: 0.0.40
codegen_flags: <defaults>
</compile_context>

<pallas_src>
import functools

import jax
import jax.numpy as jnp
from jax.experimental import pallas as pl
from jax.experimental.pallas import tpu as pltpu

TM = 256       # matmul output-row tile
TEW = 512      # elementwise row tile
M_PAD = 512    # rows padded to a multiple of this (lcm(TM, TEW))


def _round_up(x, m):
    return (x + m - 1) // m * m


def _pick_tile(dim, candidates):
    for c in candidates:
        if dim % c == 0:
            return c
    return dim


# ---------------------------------------------------------------------------
# Pallas kernels
# ---------------------------------------------------------------------------
def _matmul_stats_kernel(x_ref, w_ref, o_ref, sum_ref, sq_ref, acc_ref):
    """K-tiled matmul with f32 accumulator; emits per-tile column sum / sumsq."""
    k = pl.program_id(2)

    @pl.when(k == 0)
    def _():
        acc_ref[...] = jnp.zeros_like(acc_ref)

    acc_ref[...] += jnp.dot(x_ref[...], w_ref[...],
                            preferred_element_type=jnp.float32)

    @pl.when(k == pl.num_programs(2) - 1)
    def _():
        acc = acc_ref[...]
        o_ref[...] = acc.astype(o_ref.dtype)
        s = jnp.sum(acc, axis=0, keepdims=True)        # (1, TN)
        q = jnp.sum(acc * acc, axis=0, keepdims=True)  # (1, TN)
        sum_ref[...] = s[None]
        sq_ref[...] = q[None]


def _bn_relu_kernel(z_ref, scale_ref, shift_ref, o_ref):
    o_ref[...] = jnp.maximum(z_ref[...] * scale_ref[...] + shift_ref[...], 0.0)


def _bn_add_relu_kernel(z_ref, r_ref, scale_ref, shift_ref, o_ref):
    y = z_ref[...] * scale_ref[...] + shift_ref[...] + r_ref[...]
    o_ref[...] = jnp.maximum(y, 0.0)


# ---------------------------------------------------------------------------
# Pallas wrappers
# ---------------------------------------------------------------------------
def conv_matmul_stats(patches, wmat):
    """patches (M, K) f32, wmat (K, Cout) f32 -> z (Mp, Cp) f32 plus per-row-tile
    partial sums / sum-of-squares of z (shape (Mp//TM, 1, Cp))."""
    M, K = patches.shape
    Cout = wmat.shape[1]
    Mp = _round_up(M, M_PAD)
    Kp = _round_up(K, 128)
    Cp = _round_up(Cout, 128)
    TK = _pick_tile(Kp, (512, 384, 256, 128))
    TN = _pick_tile(Cp, (256, 128))

    # bf16 operands (MXU-native on v6e/v7x), f32 accumulation inside the kernel.
    x = jnp.pad(patches, ((0, Mp - M), (0, Kp - K))).astype(jnp.bfloat16)
    w = jnp.pad(wmat, ((0, Kp - K), (0, Cp - Cout))).astype(jnp.bfloat16)

    grid = (Mp // TM, Cp // TN, Kp // TK)
    n_mt = grid[0]

    z, psum, psq = pl.pallas_call(
        _matmul_stats_kernel,
        out_shape=(
            jax.ShapeDtypeStruct((Mp, Cp), jnp.float32),
            jax.ShapeDtypeStruct((n_mt, 1, Cp), jnp.float32),
            jax.ShapeDtypeStruct((n_mt, 1, Cp), jnp.float32),
        ),
        grid_spec=pltpu.PrefetchScalarGridSpec(
            num_scalar_prefetch=0,
            grid=grid,
            in_specs=[
                pl.BlockSpec((TM, TK), lambda i, j, k: (i, k)),
                pl.BlockSpec((TK, TN), lambda i, j, k: (k, j)),
            ],
            out_specs=(
                pl.BlockSpec((TM, TN), lambda i, j, k: (i, j)),
                pl.BlockSpec((1, 1, TN), lambda i, j, k: (i, 0, j)),
                pl.BlockSpec((1, 1, TN), lambda i, j, k: (i, 0, j)),
            ),
            scratch_shapes=[pltpu.VMEM((TM, TN), jnp.float32)],
        ),
        compiler_params=pltpu.CompilerParams(
            dimension_semantics=("parallel", "parallel", "arbitrary")),
    )(x, w)
    return z, psum, psq


def bn_relu(z, scale, shift):
    """relu(z * scale + shift), tiled; output aliases z (z is dead afterwards)."""
    Mp, Cp = z.shape
    TC = _pick_tile(Cp, (512, 384, 256, 128))
    grid = (Mp // TEW, Cp // TC)
    return pl.pallas_call(
        _bn_relu_kernel,
        out_shape=jax.ShapeDtypeStruct((Mp, Cp), jnp.float32),
        grid_spec=pltpu.PrefetchScalarGridSpec(
            num_scalar_prefetch=0,
            grid=grid,
            in_specs=[
                pl.BlockSpec((TEW, TC), lambda i, j: (i, j)),
                pl.BlockSpec((1, TC), lambda i, j: (0, j)),
                pl.BlockSpec((1, TC), lambda i, j: (0, j)),
            ],
            out_specs=pl.BlockSpec((TEW, TC), lambda i, j: (i, j)),
        ),
        compiler_params=pltpu.CompilerParams(
            dimension_semantics=("parallel", "parallel")),
        input_output_aliases={0: 0},
    )(z, scale, shift)


def bn_add_relu(z, res, scale, shift):
    """relu(z * scale + shift + res), tiled; output aliases z."""
    Mp, Cp = z.shape
    TC = _pick_tile(Cp, (512, 384, 256, 128))
    grid = (Mp // TEW, Cp // TC)
    return pl.pallas_call(
        _bn_add_relu_kernel,
        out_shape=jax.ShapeDtypeStruct((Mp, Cp), jnp.float32),
        grid_spec=pltpu.PrefetchScalarGridSpec(
            num_scalar_prefetch=0,
            grid=grid,
            in_specs=[
                pl.BlockSpec((TEW, TC), lambda i, j: (i, j)),
                pl.BlockSpec((TEW, TC), lambda i, j: (i, j)),
                pl.BlockSpec((1, TC), lambda i, j: (0, j)),
                pl.BlockSpec((1, TC), lambda i, j: (0, j)),
            ],
            out_specs=pl.BlockSpec((TEW, TC), lambda i, j: (i, j)),
        ),
        compiler_params=pltpu.CompilerParams(
            dimension_semantics=("parallel", "parallel")),
        input_output_aliases={0: 0},
    )(z, res, scale, shift)


# ---------------------------------------------------------------------------
# JAX glue (layout plumbing, im2col, tiny per-channel reductions)
# ---------------------------------------------------------------------------
def im2col(x, ksize, stride, pad):
    """x: (N, H, W, C) -> patches (N*Ho*Wo, k*k*C) with (dy, dx, cin) order."""
    N, H, W, C = x.shape
    xp = jnp.pad(x, ((0, 0), (pad, pad), (pad, pad), (0, 0)))
    Ho = (H + 2 * pad - ksize) // stride + 1
    Wo = (W + 2 * pad - ksize) // stride + 1
    cols = []
    for dy in range(ksize):
        for dx in range(ksize):
            cols.append(
                xp[:, dy : dy + stride * Ho : stride, dx : dx + stride * Wo : stride, :]
            )
    patches = jnp.concatenate(cols, axis=-1)
    return patches.reshape(N * Ho * Wo, ksize * ksize * C), (N, Ho, Wo)


def conv_weight_to_matrix(w_oihw, cin_pad=None):
    """PyTorch (Cout, Cin, KH, KW) -> (KH*KW*Cin_pad, Cout), (dy, dx, cin) order."""
    Cout, Cin, _, _ = w_oihw.shape
    w = jnp.transpose(w_oihw, (2, 3, 1, 0))  # (KH, KW, Cin, Cout)
    if cin_pad is not None and cin_pad > Cin:
        w = jnp.pad(w, ((0, 0), (0, 0), (0, cin_pad - Cin), (0, 0)))
    return w.reshape(-1, Cout)


def bn_scale_shift(psum, psq, m_real, gamma_p, beta_p, eps):
    """Per-channel affine for training-mode BN from kernel-emitted partial sums."""
    s = jnp.sum(psum, axis=(0, 1))                 # (Cp,)
    q = jnp.sum(psq, axis=(0, 1))                  # (Cp,)
    mean = s / m_real
    var = jnp.maximum(q / m_real - mean * mean, 0.0)   # biased var, single pass
    scale = gamma_p / jnp.sqrt(var + eps)
    shift = beta_p - mean * scale
    return scale[None, :], shift[None, :]


@functools.partial(jax.jit, static_argnames=("strides", "use1x1conv", "eps"))
def residual_forward(x_nchw, params, strides=1, use1x1conv=False, eps=1e-5):
    x = jnp.transpose(x_nchw, (0, 2, 3, 1)).astype(jnp.float32)  # NCHW -> NHWC
    N, H, W, Cin = x.shape
    Cout = params["w1"].shape[0]
    Cp = _round_up(Cout, 128)

    if not use1x1conv and (strides != 1 or Cin != Cout):
        raise ValueError(
            "identity skip path needs strides==1 and in_channels==out_channels; "
            "set use1x1conv=True (as the PyTorch module requires).")

    # --- block: conv3x3(stride) -> BN -> ReLU ---------------------------------
    # (conv bias omitted: exactly cancelled by the batch-mean subtraction)
    p1, (N1, H1, W1) = im2col(x, 3, strides, 1)
    M = N1 * H1 * W1
    z1, s1, q1 = conv_matmul_stats(p1, conv_weight_to_matrix(params["w1"]))
    g1p = jnp.pad(params["g1"], (0, Cp - Cout))
    be1p = jnp.pad(params["beta1"], (0, Cp - Cout))
    scale1, shift1 = bn_scale_shift(s1, q1, M, g1p, be1p, eps)
    a1 = bn_relu(z1, scale1, shift1)                      # (Mp, Cp); pad chans = 0

    # --- block: conv3x3(stride=1) -> BN ---------------------------------------
    # keep channel padding through im2col (zero activations x zero weight rows)
    a1_img = a1[:M].reshape(N1, H1, W1, Cp)
    p2, _ = im2col(a1_img, 3, 1, 1)
    z2, s2, q2 = conv_matmul_stats(
        p2, conv_weight_to_matrix(params["w2"], cin_pad=Cp))
    g2p = jnp.pad(params["g2"], (0, Cp - Cout))
    be2p = jnp.pad(params["beta2"], (0, Cp - Cout))
    scale2, shift2 = bn_scale_shift(s2, q2, M, g2p, be2p, eps)

    # --- skip path -------------------------------------------------------------
    if use1x1conv:
        xs = x[:, ::strides, ::strides, :].reshape(M, Cin)
        wp_mat = params["wp"].reshape(Cout, Cin).T        # (Cin, Cout)
        skip, _, _ = conv_matmul_stats(xs, wp_mat)
        # 1x1 conv bias (no BN after it): fold into the fused shift, for free.
        shift2 = shift2 + jnp.pad(params["bp"], (0, Cp - Cout))[None, :]
    else:
        Mp = z2.shape[0]
        skip = jnp.pad(x.reshape(M, Cin), ((0, Mp - M), (0, Cp - Cin)))

    # --- Y = relu(BN2(conv2(...)) + path(X)) -----------------------------------
    out = bn_add_relu(z2, skip, scale2, shift2)           # (Mp, Cp)
    out = out[:M, :Cout].reshape(N1, H1, W1, Cout)
    return jnp.transpose(out, (0, 3, 1, 2))               # NHWC -> NCHW


# ---------------------------------------------------------------------------
# Deterministic parameter init (shapes from Residual.__init__)
# ---------------------------------------------------------------------------
def init_params(key, in_channels, out_channels):
    k1, k2, k3, kb1, kb2, kb3 = jax.random.split(key, 6)
    s1 = 1.0 / jnp.sqrt(in_channels * 9.0)
    s2 = 1.0 / jnp.sqrt(out_channels * 9.0)
    sp = 1.0 / jnp.sqrt(in_channels * 1.0)
    return {
        "w1": jax.random.normal(k1, (out_channels, in_channels, 3, 3), jnp.float32) * s1,
        # b1/b2 kept for parity with nn.Conv2d but unused: a constant per-channel
        # bias is exactly cancelled by the following training-mode BatchNorm.
        "b1": jax.random.normal(kb1, (out_channels,), jnp.float32) * s1,
        "g1": jnp.ones((out_channels,), jnp.float32),
        "beta1": jnp.zeros((out_channels,), jnp.float32),
        "w2": jax.random.normal(k2, (out_channels, out_channels, 3, 3), jnp.float32) * s2,
        "b2": jax.random.normal(kb2, (out_channels,), jnp.float32) * s2,
        "g2": jnp.ones((out_channels,), jnp.float32),
        "beta2": jnp.zeros((out_channels,), jnp.float32),
        "wp": jax.random.normal(k3, (out_channels, in_channels, 1, 1), jnp.float32) * sp,
        "bp": jax.random.normal(kb3, (out_channels,), jnp.float32) * sp,
    }


if __name__ == "__main__":
    key = jax.random.PRNGKey(0)
    kx, kp = jax.random.split(key)

    N, Cin, Cout, H, W = 2, 4, 8, 16, 16
    strides, use1x1conv = 2, True

    x = jax.random.normal(kx, (N, Cin, H, W), jnp.float32)  # NCHW like PyTorch
    params = init_params(kp, Cin, Cout)

    y = residual_forward(x, params, strides=strides, use1x1conv=use1x1conv)
    y = jax.block_until_ready(y)

    expected_shape = (N, Cout, H // strides, W // strides)
    assert y.shape == expected_shape, (y.shape, expected_shape)
    assert bool(jnp.all(y >= 0.0)), "final ReLU violated"
    assert bool(jnp.all(jnp.isfinite(y))), "non-finite output"
    print("KERNEL_OK")
</pallas_src>

<mosaic_0001>
module attributes {stable_mosaic.version = 11 : i64} {
  func.func @_matmul_stats_kernel(%arg0: i32, %arg1: i32, %arg2: i32, %arg3: memref<256x128xbf16, #tpu.memory_space<vmem>>, %arg4: memref<128x128xbf16, #tpu.memory_space<vmem>>, %arg5: memref<256x128xf32, #tpu.memory_space<vmem>>, %arg6: memref<1x1x128xf32, #tpu.memory_space<vmem>>, %arg7: memref<1x1x128xf32, #tpu.memory_space<vmem>>, %arg8: memref<256x128xf32, #tpu.memory_space<vmem>>) attributes {dimension_semantics = [#tpu.dimension_semantics<parallel>, #tpu.dimension_semantics<parallel>, #tpu.dimension_semantics<arbitrary>], iteration_bounds = array<i64: 2, 1, 1>, scalar_prefetch = 0 : i64, scratch_operands = 1 : i64, tpu.core_type = #tpu.core_type<tc>, window_params = [{transform_indices = @transform_0, window_bounds = array<i64: 256, 128>}, {transform_indices = @transform_1, window_bounds = array<i64: 128, 128>}, {transform_indices = @transform_2, window_bounds = array<i64: 256, 128>}, {transform_indices = @transform_3, window_bounds = array<i64: 1, 1, 128>}, {transform_indices = @transform_4, window_bounds = array<i64: 1, 1, 128>}]} {
    %c0_i32 = arith.constant 0 : i32
    %0 = arith.cmpi eq, %arg2, %c0_i32 : i32
    %1 = arith.extui %0 : i1 to i32
    %c0_i32_0 = arith.constant 0 : i32
    %2 = arith.cmpi ne, %1, %c0_i32_0 : i32
    scf.if %2 {
      %cst_10 = arith.constant 0.000000e+00 : f32
      %12 = vector.broadcast %cst_10 : f32 to vector<256x128xf32>
      %c0_11 = arith.constant 0 : index
      %c0_12 = arith.constant 0 : index
      %13 = vector.load %arg8[%c0_11, %c0_12] : memref<256x128xf32, #tpu.memory_space<vmem>>, vector<256x128xf32>
      tpu.vector_store %arg8[%c0_11, %c0_12], %12 {strides = array<i32>} : memref<256x128xf32, #tpu.memory_space<vmem>>, vector<256x128xf32>,
    } else {
    }
    %c0 = arith.constant 0 : index
    %c0_1 = arith.constant 0 : index
    %3 = vector.load %arg8[%c0, %c0_1] : memref<256x128xf32, #tpu.memory_space<vmem>>, vector<256x128xf32>
    %c0_2 = arith.constant 0 : index
    %c0_3 = arith.constant 0 : index
    %4 = vector.load %arg3[%c0_2, %c0_3] : memref<256x128xbf16, #tpu.memory_space<vmem>>, vector<256x128xbf16>
    %c0_4 = arith.constant 0 : index
    %c0_5 = arith.constant 0 : index
    %5 = vector.load %arg4[%c0_4, %c0_5] : memref<128x128xbf16, #tpu.memory_space<vmem>>, vector<128x128xbf16>
    %cst = arith.constant dense<0.000000e+00> : vector<256x128xf32>
    %6 = tpu.matmul %4, %5, %cst {dimension_numbers = #tpu.dot_dimension_numbers<[1], [0], [0], [1], [0, 0, 1, 1], [], []>} : vector<256x128xbf16>, vector<128x128xbf16>, vector<256x128xf32> -> vector<256x128xf32>
    %7 = arith.addf %3, %6 : vector<256x128xf32>
    %c0_6 = arith.constant 0 : index
    %c0_7 = arith.constant 0 : index
    %8 = vector.load %arg8[%c0_6, %c0_7] : memref<256x128xf32, #tpu.memory_space<vmem>>, vector<256x128xf32>
    tpu.vector_store %arg8[%c0_6, %c0_7], %7 {strides = array<i32>} : memref<256x128xf32, #tpu.memory_space<vmem>>, vector<256x128xf32>,
    %c0_i32_8 = arith.constant 0 : i32
    %9 = arith.cmpi eq, %arg2, %c0_i32_8 : i32
    %10 = arith.extui %9 : i1 to i32
    %c0_i32_9 = arith.constant 0 : i32
    %11 = arith.cmpi ne, %10, %c0_i32_9 : i32
    scf.if %11 {
      %c0_10 = arith.constant 0 : index
      %c0_11 = arith.constant 0 : index
      %12 = vector.load %arg8[%c0_10, %c0_11] : memref<256x128xf32, #tpu.memory_space<vmem>>, vector<256x128xf32>
      %c0_12 = arith.constant 0 : index
      %c0_13 = arith.constant 0 : index
      %13 = vector.load %arg5[%c0_12, %c0_13] : memref<256x128xf32, #tpu.memory_space<vmem>>, vector<256x128xf32>
      tpu.vector_store %arg5[%c0_12, %c0_13], %12 {strides = array<i32>} : memref<256x128xf32, #tpu.memory_space<vmem>>, vector<256x128xf32>,
      %cst_14 = arith.constant dense<0.000000e+00> : vector<128xf32>
      %14 = vector.multi_reduction <add>, %12, %cst_14 [0] : vector<256x128xf32> to vector<128xf32>
      %15 = vector.shape_cast %14 : vector<128xf32> to vector<1x128xf32>
      %16 = arith.mulf %12, %12 : vector<256x128xf32>
      %cst_15 = arith.constant dense<0.000000e+00> : vector<128xf32>
      %17 = vector.multi_reduction <add>, %16, %cst_15 [0] : vector<256x128xf32> to vector<128xf32>
      %18 = vector.shape_cast %17 : vector<128xf32> to vector<1x128xf32>
      %19 = vector.shape_cast %15 : vector<1x128xf32> to vector<1x1x128xf32>
      %c0_16 = arith.constant 0 : index
      %c0_17 = arith.constant 0 : index
      %c0_18 = arith.constant 0 : index
      %20 = vector.load %arg6[%c0_16, %c0_17, %c0_18] : memref<1x1x128xf32, #tpu.memory_space<vmem>>, vector<1x1x128xf32>
      tpu.vector_store %arg6[%c0_16, %c0_17, %c0_18], %19 {strides = array<i32>} : memref<1x1x128xf32, #tpu.memory_space<vmem>>, vector<1x1x128xf32>,
      %21 = vector.shape_cast %18 : vector<1x128xf32> to vector<1x1x128xf32>
      %c0_19 = arith.constant 0 : index
      %c0_20 = arith.constant 0 : index
      %c0_21 = arith.constant 0 : index
      %22 = vector.load %arg7[%c0_19, %c0_20, %c0_21] : memref<1x1x128xf32, #tpu.memory_space<vmem>>, vector<1x1x128xf32>
      tpu.vector_store %arg7[%c0_19, %c0_20, %c0_21], %21 {strides = array<i32>} : memref<1x1x128xf32, #tpu.memory_space<vmem>>, vector<1x1x128xf32>,
    } else {
    }
    return
  }
  func.func @transform_0(%arg0: i32, %arg1: i32, %arg2: i32) -> (i32, i32) {
    %c0_i32 = arith.constant 0 : i32
    return %arg0, %arg2 : i32, i32
  }
  func.func @transform_1(%arg0: i32, %arg1: i32, %arg2: i32) -> (i32, i32) {
    %c0_i32 = arith.constant 0 : i32
    return %arg2, %arg1 : i32, i32
  }
  func.func @transform_2(%arg0: i32, %arg1: i32, %arg2: i32) -> (i32, i32) {
    %c0_i32 = arith.constant 0 : i32
    return %arg0, %arg1 : i32, i32
  }
  func.func @transform_3(%arg0: i32, %arg1: i32, %arg2: i32) -> (i32, i32, i32) {
    %c0_i32 = arith.constant 0 : i32
    %c0_i32_0 = arith.constant 0 : i32
    return %arg0, %c0_i32, %arg1 : i32, i32, i32
  }
  func.func @transform_4(%arg0: i32, %arg1: i32, %arg2: i32) -> (i32, i32, i32) {
    %c0_i32 = arith.constant 0 : i32
    %c0_i32_0 = arith.constant 0 : i32
    return %arg0, %c0_i32, %arg1 : i32, i32, i32
  }
}

module attributes {stable_mosaic.version = 11 : i64} {
  func.func @_bn_relu_kernel(%arg0: i32, %arg1: i32, %arg2: memref<512x128xf32, #tpu.memory_space<vmem>>, %arg3: memref<1x128xf32, #tpu.memory_space<vmem>>, %arg4: memref<1x128xf32, #tpu.memory_space<vmem>>, %arg5: memref<512x128xf32, #tpu.memory_space<vmem>>) attributes {dimension_semantics = [#tpu.dimension_semantics<parallel>, #tpu.dimension_semantics<parallel>], iteration_bounds = array<i64: 1, 1>, scalar_prefetch = 0 : i64, scratch_operands = 0 : i64, tpu.core_type = #tpu.core_type<tc>, window_params = [{transform_indices = @transform_0, window_bounds = array<i64: 512, 128>}, {transform_indices = @transform_1, window_bounds = array<i64: 1, 128>}, {transform_indices = @transform_2, window_bounds = array<i64: 1, 128>}, {transform_indices = @transform_3, window_bounds = array<i64: 512, 128>}]} {
    %c0 = arith.constant 0 : index
    %c0_0 = arith.constant 0 : index
    %0 = vector.load %arg2[%c0, %c0_0] : memref<512x128xf32, #tpu.memory_space<vmem>>, vector<512x128xf32>
    %c0_1 = arith.constant 0 : index
    %c0_2 = arith.constant 0 : index
    %1 = vector.load %arg3[%c0_1, %c0_2] : memref<1x128xf32, #tpu.memory_space<vmem>>, vector<1x128xf32>
    %2 = vector.broadcast %1 : vector<1x128xf32> to vector<512x128xf32>
    %3 = arith.mulf %0, %2 : vector<512x128xf32>
    %c0_3 = arith.constant 0 : index
    %c0_4 = arith.constant 0 : index
    %4 = vector.load %arg4[%c0_3, %c0_4] : memref<1x128xf32, #tpu.memory_space<vmem>>, vector<1x128xf32>
    %5 = vector.broadcast %4 : vector<1x128xf32> to vector<512x128xf32>
    %6 = arith.addf %3, %5 : vector<512x128xf32>
    %cst = arith.constant 0.000000e+00 : f32
    %7 = vector.broadcast %cst : f32 to vector<512x128xf32>
    %8 = arith.maximumf %6, %7 : vector<512x128xf32>
    %c0_5 = arith.constant 0 : index
    %c0_6 = arith.constant 0 : index
    %9 = vector.load %arg5[%c0_5, %c0_6] : memref<512x128xf32, #tpu.memory_space<vmem>>, vector<512x128xf32>
    tpu.vector_store %arg5[%c0_5, %c0_6], %8 {strides = array<i32>} : memref<512x128xf32, #tpu.memory_space<vmem>>, vector<512x128xf32>,
    return
  }
  func.func @transform_0(%arg0: i32, %arg1: i32) -> (i32, i32) {
    %c0_i32 = arith.constant 0 : i32
    return %arg0, %arg1 : i32, i32
  }
  func.func @transform_1(%arg0: i32, %arg1: i32) -> (i32, i32) {
    %c0_i32 = arith.constant 0 : i32
    %c0_i32_0 = arith.constant 0 : i32
    return %c0_i32, %arg1 : i32, i32
  }
  func.func @transform_2(%arg0: i32, %arg1: i32) -> (i32, i32) {
    %c0_i32 = arith.constant 0 : i32
    %c0_i32_0 = arith.constant 0 : i32
    return %c0_i32, %arg1 : i32, i32
  }
  func.func @transform_3(%arg0: i32, %arg1: i32) -> (i32, i32) {
    %c0_i32 = arith.constant 0 : i32
    return %arg0, %arg1 : i32, i32
  }
}

module attributes {stable_mosaic.version = 11 : i64} {
  func.func @_matmul_stats_kernel(%arg0: i32, %arg1: i32, %arg2: i32, %arg3: memref<256x384xbf16, #tpu.memory_space<vmem>>, %arg4: memref<384x128xbf16, #tpu.memory_space<vmem>>, %arg5: memref<256x128xf32, #tpu.memory_space<vmem>>, %arg6: memref<1x1x128xf32, #tpu.memory_space<vmem>>, %arg7: memref<1x1x128xf32, #tpu.memory_space<vmem>>, %arg8: memref<256x128xf32, #tpu.memory_space<vmem>>) attributes {dimension_semantics = [#tpu.dimension_semantics<parallel>, #tpu.dimension_semantics<parallel>, #tpu.dimension_semantics<arbitrary>], iteration_bounds = array<i64: 2, 1, 3>, scalar_prefetch = 0 : i64, scratch_operands = 1 : i64, tpu.core_type = #tpu.core_type<tc>, window_params = [{transform_indices = @transform_0, window_bounds = array<i64: 256, 384>}, {transform_indices = @transform_1, window_bounds = array<i64: 384, 128>}, {transform_indices = @transform_2, window_bounds = array<i64: 256, 128>}, {transform_indices = @transform_3, window_bounds = array<i64: 1, 1, 128>}, {transform_indices = @transform_4, window_bounds = array<i64: 1, 1, 128>}]} {
    %c0_i32 = arith.constant 0 : i32
    %0 = arith.cmpi eq, %arg2, %c0_i32 : i32
    %1 = arith.extui %0 : i1 to i32
    %c0_i32_0 = arith.constant 0 : i32
    %2 = arith.cmpi ne, %1, %c0_i32_0 : i32
    scf.if %2 {
      %cst_9 = arith.constant 0.000000e+00 : f32
      %12 = vector.broadcast %cst_9 : f32 to vector<256x128xf32>
      %c0_10 = arith.constant 0 : index
      %c0_11 = arith.constant 0 : index
      %13 = vector.load %arg8[%c0_10, %c0_11] : memref<256x128xf32, #tpu.memory_space<vmem>>, vector<256x128xf32>
      tpu.vector_store %arg8[%c0_10, %c0_11], %12 {strides = array<i32>} : memref<256x128xf32, #tpu.memory_space<vmem>>, vector<256x128xf32>,
    } else {
    }
    %c0 = arith.constant 0 : index
    %c0_1 = arith.constant 0 : index
    %3 = vector.load %arg8[%c0, %c0_1] : memref<256x128xf32, #tpu.memory_space<vmem>>, vector<256x128xf32>
    %c0_2 = arith.constant 0 : index
    %c0_3 = arith.constant 0 : index
    %4 = vector.load %arg3[%c0_2, %c0_3] : memref<256x384xbf16, #tpu.memory_space<vmem>>, vector<256x384xbf16>
    %c0_4 = arith.constant 0 : index
    %c0_5 = arith.constant 0 : index
    %5 = vector.load %arg4[%c0_4, %c0_5] : memref<384x128xbf16, #tpu.memory_space<vmem>>, vector<384x128xbf16>
    %cst = arith.constant dense<0.000000e+00> : vector<256x128xf32>
    %6 = tpu.matmul %4, %5, %cst {dimension_numbers = #tpu.dot_dimension_numbers<[1], [0], [0], [1], [0, 0, 1, 1], [], []>} : vector<256x384xbf16>, vector<384x128xbf16>, vector<256x128xf32> -> vector<256x128xf32>
    %7 = arith.addf %3, %6 : vector<256x128xf32>
    %c0_6 = arith.constant 0 : index
    %c0_7 = arith.constant 0 : index
    %8 = vector.load %arg8[%c0_6, %c0_7] : memref<256x128xf32, #tpu.memory_space<vmem>>, vector<256x128xf32>
    tpu.vector_store %arg8[%c0_6, %c0_7], %7 {strides = array<i32>} : memref<256x128xf32, #tpu.memory_space<vmem>>, vector<256x128xf32>,
    %c2_i32 = arith.constant 2 : i32
    %9 = arith.cmpi eq, %arg2, %c2_i32 : i32
    %10 = arith.extui %9 : i1 to i32
    %c0_i32_8 = arith.constant 0 : i32
    %11 = arith.cmpi ne, %10, %c0_i32_8 : i32
    scf.if %11 {
      %c0_9 = arith.constant 0 : index
      %c0_10 = arith.constant 0 : index
      %12 = vector.load %arg8[%c0_9, %c0_10] : memref<256x128xf32, #tpu.memory_space<vmem>>, vector<256x128xf32>
      %c0_11 = arith.constant 0 : index
      %c0_12 = arith.constant 0 : index
      %13 = vector.load %arg5[%c0_11, %c0_12] : memref<256x128xf32, #tpu.memory_space<vmem>>, vector<256x128xf32>
      tpu.vector_store %arg5[%c0_11, %c0_12], %12 {strides = array<i32>} : memref<256x128xf32, #tpu.memory_space<vmem>>, vector<256x128xf32>,
      %cst_13 = arith.constant dense<0.000000e+00> : vector<128xf32>
      %14 = vector.multi_reduction <add>, %12, %cst_13 [0] : vector<256x128xf32> to vector<128xf32>
      %15 = vector.shape_cast %14 : vector<128xf32> to vector<1x128xf32>
      %16 = arith.mulf %12, %12 : vector<256x128xf32>
      %cst_14 = arith.constant dense<0.000000e+00> : vector<128xf32>
      %17 = vector.multi_reduction <add>, %16, %cst_14 [0] : vector<256x128xf32> to vector<128xf32>
      %18 = vector.shape_cast %17 : vector<128xf32> to vector<1x128xf32>
      %19 = vector.shape_cast %15 : vector<1x128xf32> to vector<1x1x128xf32>
      %c0_15 = arith.constant 0 : index
      %c0_16 = arith.constant 0 : index
      %c0_17 = arith.constant 0 : index
      %20 = vector.load %arg6[%c0_15, %c0_16, %c0_17] : memref<1x1x128xf32, #tpu.memory_space<vmem>>, vector<1x1x128xf32>
      tpu.vector_store %arg6[%c0_15, %c0_16, %c0_17], %19 {strides = array<i32>} : memref<1x1x128xf32, #tpu.memory_space<vmem>>, vector<1x1x128xf32>,
      %21 = vector.shape_cast %18 : vector<1x128xf32> to vector<1x1x128xf32>
      %c0_18 = arith.constant 0 : index
      %c0_19 = arith.constant 0 : index
      %c0_20 = arith.constant 0 : index
      %22 = vector.load %arg7[%c0_18, %c0_19, %c0_20] : memref<1x1x128xf32, #tpu.memory_space<vmem>>, vector<1x1x128xf32>
      tpu.vector_store %arg7[%c0_18, %c0_19, %c0_20], %21 {strides = array<i32>} : memref<1x1x128xf32, #tpu.memory_space<vmem>>, vector<1x1x128xf32>,
    } else {
    }
    return
  }
  func.func @transform_0(%arg0: i32, %arg1: i32, %arg2: i32) -> (i32, i32) {
    %c0_i32 = arith.constant 0 : i32
    return %arg0, %arg2 : i32, i32
  }
  func.func @transform_1(%arg0: i32, %arg1: i32, %arg2: i32) -> (i32, i32) {
    %c0_i32 = arith.constant 0 : i32
    return %arg2, %arg1 : i32, i32
  }
  func.func @transform_2(%arg0: i32, %arg1: i32, %arg2: i32) -> (i32, i32) {
    %c0_i32 = arith.constant 0 : i32
    return %arg0, %arg1 : i32, i32
  }
  func.func @transform_3(%arg0: i32, %arg1: i32, %arg2: i32) -> (i32, i32, i32) {
    %c0_i32 = arith.constant 0 : i32
    %c0_i32_0 = arith.constant 0 : i32
    return %arg0, %c0_i32, %arg1 : i32, i32, i32
  }
  func.func @transform_4(%arg0: i32, %arg1: i32, %arg2: i32) -> (i32, i32, i32) {
    %c0_i32 = arith.constant 0 : i32
    %c0_i32_0 = arith.constant 0 : i32
    return %arg0, %c0_i32, %arg1 : i32, i32, i32
  }
}

module attributes {stable_mosaic.version = 11 : i64} {
  func.func @_bn_add_relu_kernel(%arg0: i32, %arg1: i32, %arg2: memref<512x128xf32, #tpu.memory_space<vmem>>, %arg3: memref<512x128xf32, #tpu.memory_space<vmem>>, %arg4: memref<1x128xf32, #tpu.memory_space<vmem>>, %arg5: memref<1x128xf32, #tpu.memory_space<vmem>>, %arg6: memref<512x128xf32, #tpu.memory_space<vmem>>) attributes {dimension_semantics = [#tpu.dimension_semantics<parallel>, #tpu.dimension_semantics<parallel>], iteration_bounds = array<i64: 1, 1>, scalar_prefetch = 0 : i64, scratch_operands = 0 : i64, tpu.core_type = #tpu.core_type<tc>, window_params = [{transform_indices = @transform_0, window_bounds = array<i64: 512, 128>}, {transform_indices = @transform_1, window_bounds = array<i64: 512, 128>}, {transform_indices = @transform_2, window_bounds = array<i64: 1, 128>}, {transform_indices = @transform_3, window_bounds = array<i64: 1, 128>}, {transform_indices = @transform_4, window_bounds = array<i64: 512, 128>}]} {
    %c0 = arith.constant 0 : index
    %c0_0 = arith.constant 0 : index
    %0 = vector.load %arg2[%c0, %c0_0] : memref<512x128xf32, #tpu.memory_space<vmem>>, vector<512x128xf32>
    %c0_1 = arith.constant 0 : index
    %c0_2 = arith.constant 0 : index
    %1 = vector.load %arg4[%c0_1, %c0_2] : memref<1x128xf32, #tpu.memory_space<vmem>>, vector<1x128xf32>
    %2 = vector.broadcast %1 : vector<1x128xf32> to vector<512x128xf32>
    %3 = arith.mulf %0, %2 : vector<512x128xf32>
    %c0_3 = arith.constant 0 : index
    %c0_4 = arith.constant 0 : index
    %4 = vector.load %arg5[%c0_3, %c0_4] : memref<1x128xf32, #tpu.memory_space<vmem>>, vector<1x128xf32>
    %5 = vector.broadcast %4 : vector<1x128xf32> to vector<512x128xf32>
    %6 = arith.addf %3, %5 : vector<512x128xf32>
    %c0_5 = arith.constant 0 : index
    %c0_6 = arith.constant 0 : index
    %7 = vector.load %arg3[%c0_5, %c0_6] : memref<512x128xf32, #tpu.memory_space<vmem>>, vector<512x128xf32>
    %8 = arith.addf %6, %7 : vector<512x128xf32>
    %cst = arith.constant 0.000000e+00 : f32
    %9 = vector.broadcast %cst : f32 to vector<512x128xf32>
    %10 = arith.maximumf %8, %9 : vector<512x128xf32>
    %c0_7 = arith.constant 0 : index
    %c0_8 = arith.constant 0 : index
    %11 = vector.load %arg6[%c0_7, %c0_8] : memref<512x128xf32, #tpu.memory_space<vmem>>, vector<512x128xf32>
    tpu.vector_store %arg6[%c0_7, %c0_8], %10 {strides = array<i32>} : memref<512x128xf32, #tpu.memory_space<vmem>>, vector<512x128xf32>,
    return
  }
  func.func @transform_0(%arg0: i32, %arg1: i32) -> (i32, i32) {
    %c0_i32 = arith.constant 0 : i32
    return %arg0, %arg1 : i32, i32
  }
  func.func @transform_1(%arg0: i32, %arg1: i32) -> (i32, i32) {
    %c0_i32 = arith.constant 0 : i32
    return %arg0, %arg1 : i32, i32
  }
  func.func @transform_2(%arg0: i32, %arg1: i32) -> (i32, i32) {
    %c0_i32 = arith.constant 0 : i32
    %c0_i32_0 = arith.constant 0 : i32
    return %c0_i32, %arg1 : i32, i32
  }
  func.func @transform_3(%arg0: i32, %arg1: i32) -> (i32, i32) {
    %c0_i32 = arith.constant 0 : i32
    %c0_i32_0 = arith.constant 0 : i32
    return %c0_i32, %arg1 : i32, i32
  }
  func.func @transform_4(%arg0: i32, %arg1: i32) -> (i32, i32) {
    %c0_i32 = arith.constant 0 : i32
    return %arg0, %arg1 : i32, i32
  }
}

module attributes {stable_mosaic.version = 11 : i64} {
  func.func @_matmul_stats_kernel(%arg0: i32, %arg1: i32, %arg2: i32, %arg3: memref<256x128xbf16, #tpu.memory_space<vmem>>, %arg4: memref<128x128xbf16, #tpu.memory_space<vmem>>, %arg5: memref<256x128xf32, #tpu.memory_space<vmem>>, %arg6: memref<1x1x128xf32, #tpu.memory_space<vmem>>, %arg7: memref<1x1x128xf32, #tpu.memory_space<vmem>>, %arg8: memref<256x128xf32, #tpu.memory_space<vmem>>) attributes {dimension_semantics = [#tpu.dimension_semantics<parallel>, #tpu.dimension_semantics<parallel>, #tpu.dimension_semantics<arbitrary>], iteration_bounds = array<i64: 2, 1, 1>, scalar_prefetch = 0 : i64, scratch_operands = 1 : i64, tpu.core_type = #tpu.core_type<tc>, window_params = [{transform_indices = @transform_0, window_bounds = array<i64: 256, 128>}, {transform_indices = @transform_1, window_bounds = array<i64: 128, 128>}, {transform_indices = @transform_2, window_bounds = array<i64: 256, 128>}, {transform_indices = @transform_3, window_bounds = array<i64: 1, 1, 128>}, {transform_indices = @transform_4, window_bounds = array<i64: 1, 1, 128>}]} {
    %c0_i32 = arith.constant 0 : i32
    %0 = arith.cmpi eq, %arg2, %c0_i32 : i32
    %1 = arith.extui %0 : i1 to i32
    %c0_i32_0 = arith.constant 0 : i32
    %2 = arith.cmpi ne, %1, %c0_i32_0 : i32
    scf.if %2 {
      %cst_10 = arith.constant 0.000000e+00 : f32
      %12 = vector.broadcast %cst_10 : f32 to vector<256x128xf32>
      %c0_11 = arith.constant 0 : index
      %c0_12 = arith.constant 0 : index
      %13 = vector.load %arg8[%c0_11, %c0_12] : memref<256x128xf32, #tpu.memory_space<vmem>>, vector<256x128xf32>
      tpu.vector_store %arg8[%c0_11, %c0_12], %12 {strides = array<i32>} : memref<256x128xf32, #tpu.memory_space<vmem>>, vector<256x128xf32>,
    } else {
    }
    %c0 = arith.constant 0 : index
    %c0_1 = arith.constant 0 : index
    %3 = vector.load %arg8[%c0, %c0_1] : memref<256x128xf32, #tpu.memory_space<vmem>>, vector<256x128xf32>
    %c0_2 = arith.constant 0 : index
    %c0_3 = arith.constant 0 : index
    %4 = vector.load %arg3[%c0_2, %c0_3] : memref<256x128xbf16, #tpu.memory_space<vmem>>, vector<256x128xbf16>
    %c0_4 = arith.constant 0 : index
    %c0_5 = arith.constant 0 : index
    %5 = vector.load %arg4[%c0_4, %c0_5] : memref<128x128xbf16, #tpu.memory_space<vmem>>, vector<128x128xbf16>
    %cst = arith.constant dense<0.000000e+00> : vector<256x128xf32>
    %6 = tpu.matmul %4, %5, %cst {dimension_numbers = #tpu.dot_dimension_numbers<[1], [0], [0], [1], [0, 0, 1, 1], [], []>} : vector<256x128xbf16>, vector<128x128xbf16>, vector<256x128xf32> -> vector<256x128xf32>
    %7 = arith.addf %3, %6 : vector<256x128xf32>
    %c0_6 = arith.constant 0 : index
    %c0_7 = arith.constant 0 : index
    %8 = vector.load %arg8[%c0_6, %c0_7] : memref<256x128xf32, #tpu.memory_space<vmem>>, vector<256x128xf32>
    tpu.vector_store %arg8[%c0_6, %c0_7], %7 {strides = array<i32>} : memref<256x128xf32, #tpu.memory_space<vmem>>, vector<256x128xf32>,
    %c0_i32_8 = arith.constant 0 : i32
    %9 = arith.cmpi eq, %arg2, %c0_i32_8 : i32
    %10 = arith.extui %9 : i1 to i32
    %c0_i32_9 = arith.constant 0 : i32
    %11 = arith.cmpi ne, %10, %c0_i32_9 : i32
    scf.if %11 {
      %c0_10 = arith.constant 0 : index
      %c0_11 = arith.constant 0 : index
      %12 = vector.load %arg8[%c0_10, %c0_11] : memref<256x128xf32, #tpu.memory_space<vmem>>, vector<256x128xf32>
      %c0_12 = arith.constant 0 : index
      %c0_13 = arith.constant 0 : index
      %13 = vector.load %arg5[%c0_12, %c0_13] : memref<256x128xf32, #tpu.memory_space<vmem>>, vector<256x128xf32>
      tpu.vector_store %arg5[%c0_12, %c0_13], %12 {strides = array<i32>} : memref<256x128xf32, #tpu.memory_space<vmem>>, vector<256x128xf32>,
      %cst_14 = arith.constant dense<0.000000e+00> : vector<128xf32>
      %14 = vector.multi_reduction <add>, %12, %cst_14 [0] : vector<256x128xf32> to vector<128xf32>
      %15 = vector.shape_cast %14 : vector<128xf32> to vector<1x128xf32>
      %16 = arith.mulf %12, %12 : vector<256x128xf32>
      %cst_15 = arith.constant dense<0.000000e+00> : vector<128xf32>
      %17 = vector.multi_reduction <add>, %16, %cst_15 [0] : vector<256x128xf32> to vector<128xf32>
      %18 = vector.shape_cast %17 : vector<128xf32> to vector<1x128xf32>
      %19 = vector.shape_cast %15 : vector<1x128xf32> to vector<1x1x128xf32>
      %c0_16 = arith.constant 0 : index
      %c0_17 = arith.constant 0 : index
      %c0_18 = arith.constant 0 : index
      %20 = vector.load %arg6[%c0_16, %c0_17, %c0_18] : memref<1x1x128xf32, #tpu.memory_space<vmem>>, vector<1x1x128xf32>
      tpu.vector_store %arg6[%c0_16, %c0_17, %c0_18], %19 {strides = array<i32>} : memref<1x1x128xf32, #tpu.memory_space<vmem>>, vector<1x1x128xf32>,
      %21 = vector.shape_cast %18 : vector<1x128xf32> to vector<1x1x128xf32>
      %c0_19 = arith.constant 0 : index
      %c0_20 = arith.constant 0 : index
      %c0_21 = arith.constant 0 : index
      %22 = vector.load %arg7[%c0_19, %c0_20, %c0_21] : memref<1x1x128xf32, #tpu.memory_space<vmem>>, vector<1x1x128xf32>
      tpu.vector_store %arg7[%c0_19, %c0_20, %c0_21], %21 {strides = array<i32>} : memref<1x1x128xf32, #tpu.memory_space<vmem>>, vector<1x1x128xf32>,
    } else {
    }
    return
  }
  func.func @transform_0(%arg0: i32, %arg1: i32, %arg2: i32) -> (i32, i32) {
    %c0_i32 = arith.constant 0 : i32
    return %arg0, %arg2 : i32, i32
  }
  func.func @transform_1(%arg0: i32, %arg1: i32, %arg2: i32) -> (i32, i32) {
    %c0_i32 = arith.constant 0 : i32
    return %arg2, %arg1 : i32, i32
  }
  func.func @transform_2(%arg0: i32, %arg1: i32, %arg2: i32) -> (i32, i32) {
    %c0_i32 = arith.constant 0 : i32
    return %arg0, %arg1 : i32, i32
  }
  func.func @transform_3(%arg0: i32, %arg1: i32, %arg2: i32) -> (i32, i32, i32) {
    %c0_i32 = arith.constant 0 : i32
    %c0_i32_0 = arith.constant 0 : i32
    return %arg0, %c0_i32, %arg1 : i32, i32, i32
  }
  func.func @transform_4(%arg0: i32, %arg1: i32, %arg2: i32) -> (i32, i32, i32) {
    %c0_i32 = arith.constant 0 : i32
    %c0_i32_0 = arith.constant 0 : i32
    return %arg0, %c0_i32, %arg1 : i32, i32, i32
  }
}

</mosaic_0001>

<bundles_post_ra>
// kernel: residual_forward.6
= control target key start
LH: loop header
LB: loop body
LE: loop exit
PB: predicated region body
PF: predicated region fallthrough
CT: control target
= control target key end

     0   :  { %s896_s0 = inlined_call_operand.vmem [shape: f32[512,128], index: 0, kind: input, shape index: {}, may-alias: {0,3}]   ;;  %s897_s1 = inlined_call_operand.vmem [shape: f32[1,128], index: 1, kind: input, shape index: {}]   ;;  %s898_s2 = inlined_call_operand.vmem [shape: f32[1,128], index: 2, kind: input, shape index: {}]   ;;  %s899_s3 = inlined_call_operand.vmem [shape: f32[512,128], index: 3, kind: output, shape index: {}, may-alias: {0,3}]  }
   0x1   :  { %v14_v0 = vld [vmem:[%s896_s0] sm:$0xff]  ;;  %v15_v4 = vld [vmem:[%s896_s0 + $0x8] sm:$0xff]  ;;  %v16_v5 = vld [vmem:[%s896_s0 + $0x10] sm:$0xff] }
   0x2   :  { %v380_v1 = vld [vmem:[%s897_s1] ss:$0 sm:$0xff]  ;;  %v17_v6 = vld [vmem:[%s896_s0 + $0x18] sm:$0xff]  ;;  %v19_v11 = vld [vmem:[%s896_s0 + $0x28] sm:$0xff] }
   0x3   :  { %v385_v2 = vld [vmem:[%s898_s2] ss:$0 sm:$0xff]  ;;  %v85_v3 = vmul.f32 %v380_v1, %v14_v0  ;;  %v86_v7 = vmul.f32 %v380_v1, %v15_v4  ;;  %v87_v8 = vmul.f32 %v380_v1, %v16_v5  ;;  %v88_v9 = vmul.f32 %v380_v1, %v17_v6  ;;  %v20_v12 = vld [vmem:[%s896_s0 + $0x30] sm:$0xff]  ;;  %v21_v17 = vld [vmem:[%s896_s0 + $0x38] sm:$0xff] }
   0x4   :  { %v18_v10 = vld [vmem:[%s896_s0 + $0x20] sm:$0xff]  ;;  %v90_v15 = vmul.f32 %v380_v1, %v19_v11  ;;  %v91_v16 = vmul.f32 %v380_v1, %v20_v12  ;;  %v92_v21 = vmul.f32 %v380_v1, %v21_v17  ;;  %v23_v27 = vld [vmem:[%s896_s0 + $0x48] sm:$0xff]  ;;  %v24_v28 = vld [vmem:[%s896_s0 + $0x50] sm:$0xff] }
   0x5   :  { %v156_v13 = vadd.f32 %v385_v2, %v85_v3  ;;  %v89_v14 = vmul.f32 %v380_v1, %v18_v10  ;;  %v157_v18 = vadd.f32 %v385_v2, %v86_v7  ;;  %v158_v19 = vadd.f32 %v385_v2, %v87_v8  ;;  %v22_v22 = vld [vmem:[%s896_s0 + $0x40] sm:$0xff]  ;;  %v25_v29 = vld [vmem:[%s896_s0 + $0x58] sm:$0xff]  ;;  %v27_v35 = vld [vmem:[%s896_s0 + $0x68] sm:$0xff] }
   0x6   :  { %v159_v20 = vadd.f32 %v385_v2, %v88_v9  ;;  %v161_v25 = vadd.f32 %v385_v2, %v90_v15  ;;  %v162_v26 = vadd.f32 %v385_v2, %v91_v16  ;;  %v163_v33 = vadd.f32 %v385_v2, %v92_v21  ;;  %v26_v34 = vld [vmem:[%s896_s0 + $0x60] sm:$0xff]  ;;  %v28_v36 = vld [vmem:[%s896_s0 + $0x70] sm:$0xff] }
   0x7   :  { %v220_v23 = vmax.f32 %v156_v13, 0.0  ;;  %v160_v24 = vadd.f32 %v385_v2, %v89_v14  ;;  %v221_v30 = vmax.f32 %v157_v18, 0.0  ;;  %v222_v31 = vmax.f32 %v158_v19, 0.0 }
   0x8   :  { %v223_v32 = vmax.f32 %v159_v20, 0.0  ;;  %v225_v38 = vmax.f32 %v161_v25, 0.0  ;;  %v226_v39 = vmax.f32 %v162_v26, 0.0  ;;  %v93_v40 = vmul.f32 %v380_v1, %v22_v22 }
   0x9   :  { %284 = vst [vmem:[%s899_s3] sm:$0xff] %v220_v23  ;;  %v224_v37 = vmax.f32 %v160_v24, 0.0  ;;  %v227_v42 = vmax.f32 %v163_v33, 0.0  ;;  %v94_v43 = vmul.f32 %v380_v1, %v23_v27  ;;  %v95_v44 = vmul.f32 %v380_v1, %v24_v28 }
   0xa   :  { %v96_v45 = vmul.f32 %v380_v1, %v25_v29  ;;  %v164_v46 = vadd.f32 %v385_v2, %v93_v40  ;;  %v97_v47 = vmul.f32 %v380_v1, %v26_v34  ;;  %v98_v48 = vmul.f32 %v380_v1, %v27_v35 }
   0xb   :  { %v99_v49 = vmul.f32 %v380_v1, %v28_v36  ;;  %v165_v50 = vadd.f32 %v385_v2, %v94_v43  ;;  %v166_v51 = vadd.f32 %v385_v2, %v95_v44 }
   0xc   :  { %v167_v52 = vadd.f32 %v385_v2, %v96_v45  ;;  %v228_v55 = vmax.f32 %v164_v46, 0.0  ;;  %v168_v56 = vadd.f32 %v385_v2, %v97_v47  ;;  %v169_v57 = vadd.f32 %v385_v2, %v98_v48 }
   0xd   :  { %v170_v58 = vadd.f32 %v385_v2, %v99_v49  ;;  %v229_v62 = vmax.f32 %v165_v50, 0.0  ;;  %v230_v63 = vmax.f32 %v166_v51, 0.0 }
   0xe   :  { %v231_v0 = vmax.f32 %v167_v52, 0.0  ;;  %v232_v7 = vmax.f32 %v168_v56, 0.0  ;;  %v233_v8 = vmax.f32 %v169_v57, 0.0 }
   0xf   :  { %v234_v9 = vmax.f32 %v170_v58, 0.0 }
  0x10   :  { %v29_v41 = vld [vmem:[%s896_s0 + $0x78] sm:$0xff] }
  0x11   :  { %285 = vst [vmem:[%s899_s3 + $0x8] sm:$0xff] %v221_v30  ;;  %286 = vst [vmem:[%s899_s3 + $0x10] sm:$0xff] %v222_v31  ;;  %v100_v53 = vmul.f32 %v380_v1, %v29_v41 }
  0x12   :  { %287 = vst [vmem:[%s899_s3 + $0x18] sm:$0xff] %v223_v32  ;;  %288 = vst [vmem:[%s899_s3 + $0x20] sm:$0xff] %v224_v37 }
  0x13   :  { %289 = vst [vmem:[%s899_s3 + $0x28] sm:$0xff] %v225_v38  ;;  %290 = vst [vmem:[%s899_s3 + $0x30] sm:$0xff] %v226_v39  ;;  %v171_v3 = vadd.f32 %v385_v2, %v100_v53 }
  0x14   :  { %291 = vst [vmem:[%s899_s3 + $0x38] sm:$0xff] %v227_v42 }
  0x15   :  { %v235_v12 = vmax.f32 %v171_v3, 0.0 }
  0x1b   :  { %v30_v54 = vld [vmem:[%s896_s0 + $0x80] sm:$0xff]  ;;  %v31_v59 = vld [vmem:[%s896_s0 + $0x88] sm:$0xff]  ;;  %v32_v60 = vld [vmem:[%s896_s0 + $0x90] sm:$0xff] }
  0x1c   :  { %v33_v61 = vld [vmem:[%s896_s0 + $0x98] sm:$0xff]  ;;  %v34_v4 = vld [vmem:[%s896_s0 + $0xa0] sm:$0xff]  ;;  %v35_v5 = vld [vmem:[%s896_s0 + $0xa8] sm:$0xff]  ;;  %v101_v10 = vmul.f32 %v380_v1, %v30_v54  ;;  %v102_v13 = vmul.f32 %v380_v1, %v31_v59  ;;  %v103_v14 = vmul.f32 %v380_v1, %v32_v60 }
  0x1d   :  { %v36_v6 = vld [vmem:[%s896_s0 + $0xb0] sm:$0xff]  ;;  %v104_v15 = vmul.f32 %v380_v1, %v33_v61  ;;  %v105_v17 = vmul.f32 %v380_v1, %v34_v4  ;;  %v106_v18 = vmul.f32 %v380_v1, %v35_v5 }
  0x1e   :  { %292 = vst [vmem:[%s899_s3 + $0x40] sm:$0xff] %v228_v55  ;;  %v172_v16 = vadd.f32 %v385_v2, %v101_v10  ;;  %v107_v19 = vmul.f32 %v380_v1, %v36_v6  ;;  %v173_v20 = vadd.f32 %v385_v2, %v102_v13  ;;  %v174_v21 = vadd.f32 %v385_v2, %v103_v14 }
  0x1f   :  { %v175_v22 = vadd.f32 %v385_v2, %v104_v15  ;;  %v176_v26 = vadd.f32 %v385_v2, %v105_v17  ;;  %v177_v27 = vadd.f32 %v385_v2, %v106_v18 }
  0x20   :  { %v236_v25 = vmax.f32 %v172_v16, 0.0  ;;  %v178_v28 = vadd.f32 %v385_v2, %v107_v19  ;;  %v237_v32 = vmax.f32 %v173_v20, 0.0  ;;  %v238_v33 = vmax.f32 %v174_v21, 0.0 }
  0x21   :  { %v239_v34 = vmax.f32 %v175_v22, 0.0  ;;  %v240_v39 = vmax.f32 %v176_v26, 0.0  ;;  %v241_v40 = vmax.f32 %v177_v27, 0.0 }
  0x22   :  { %v242_v41 = vmax.f32 %v178_v28, 0.0 }
  0x25   :  { %v37_v11 = vld [vmem:[%s896_s0 + $0xb8] sm:$0xff] }
  0x26   :  { %293 = vst [vmem:[%s899_s3 + $0x48] sm:$0xff] %v229_v62  ;;  %294 = vst [vmem:[%s899_s3 + $0x50] sm:$0xff] %v230_v63  ;;  %v108_v23 = vmul.f32 %v380_v1, %v37_v11 }
  0x27   :  { %295 = vst [vmem:[%s899_s3 + $0x58] sm:$0xff] %v231_v0  ;;  %296 = vst [vmem:[%s899_s3 + $0x60] sm:$0xff] %v232_v7 }
  0x28   :  { %297 = vst [vmem:[%s899_s3 + $0x68] sm:$0xff] %v233_v8  ;;  %298 = vst [vmem:[%s899_s3 + $0x70] sm:$0xff] %v234_v9  ;;  %v179_v35 = vadd.f32 %v385_v2, %v108_v23 }
  0x29   :  { %299 = vst [vmem:[%s899_s3 + $0x78] sm:$0xff] %v235_v12 }
  0x2a   :  { %v243_v44 = vmax.f32 %v179_v35, 0.0 }
  0x30   :  { %v38_v24 = vld [vmem:[%s896_s0 + $0xc0] sm:$0xff]  ;;  %v39_v29 = vld [vmem:[%s896_s0 + $0xc8] sm:$0xff]  ;;  %v40_v30 = vld [vmem:[%s896_s0 + $0xd0] sm:$0xff] }
  0x31   :  { %v41_v31 = vld [vmem:[%s896_s0 + $0xd8] sm:$0xff]  ;;  %v42_v36 = vld [vmem:[%s896_s0 + $0xe0] sm:$0xff]  ;;  %v43_v37 = vld [vmem:[%s896_s0 + $0xe8] sm:$0xff]  ;;  %v109_v42 = vmul.f32 %v380_v1, %v38_v24  ;;  %v110_v45 = vmul.f32 %v380_v1, %v39_v29  ;;  %v111_v46 = vmul.f32 %v380_v1, %v40_v30 }
  0x32   :  { %v44_v38 = vld [vmem:[%s896_s0 + $0xf0] sm:$0xff]  ;;  %v112_v47 = vmul.f32 %v380_v1, %v41_v31  ;;  %v113_v49 = vmul.f32 %v380_v1, %v42_v36  ;;  %v114_v50 = vmul.f32 %v380_v1, %v43_v37 }
  0x33   :  { %300 = vst [vmem:[%s899_s3 + $0x80] sm:$0xff] %v236_v25  ;;  %v180_v48 = vadd.f32 %v385_v2, %v109_v42  ;;  %v115_v51 = vmul.f32 %v380_v1, %v44_v38  ;;  %v181_v52 = vadd.f32 %v385_v2, %v110_v45  ;;  %v182_v53 = vadd.f32 %v385_v2, %v111_v46 }
  0x34   :  { %v183_v54 = vadd.f32 %v385_v2, %v112_v47  ;;  %v184_v58 = vadd.f32 %v385_v2, %v113_v49  ;;  %v185_v59 = vadd.f32 %v385_v2, %v114_v50 }
  0x35   :  { %v244_v57 = vmax.f32 %v180_v48, 0.0  ;;  %v186_v60 = vadd.f32 %v385_v2, %v115_v51  ;;  %v245_v0 = vmax.f32 %v181_v52, 0.0  ;;  %v246_v3 = vmax.f32 %v182_v53, 0.0 }
  0x36   :  { %v247_v4 = vmax.f32 %v183_v54, 0.0  ;;  %v248_v9 = vmax.f32 %v184_v58, 0.0  ;;  %v249_v10 = vmax.f32 %v185_v59, 0.0 }
  0x37   :  { %v250_v11 = vmax.f32 %v186_v60, 0.0 }
  0x3a   :  { %v45_v43 = vld [vmem:[%s896_s0 + $0xf8] sm:$0xff] }
  0x3b   :  { %301 = vst [vmem:[%s899_s3 + $0x88] sm:$0xff] %v237_v32  ;;  %302 = vst [vmem:[%s899_s3 + $0x90] sm:$0xff] %v238_v33  ;;  %v116_v55 = vmul.f32 %v380_v1, %v45_v43 }
  0x3c   :  { %303 = vst [vmem:[%s899_s3 + $0x98] sm:$0xff] %v239_v34  ;;  %304 = vst [vmem:[%s899_s3 + $0xa0] sm:$0xff] %v240_v39 }
  0x3d   :  { %305 = vst [vmem:[%s899_s3 + $0xa8] sm:$0xff] %v241_v40  ;;  %306 = vst [vmem:[%s899_s3 + $0xb0] sm:$0xff] %v242_v41  ;;  %v187_v5 = vadd.f32 %v385_v2, %v116_v55 }
  0x3e   :  { %307 = vst [vmem:[%s899_s3 + $0xb8] sm:$0xff] %v243_v44 }
  0x3f   :  { %v251_v14 = vmax.f32 %v187_v5, 0.0 }
  0x45   :  { %v46_v56 = vld [vmem:[%s896_s0 + $0x100] sm:$0xff]  ;;  %v47_v61 = vld [vmem:[%s896_s0 + $0x108] sm:$0xff]  ;;  %v48_v62 = vld [vmem:[%s896_s0 + $0x110] sm:$0xff] }
  0x46   :  { %v49_v63 = vld [vmem:[%s896_s0 + $0x118] sm:$0xff]  ;;  %v50_v6 = vld [vmem:[%s896_s0 + $0x120] sm:$0xff]  ;;  %v51_v7 = vld [vmem:[%s896_s0 + $0x128] sm:$0xff]  ;;  %v117_v12 = vmul.f32 %v380_v1, %v46_v56  ;;  %v118_v15 = vmul.f32 %v380_v1, %v47_v61  ;;  %v119_v16 = vmul.f32 %v380_v1, %v48_v62 }
  0x47   :  { %v52_v8 = vld [vmem:[%s896_s0 + $0x130] sm:$0xff]  ;;  %v120_v17 = vmul.f32 %v380_v1, %v49_v63  ;;  %v121_v19 = vmul.f32 %v380_v1, %v50_v6  ;;  %v122_v20 = vmul.f32 %v380_v1, %v51_v7 }
  0x48   :  { %308 = vst [vmem:[%s899_s3 + $0xc0] sm:$0xff] %v244_v57  ;;  %v188_v18 = vadd.f32 %v385_v2, %v117_v12  ;;  %v123_v21 = vmul.f32 %v380_v1, %v52_v8  ;;  %v189_v22 = vadd.f32 %v385_v2, %v118_v15  ;;  %v190_v23 = vadd.f32 %v385_v2, %v119_v16 }
  0x49   :  { %v191_v24 = vadd.f32 %v385_v2, %v120_v17  ;;  %v192_v28 = vadd.f32 %v385_v2, %v121_v19  ;;  %v193_v29 = vadd.f32 %v385_v2, %v122_v20 }
  0x4a   :  { %v252_v27 = vmax.f32 %v188_v18, 0.0  ;;  %v194_v30 = vadd.f32 %v385_v2, %v123_v21  ;;  %v253_v34 = vmax.f32 %v189_v22, 0.0  ;;  %v254_v35 = vmax.f32 %v190_v23, 0.0 }
  0x4b   :  { %v255_v36 = vmax.f32 %v191_v24, 0.0  ;;  %v256_v41 = vmax.f32 %v192_v28, 0.0  ;;  %v257_v42 = vmax.f32 %v193_v29, 0.0 }
  0x4c   :  { %v258_v43 = vmax.f32 %v194_v30, 0.0 }
  0x4f   :  { %v53_v13 = vld [vmem:[%s896_s0 + $0x138] sm:$0xff] }
  0x50   :  { %309 = vst [vmem:[%s899_s3 + $0xc8] sm:$0xff] %v245_v0  ;;  %310 = vst [vmem:[%s899_s3 + $0xd0] sm:$0xff] %v246_v3  ;;  %v124_v25 = vmul.f32 %v380_v1, %v53_v13 }
  0x51   :  { %311 = vst [vmem:[%s899_s3 + $0xd8] sm:$0xff] %v247_v4  ;;  %312 = vst [vmem:[%s899_s3 + $0xe0] sm:$0xff] %v248_v9 }
  0x52   :  { %313 = vst [vmem:[%s899_s3 + $0xe8] sm:$0xff] %v249_v10  ;;  %314 = vst [vmem:[%s899_s3 + $0xf0] sm:$0xff] %v250_v11  ;;  %v195_v37 = vadd.f32 %v385_v2, %v124_v25 }
  0x53   :  { %315 = vst [vmem:[%s899_s3 + $0xf8] sm:$0xff] %v251_v14 }
  0x54   :  { %v259_v46 = vmax.f32 %v195_v37, 0.0 }
  0x5a   :  { %v54_v26 = vld [vmem:[%s896_s0 + $0x140] sm:$0xff]  ;;  %v55_v31 = vld [vmem:[%s896_s0 + $0x148] sm:$0xff]  ;;  %v56_v32 = vld [vmem:[%s896_s0 + $0x150] sm:$0xff] }
  0x5b   :  { %v57_v33 = vld [vmem:[%s896_s0 + $0x158] sm:$0xff]  ;;  %v58_v38 = vld [vmem:[%s896_s0 + $0x160] sm:$0xff]  ;;  %v59_v39 = vld [vmem:[%s896_s0 + $0x168] sm:$0xff]  ;;  %v125_v44 = vmul.f32 %v380_v1, %v54_v26  ;;  %v126_v47 = vmul.f32 %v380_v1, %v55_v31  ;;  %v127_v48 = vmul.f32 %v380_v1, %v56_v32 }
  0x5c   :  { %v60_v40 = vld [vmem:[%s896_s0 + $0x170] sm:$0xff]  ;;  %v128_v49 = vmul.f32 %v380_v1, %v57_v33  ;;  %v129_v51 = vmul.f32 %v380_v1, %v58_v38  ;;  %v130_v52 = vmul.f32 %v380_v1, %v59_v39 }
  0x5d   :  { %316 = vst [vmem:[%s899_s3 + $0x100] sm:$0xff] %v252_v27  ;;  %v196_v50 = vadd.f32 %v385_v2, %v125_v44  ;;  %v131_v53 = vmul.f32 %v380_v1, %v60_v40  ;;  %v197_v54 = vadd.f32 %v385_v2, %v126_v47  ;;  %v198_v55 = vadd.f32 %v385_v2, %v127_v48 }
  0x5e   :  { %v199_v56 = vadd.f32 %v385_v2, %v128_v49  ;;  %v200_v60 = vadd.f32 %v385_v2, %v129_v51  ;;  %v201_v61 = vadd.f32 %v385_v2, %v130_v52 }
  0x5f   :  { %v260_v59 = vmax.f32 %v196_v50, 0.0  ;;  %v202_v62 = vadd.f32 %v385_v2, %v131_v53  ;;  %v261_v4 = vmax.f32 %v197_v54, 0.0  ;;  %v262_v5 = vmax.f32 %v198_v55, 0.0 }
  0x60   :  { %v263_v6 = vmax.f32 %v199_v56, 0.0  ;;  %v264_v11 = vmax.f32 %v200_v60, 0.0  ;;  %v265_v12 = vmax.f32 %v201_v61, 0.0 }
  0x61   :  { %v266_v13 = vmax.f32 %v202_v62, 0.0 }
  0x64   :  { %v61_v45 = vld [vmem:[%s896_s0 + $0x178] sm:$0xff] }
  0x65   :  { %317 = vst [vmem:[%s899_s3 + $0x108] sm:$0xff] %v253_v34  ;;  %318 = vst [vmem:[%s899_s3 + $0x110] sm:$0xff] %v254_v35  ;;  %v132_v57 = vmul.f32 %v380_v1, %v61_v45 }
  0x66   :  { %319 = vst [vmem:[%s899_s3 + $0x118] sm:$0xff] %v255_v36  ;;  %320 = vst [vmem:[%s899_s3 + $0x120] sm:$0xff] %v256_v41 }
  0x67   :  { %321 = vst [vmem:[%s899_s3 + $0x128] sm:$0xff] %v257_v42  ;;  %322 = vst [vmem:[%s899_s3 + $0x130] sm:$0xff] %v258_v43  ;;  %v203_v7 = vadd.f32 %v385_v2, %v132_v57 }
  0x68   :  { %323 = vst [vmem:[%s899_s3 + $0x138] sm:$0xff] %v259_v46 }
  0x69   :  { %v267_v16 = vmax.f32 %v203_v7, 0.0 }
  0x6f   :  { %v62_v58 = vld [vmem:[%s896_s0 + $0x180] sm:$0xff]  ;;  %v63_v63 = vld [vmem:[%s896_s0 + $0x188] sm:$0xff]  ;;  %v64_v0 = vld [vmem:[%s896_s0 + $0x190] sm:$0xff] }
  0x70   :  { %v65_v3 = vld [vmem:[%s896_s0 + $0x198] sm:$0xff]  ;;  %v66_v8 = vld [vmem:[%s896_s0 + $0x1a0] sm:$0xff]  ;;  %v67_v9 = vld [vmem:[%s896_s0 + $0x1a8] sm:$0xff]  ;;  %v133_v14 = vmul.f32 %v380_v1, %v62_v58  ;;  %v134_v17 = vmul.f32 %v380_v1, %v63_v63  ;;  %v135_v18 = vmul.f32 %v380_v1, %v64_v0 }
  0x71   :  { %v68_v10 = vld [vmem:[%s896_s0 + $0x1b0] sm:$0xff]  ;;  %v136_v19 = vmul.f32 %v380_v1, %v65_v3  ;;  %v137_v21 = vmul.f32 %v380_v1, %v66_v8  ;;  %v138_v22 = vmul.f32 %v380_v1, %v67_v9 }
  0x72   :  { %324 = vst [vmem:[%s899_s3 + $0x140] sm:$0xff] %v260_v59  ;;  %v204_v20 = vadd.f32 %v385_v2, %v133_v14  ;;  %v139_v23 = vmul.f32 %v380_v1, %v68_v10  ;;  %v205_v24 = vadd.f32 %v385_v2, %v134_v17  ;;  %v206_v25 = vadd.f32 %v385_v2, %v135_v18 }
  0x73   :  { %v207_v26 = vadd.f32 %v385_v2, %v136_v19  ;;  %v208_v30 = vadd.f32 %v385_v2, %v137_v21  ;;  %v209_v31 = vadd.f32 %v385_v2, %v138_v22 }
  0x74   :  { %v268_v29 = vmax.f32 %v204_v20, 0.0  ;;  %v210_v32 = vadd.f32 %v385_v2, %v139_v23  ;;  %v269_v36 = vmax.f32 %v205_v24, 0.0  ;;  %v270_v37 = vmax.f32 %v206_v25, 0.0 }
  0x75   :  { %v271_v38 = vmax.f32 %v207_v26, 0.0  ;;  %v272_v43 = vmax.f32 %v208_v30, 0.0  ;;  %v273_v44 = vmax.f32 %v209_v31, 0.0 }
  0x76   :  { %v274_v45 = vmax.f32 %v210_v32, 0.0 }
  0x79   :  { %v69_v15 = vld [vmem:[%s896_s0 + $0x1b8] sm:$0xff] }
  0x7a   :  { %325 = vst [vmem:[%s899_s3 + $0x148] sm:$0xff] %v261_v4  ;;  %326 = vst [vmem:[%s899_s3 + $0x150] sm:$0xff] %v262_v5  ;;  %v140_v27 = vmul.f32 %v380_v1, %v69_v15 }
  0x7b   :  { %327 = vst [vmem:[%s899_s3 + $0x158] sm:$0xff] %v263_v6  ;;  %328 = vst [vmem:[%s899_s3 + $0x160] sm:$0xff] %v264_v11 }
  0x7c   :  { %329 = vst [vmem:[%s899_s3 + $0x168] sm:$0xff] %v265_v12  ;;  %330 = vst [vmem:[%s899_s3 + $0x170] sm:$0xff] %v266_v13  ;;  %v211_v39 = vadd.f32 %v385_v2, %v140_v27 }
  0x7d   :  { %331 = vst [vmem:[%s899_s3 + $0x178] sm:$0xff] %v267_v16 }
  0x7e   :  { %v275_v48 = vmax.f32 %v211_v39, 0.0 }
  0x84   :  { %v70_v28 = vld [vmem:[%s896_s0 + $0x1c0] sm:$0xff]  ;;  %v71_v33 = vld [vmem:[%s896_s0 + $0x1c8] sm:$0xff]  ;;  %v72_v34 = vld [vmem:[%s896_s0 + $0x1d0] sm:$0xff] }
  0x85   :  { %v73_v35 = vld [vmem:[%s896_s0 + $0x1d8] sm:$0xff]  ;;  %v74_v40 = vld [vmem:[%s896_s0 + $0x1e0] sm:$0xff]  ;;  %v75_v41 = vld [vmem:[%s896_s0 + $0x1e8] sm:$0xff]  ;;  %v141_v46 = vmul.f32 %v380_v1, %v70_v28  ;;  %v142_v49 = vmul.f32 %v380_v1, %v71_v33  ;;  %v143_v50 = vmul.f32 %v380_v1, %v72_v34 }
  0x86   :  { %v76_v42 = vld [vmem:[%s896_s0 + $0x1f0] sm:$0xff]  ;;  %v144_v51 = vmul.f32 %v380_v1, %v73_v35  ;;  %v145_v53 = vmul.f32 %v380_v1, %v74_v40  ;;  %v146_v54 = vmul.f32 %v380_v1, %v75_v41 }
  0x87   :  { %332 = vst [vmem:[%s899_s3 + $0x180] sm:$0xff] %v268_v29  ;;  %v212_v52 = vadd.f32 %v385_v2, %v141_v46  ;;  %v147_v55 = vmul.f32 %v380_v1, %v76_v42  ;;  %v213_v56 = vadd.f32 %v385_v2, %v142_v49  ;;  %v214_v57 = vadd.f32 %v385_v2, %v143_v50 }
  0x88   :  { %v215_v58 = vadd.f32 %v385_v2, %v144_v51  ;;  %v216_v61 = vadd.f32 %v385_v2, %v145_v53  ;;  %v217_v62 = vadd.f32 %v385_v2, %v146_v54 }
  0x89   :  { %v276_v60 = vmax.f32 %v212_v52, 0.0  ;;  %v218_v63 = vadd.f32 %v385_v2, %v147_v55  ;;  %v277_v0 = vmax.f32 %v213_v56, 0.0  ;;  %v278_v3 = vmax.f32 %v214_v57, 0.0 }
  0x8a   :  { %v279_v4 = vmax.f32 %v215_v58, 0.0  ;;  %v280_v6 = vmax.f32 %v216_v61, 0.0  ;;  %v281_v7 = vmax.f32 %v217_v62, 0.0 }
  0x8b   :  { %v282_v8 = vmax.f32 %v218_v63, 0.0 }
  0x8e   :  { %v77_v47 = vld [vmem:[%s896_s0 + $0x1f8] sm:$0xff] }
  0x8f   :  { %333 = vst [vmem:[%s899_s3 + $0x188] sm:$0xff] %v269_v36  ;;  %334 = vst [vmem:[%s899_s3 + $0x190] sm:$0xff] %v270_v37  ;;  %v148_v59 = vmul.f32 %v380_v1, %v77_v47 }
  0x90   :  { %335 = vst [vmem:[%s899_s3 + $0x198] sm:$0xff] %v271_v38  ;;  %336 = vst [vmem:[%s899_s3 + $0x1a0] sm:$0xff] %v272_v43 }
  0x91   :  { %337 = vst [vmem:[%s899_s3 + $0x1a8] sm:$0xff] %v273_v44  ;;  %338 = vst [vmem:[%s899_s3 + $0x1b0] sm:$0xff] %v274_v45  ;;  %v219_v5 = vadd.f32 %v385_v2, %v148_v59 }
  0x92   :  { %339 = vst [vmem:[%s899_s3 + $0x1b8] sm:$0xff] %v275_v48  ;;  %340 = vst [vmem:[%s899_s3 + $0x1c0] sm:$0xff] %v276_v60 }
  0x93   :  { %341 = vst [vmem:[%s899_s3 + $0x1c8] sm:$0xff] %v277_v0  ;;  %342 = vst [vmem:[%s899_s3 + $0x1d0] sm:$0xff] %v278_v3  ;;  %v283_v1 = vmax.f32 %v219_v5, 0.0 }
  0x94   :  { %343 = vst [vmem:[%s899_s3 + $0x1d8] sm:$0xff] %v279_v4  ;;  %344 = vst [vmem:[%s899_s3 + $0x1e0] sm:$0xff] %v280_v6 }
  0x95   :  { %345 = vst [vmem:[%s899_s3 + $0x1e8] sm:$0xff] %v281_v7  ;;  %346 = vst [vmem:[%s899_s3 + $0x1f0] sm:$0xff] %v282_v8 }
  0x96   :  { %347 = vst [vmem:[%s899_s3 + $0x1f8] sm:$0xff] %v283_v1 }

// kernel: residual_forward.5
= control target key start
LH: loop header
LB: loop body
LE: loop exit
PB: predicated region body
PF: predicated region fallthrough
CT: control target
= control target key end

     0   :  { %s1356_s15 = smov 0   ;;  %s1358_s16 = smov 0   ;;  %s1558_s0 = inlined_call_operand.vmem [shape: bf16[512,128], index: 0, kind: input, shape index: {}]   ;;  %s1559_s1 = inlined_call_operand.vmem [shape: bf16[128,128], index: 1, kind: input, shape index: {}]   ;;  %s1560_s2 = inlined_call_operand.vmem [shape: f32[512,128], index: 2, kind: output, shape index: {0}]   ;;  %s1561_s3 = inlined_call_operand.vmem [shape: f32[2,1,128], index: 3, kind: output, shape index: {1}]   ;;  %s1562_s4 = inlined_call_operand.vmem [shape: f32[2,1,128], index: 4, kind: output, shape index: {2}]  }
   0x1   :  { %s1360_s17 = smov 0  }
   0x2 LB: > { %s34_s18 = sadd.s32 1, %s1325_s16  ;;  %p1140_p0 = scmp.ge.s32.totalorder %s1329_s17, 1  ;;  %s1329_s17 = sphi %s1360_s17, %s15_s17   ;;  %s1325_s16 = sphi %s1358_s16, %s1564_s16   ;;  %s1321_s15 = sphi %s1356_s15, %s1563_s15  }
   0x3   : > { %p36_p1 = scmp.ge.s32.totalorder %s34_s18, 2  ;;  %p214_p2 = scmp.lt.s32.totalorder %s1329_s17, 3 }
   0x5   : > { %s1566_s18 = smov (%p36_p1, %s34_s18), 0  ;;  %p215_p3 = pnand %p1140_p0, %p214_p2 }
   0x6   : > { %v1283_v0 = vld [vmem:[%s1559_s1] sm:$0xff] (!%p215_p3)   ;;  %s1141_s21 = sshll.u32 (!%p215_p3), %s1321_s15, 5  ;;  %v1284_v1 = vld [vmem:[%s1559_s1 + $0x8] sm:$0xff] (!%p215_p3)   ;;  %v1285_v2 = vld [vmem:[%s1559_s1 + $0x10] sm:$0xff] (!%p215_p3)   ;;  %p293_p5 = scmp.lt.s32.totalorder (!%p215_p3), %s1321_s15, 1 }
   0x7   : > { %218 = sbr.rel (%p215_p3) target bundleno = 331 (0x14b), region = 28  ;;  %p267_p4 = scmp.lt.s32.totalorder (!%p215_p3), %s1141_s21, 63  ;;  %1195 = vmatprep.subr.bf16.mxu0 (!%p215_p3), %v1283_v0  ;;  %1243 = vmatprep.subr.bf16.mxu1 (!%p215_p3), %v1283_v0  ;;  %v1286_v3 = vld [vmem:[%s1559_s1 + $0x18] sm:$0xff] (!%p215_p3)   ;;  %v1287_v5 = vld [vmem:[%s1559_s1 + $0x20] sm:$0xff] (!%p215_p3)   ;;  %v1288_v6 = vld [vmem:[%s1559_s1 + $0x28] sm:$0xff] (!%p215_p3)  }
   0x8   : > { %1196 = vmatpush3.bf16.msra.mxu0 (!%p215_p3), %v1283_v0  ;;  %1251 = vmatpush3.bf16.msra.mxu1 (!%p215_p3), %v1283_v0  ;;  %v1289_v8 = vld [vmem:[%s1559_s1 + $0x30] sm:$0xff] (!%p215_p3)   ;;  %v1290_v9 = vld [vmem:[%s1559_s1 + $0x38] sm:$0xff] (!%p215_p3)  }
   0x9   : > { %1197 = vmatprep.subr.bf16.mxu0 (!%p215_p3), %v1284_v1  ;;  %1244 = vmatprep.subr.bf16.mxu1 (!%p215_p3), %v1284_v1 }
   0xc   : > { %1198 = vmatpush3.bf16.msra.mxu0 (!%p215_p3), %v1284_v1  ;;  %1252 = vmatpush3.bf16.msra.mxu1 (!%p215_p3), %v1284_v1 }
   0xd   : > { %1199 = vmatprep.subr.bf16.mxu0 (!%p215_p3), %v1285_v2  ;;  %1245 = vmatprep.subr.bf16.mxu1 (!%p215_p3), %v1285_v2 }
   0xe   : > { %s1568_s21 = smov (!%p267_p4, %s1141_s21), 63  ;;  %s1570_s15 = smov (!%p293_p5, %s1321_s15), 1 }
   0xf   : > { %s1142_s26 = sshll.u32 %s1568_s21, 2  ;;  %s1144_s14 = sshll.u32 %s1568_s21, 3 }
  0x10   : > { %s1392_s29 = scalar_lea.vmem %s1558_s0, %s1142_s26  ;;  %1200 = vmatpush3.bf16.msra.mxu0 %v1285_v2  ;;  %1253 = vmatpush3.bf16.msra.mxu1 %v1285_v2  ;;  %s1429_s22 = scalar_lea.vmem %s1560_s2, %s1144_s14 }
  0x11   : > { %v1291_v4 = vld [vmem:[%s1392_s29] sm:$0xff]   ;;  %1201 = vmatprep.subr.bf16.mxu0 %v1286_v3  ;;  %1246 = vmatprep.subr.bf16.mxu1 %v1286_v3  ;;  %v1292_v10 = vld [vmem:[%s1392_s29 + $0x8] sm:$0xff]   ;;  %v1293_v12 = vld [vmem:[%s1392_s29 + $0x10] sm:$0xff]   ;;  %s298_s24 = scalar_lea.vmem %s1561_s3, %s1570_s15  ;;  %s304_s27 = scalar_lea.vmem %s1562_s4, %s1570_s15 }
  0x12   : > { %1211 = vmatprep.mubr.bf16.mxu0 %v1291_v4  ;;  %v1299_v7 = vld [vmem:[%s1392_s29 + $0x40] sm:$0xff]   ;;  %v1300_v11 = vld [vmem:[%s1392_s29 + $0x48] sm:$0xff]   ;;  %v1301_v13 = vld [vmem:[%s1392_s29 + $0x50] sm:$0xff]  }
  0x13   : > { %1227 = vmatprep.mubr.bf16.mxu1 %v1299_v7  ;;  %v1294_v14 = vld [vmem:[%s1392_s29 + $0x18] sm:$0xff]   ;;  %v1295_v16 = vld [vmem:[%s1392_s29 + $0x20] sm:$0xff]   ;;  %v1296_v18 = vld [vmem:[%s1392_s29 + $0x28] sm:$0xff]  }
  0x14   : > { %1202 = vmatpush3.bf16.msra.mxu0 %v1286_v3  ;;  %1254 = vmatpush3.bf16.msra.mxu1 %v1286_v3  ;;  %v1302_v15 = vld [vmem:[%s1392_s29 + $0x58] sm:$0xff]   ;;  %v1303_v17 = vld [vmem:[%s1392_s29 + $0x60] sm:$0xff]   ;;  %v1304_v19 = vld [vmem:[%s1392_s29 + $0x68] sm:$0xff]  }
  0x15   : > { %1203 = vmatprep.subr.bf16.mxu0 %v1287_v5  ;;  %1247 = vmatprep.subr.bf16.mxu1 %v1287_v5  ;;  %v1297_v20 = vld [vmem:[%s1392_s29 + $0x30] sm:$0xff]   ;;  %v1298_v22 = vld [vmem:[%s1392_s29 + $0x38] sm:$0xff]  }
  0x16   : > { %v1305_v21 = vld [vmem:[%s1392_s29 + $0x70] sm:$0xff]   ;;  %v1306_v23 = vld [vmem:[%s1392_s29 + $0x78] sm:$0xff]  }
  0x18   : > { %1204 = vmatpush3.bf16.msra.mxu0 %v1287_v5  ;;  %1255 = vmatpush3.bf16.msra.mxu1 %v1287_v5 }
  0x19   : > { %1205 = vmatprep.subr.bf16.mxu0 %v1288_v6  ;;  %1248 = vmatprep.subr.bf16.mxu1 %v1288_v6 }
  0x1c   : > { %1206 = vmatpush3.bf16.msra.mxu0 %v1288_v6  ;;  %1256 = vmatpush3.bf16.msra.mxu1 %v1288_v6 }
  0x1d   : > { %1207 = vmatprep.subr.bf16.mxu0 %v1289_v8  ;;  %1249 = vmatprep.subr.bf16.mxu1 %v1289_v8 }
  0x20   : > { %1208 = vmatpush3.bf16.msra.mxu0 %v1289_v8  ;;  %1257 = vmatpush3.bf16.msra.mxu1 %v1289_v8 }
  0x21   : > { %1209 = vmatprep.subr.bf16.mxu0 %v1290_v9  ;;  %1250 = vmatprep.subr.bf16.mxu1 %v1290_v9 }
  0x24   : > { %1210 = vmatpush3.bf16.msra.mxu0 %v1290_v9  ;;  %1258 = vmatpush3.bf16.msra.mxu1 %v1290_v9 }
  0x27   : > { %1212 = vmatmul.mubr.bf16.vlgmr.msra.gmra.mrb[0].mxu0 %v1292_v10  ;;  %1228 = vmatmul.mubr.bf16.vlgmr.msra.gmra.mrb[0].mxu1 %v1300_v11 }
  0x28   : > { %1215 = vmatprep.mubr.bf16.mxu0 %v1293_v12  ;;  %1231 = vmatprep.mubr.bf16.mxu1 %v1301_v13 }
  0x2f   : > { %1216 = vmatmul.mubr.bf16.gmra.mrb[4].mxu0 %v1294_v14  ;;  %1232 = vmatmul.mubr.bf16.gmra.mrb[4].mxu1 %v1302_v15 }
  0x30   : > { %1219 = vmatprep.mubr.bf16.mxu0 %v1295_v16  ;;  %1235 = vmatprep.mubr.bf16.mxu1 %v1303_v17 }
  0x37   : > { %1220 = vmatmul.mubr.bf16.gmra.mrb[8].mxu0 %v1296_v18  ;;  %1236 = vmatmul.mubr.bf16.gmra.mrb[8].mxu1 %v1304_v19 }
  0x38   : > { %1223 = vmatprep.mubr.bf16.mxu0 %v1297_v20  ;;  %1239 = vmatprep.mubr.bf16.mxu1 %v1305_v21 }
  0x3f   : > { %1224 = vmatmul.mubr.bf16.gmra.mrb[12].mxu0 %v1298_v22  ;;  %1240 = vmatmul.mubr.bf16.gmra.mrb[12].mxu1 %v1306_v23 }
  0xfa   : > { %v1213_v24 = vpop.f32.mrb[0].mxu0  ;;  %v1431_v25 = vpop.f32.mrb[0].mxu1 }
  0xfb   : > { %828 = vst [vmem:[%s1429_s22 + $0x10] sm:$0xff] %v1213_v24  ;;  %v600_v26 = vpop.f32.mrb[1].mxu0  ;;  %844 = vst [vmem:[%s1429_s22 + $0x90] sm:$0xff] %v1431_v25  ;;  %v1436_v27 = vpop.f32.mrb[1].mxu1  ;;  %v897_v35 = vmul.f32 %v1213_v24, %v1213_v24 }
  0xfc   : > { %826 = vst [vmem:[%s1429_s22] sm:$0xff] %v600_v26  ;;  %v1214_v28 = vpop.f32.mrb[2].mxu0  ;;  %842 = vst [vmem:[%s1429_s22 + $0x80] sm:$0xff] %v1436_v27  ;;  %v1441_v29 = vpop.f32.mrb[2].mxu1  ;;  %v895_v32 = vmul.f32 %v600_v26, %v600_v26 }
  0xfd   : > { %829 = vst [vmem:[%s1429_s22 + $0x18] sm:$0xff] %v1214_v28  ;;  %v603_v30 = vpop.f32.mrb[3].mxu0  ;;  %845 = vst [vmem:[%s1429_s22 + $0x98] sm:$0xff] %v1441_v29  ;;  %v1446_v31 = vpop.f32.mrb[3].mxu1  ;;  %v898_v38 = vmul.f32 %v1214_v28, %v1214_v28 }
  0xfe   : > { %827 = vst [vmem:[%s1429_s22 + $0x8] sm:$0xff] %v603_v30  ;;  %v858_v33 = vadd.f32 %v603_v30, %v600_v26  ;;  %v896_v34 = vmul.f32 %v603_v30, %v603_v30  ;;  %843 = vst [vmem:[%s1429_s22 + $0x88] sm:$0xff] %v1446_v31 }
 0x100   : > { %v859_v36 = vadd.f32 %v1213_v24, %v858_v33  ;;  %v927_v37 = vadd.f32 %v896_v34, %v895_v32 }
 0x102   : > { %v928_v39 = vadd.f32 %v927_v37, %v897_v35  ;;  %v1217_v40 = vpop.f32.mrb[4].mxu0  ;;  %v860_v41 = vadd.f32 %v1214_v28, %v859_v36  ;;  %v1451_v42 = vpop.f32.mrb[4].mxu1 }
 0x103   : > { %832 = vst [vmem:[%s1429_s22 + $0x30] sm:$0xff] %v1217_v40  ;;  %v616_v43 = vpop.f32.mrb[5].mxu0  ;;  %848 = vst [vmem:[%s1429_s22 + $0xb0] sm:$0xff] %v1451_v42  ;;  %v1456_v44 = vpop.f32.mrb[5].mxu1  ;;  %v901_v55 = vmul.f32 %v1217_v40, %v1217_v40 }
 0x104   : > { %830 = vst [vmem:[%s1429_s22 + $0x20] sm:$0xff] %v616_v43  ;;  %v861_v45 = vadd.f32 %v860_v41, %v616_v43  ;;  %v899_v46 = vmul.f32 %v616_v43, %v616_v43  ;;  %v929_v47 = vadd.f32 %v928_v39, %v898_v38  ;;  %v1218_v48 = vpop.f32.mrb[6].mxu0  ;;  %846 = vst [vmem:[%s1429_s22 + $0xa0] sm:$0xff] %v1456_v44  ;;  %v1461_v49 = vpop.f32.mrb[6].mxu1 }
 0x105   : > { %833 = vst [vmem:[%s1429_s22 + $0x38] sm:$0xff] %v1218_v48  ;;  %v619_v50 = vpop.f32.mrb[7].mxu0  ;;  %849 = vst [vmem:[%s1429_s22 + $0xb8] sm:$0xff] %v1461_v49  ;;  %v1466_v51 = vpop.f32.mrb[7].mxu1  ;;  %v902_v58 = vmul.f32 %v1218_v48, %v1218_v48  ;;  %v911_v41 = vmul.f32 %v1436_v27, %v1436_v27 }
 0x106   : > { %v930_v52 = vadd.f32 %v929_v47, %v899_v46  ;;  %831 = vst [vmem:[%s1429_s22 + $0x28] sm:$0xff] %v619_v50  ;;  %v862_v53 = vadd.f32 %v861_v45, %v619_v50  ;;  %v900_v54 = vmul.f32 %v619_v50, %v619_v50  ;;  %847 = vst [vmem:[%s1429_s22 + $0xa8] sm:$0xff] %v1466_v51 }
 0x107   : > { %v913_v50 = vmul.f32 %v1431_v25, %v1431_v25 }
 0x108   : > { %v863_v56 = vadd.f32 %v1217_v40, %v862_v53  ;;  %v931_v57 = vadd.f32 %v930_v52, %v900_v54  ;;  %v914_v54 = vmul.f32 %v1441_v29, %v1441_v29 }
 0x10a   : > { %v932_v59 = vadd.f32 %v931_v57, %v901_v55  ;;  %v1221_v60 = vpop.f32.mrb[8].mxu0  ;;  %v864_v61 = vadd.f32 %v1218_v48, %v863_v56  ;;  %v1471_v62 = vpop.f32.mrb[8].mxu1  ;;  %v912_v48 = vmul.f32 %v1446_v31, %v1446_v31 }
 0x10b   : > { %836 = vst [vmem:[%s1429_s22 + $0x50] sm:$0xff] %v1221_v60  ;;  %v632_v63 = vpop.f32.mrb[9].mxu0  ;;  %852 = vst [vmem:[%s1429_s22 + $0xd0] sm:$0xff] %v1471_v62  ;;  %v1476_v0 = vpop.f32.mrb[9].mxu1  ;;  %v905_v11 = vmul.f32 %v1221_v60, %v1221_v60 }
 0x10c   : > { %834 = vst [vmem:[%s1429_s22 + $0x40] sm:$0xff] %v632_v63  ;;  %v865_v1 = vadd.f32 %v864_v61, %v632_v63  ;;  %v903_v2 = vmul.f32 %v632_v63, %v632_v63  ;;  %v933_v3 = vadd.f32 %v932_v59, %v902_v58  ;;  %v1222_v4 = vpop.f32.mrb[10].mxu0  ;;  %850 = vst [vmem:[%s1429_s22 + $0xc0] sm:$0xff] %v1476_v0  ;;  %v1481_v5 = vpop.f32.mrb[10].mxu1 }
 0x10d   : > { %837 = vst [vmem:[%s1429_s22 + $0x58] sm:$0xff] %v1222_v4  ;;  %v635_v6 = vpop.f32.mrb[11].mxu0  ;;  %853 = vst [vmem:[%s1429_s22 + $0xd8] sm:$0xff] %v1481_v5  ;;  %v1486_v7 = vpop.f32.mrb[11].mxu1  ;;  %v906_v14 = vmul.f32 %v1222_v4, %v1222_v4 }
 0x10e   : > { %v934_v8 = vadd.f32 %v933_v3, %v903_v2  ;;  %835 = vst [vmem:[%s1429_s22 + $0x48] sm:$0xff] %v635_v6  ;;  %v866_v9 = vadd.f32 %v865_v1, %v635_v6  ;;  %v904_v10 = vmul.f32 %v635_v6, %v635_v6  ;;  %851 = vst [vmem:[%s1429_s22 + $0xc8] sm:$0xff] %v1486_v7 }
 0x110   : > { %v867_v12 = vadd.f32 %v1221_v60, %v866_v9  ;;  %v935_v13 = vadd.f32 %v934_v8, %v904_v10  ;;  %v916_v60 = vmul.f32 %v1466_v51, %v1466_v51  ;;  %v920_v8 = vmul.f32 %v1486_v7, %v1486_v7 }
 0x112   : > { %v936_v15 = vadd.f32 %v935_v13, %v905_v11  ;;  %v1225_v16 = vpop.f32.mrb[12].mxu0  ;;  %v868_v17 = vadd.f32 %v1222_v4, %v867_v12  ;;  %v1491_v18 = vpop.f32.mrb[12].mxu1 }
 0x113   : > { %840 = vst [vmem:[%s1429_s22 + $0x70] sm:$0xff] %v1225_v16  ;;  %v648_v19 = vpop.f32.mrb[13].mxu0  ;;  %856 = vst [vmem:[%s1429_s22 + $0xf0] sm:$0xff] %v1491_v18  ;;  %v712_v20 = vpop.f32.mrb[13].mxu1  ;;  %v909_v35 = vmul.f32 %v1225_v16, %v1225_v16 }
 0x114   : > { %838 = vst [vmem:[%s1429_s22 + $0x60] sm:$0xff] %v648_v19  ;;  %v869_v21 = vadd.f32 %v868_v17, %v648_v19  ;;  %v907_v22 = vmul.f32 %v648_v19, %v648_v19  ;;  %v937_v23 = vadd.f32 %v936_v15, %v906_v14  ;;  %v1226_v24 = vpop.f32.mrb[14].mxu0  ;;  %854 = vst [vmem:[%s1429_s22 + $0xe0] sm:$0xff] %v712_v20  ;;  %v1242_v26 = vpop.f32.mrb[14].mxu1 }
 0x115   : > { %841 = vst [vmem:[%s1429_s22 + $0x78] sm:$0xff] %v1226_v24  ;;  %v651_v28 = vpop.f32.mrb[15].mxu0  ;;  %857 = vst [vmem:[%s1429_s22 + $0xf8] sm:$0xff] %v1242_v26  ;;  %v715_v30 = vpop.f32.mrb[15].mxu1  ;;  %v910_v38 = vmul.f32 %v1226_v24, %v1226_v24  ;;  %v923_v12 = vmul.f32 %v712_v20, %v712_v20  ;;  %v925_v17 = vmul.f32 %v1491_v18, %v1491_v18 }
 0x116   : > { %v938_v32 = vadd.f32 %v937_v23, %v907_v22  ;;  %839 = vst [vmem:[%s1429_s22 + $0x68] sm:$0xff] %v651_v28  ;;  %v870_v33 = vadd.f32 %v869_v21, %v651_v28  ;;  %v908_v34 = vmul.f32 %v651_v28, %v651_v28  ;;  %855 = vst [vmem:[%s1429_s22 + $0xe8] sm:$0xff] %v715_v30 }
 0x117   : > { %v926_v21 = vmul.f32 %v1242_v26, %v1242_v26 }
 0x118   : > { %v871_v36 = vadd.f32 %v1225_v16, %v870_v33  ;;  %v939_v37 = vadd.f32 %v938_v32, %v908_v34 }
 0x11a   : > { %v940_v39 = vadd.f32 %v939_v37, %v909_v35  ;;  %v872_v40 = vadd.f32 %v1226_v24, %v871_v36 }
 0x11c   : > { %v873_v43 = vadd.f32 %v872_v40, %v1436_v27  ;;  %v941_v45 = vadd.f32 %v940_v39, %v910_v38  ;;  %v915_v27 = vmul.f32 %v1456_v44, %v1456_v44 }
 0x11e   : > { %v942_v46 = vadd.f32 %v941_v45, %v911_v41  ;;  %v874_v47 = vadd.f32 %v873_v43, %v1446_v31 }
 0x120   : > { %v875_v52 = vadd.f32 %v1431_v25, %v874_v47  ;;  %v943_v53 = vadd.f32 %v942_v46, %v912_v48  ;;  %v917_v25 = vmul.f32 %v1451_v42, %v1451_v42 }
 0x122   : > { %v944_v55 = vadd.f32 %v943_v53, %v913_v50  ;;  %v876_v56 = vadd.f32 %v1441_v29, %v875_v52  ;;  %v918_v29 = vmul.f32 %v1461_v49, %v1461_v49 }
 0x124   : > { %v877_v57 = vadd.f32 %v876_v56, %v1456_v44  ;;  %v945_v58 = vadd.f32 %v944_v55, %v914_v54  ;;  %v919_v44 = vmul.f32 %v1476_v0, %v1476_v0 }
 0x126   : > { %v946_v59 = vadd.f32 %v945_v58, %v915_v27  ;;  %v878_v31 = vadd.f32 %v877_v57, %v1466_v51 }
 0x128   : > { %v879_v61 = vadd.f32 %v1451_v42, %v878_v31  ;;  %v947_v63 = vadd.f32 %v946_v59, %v916_v60  ;;  %v921_v42 = vmul.f32 %v1471_v62, %v1471_v62 }
 0x12a   : > { %v948_v1 = vadd.f32 %v947_v63, %v917_v25  ;;  %v880_v2 = vadd.f32 %v1461_v49, %v879_v61  ;;  %v922_v49 = vmul.f32 %v1481_v5, %v1481_v5 }
 0x12c   : > { %v881_v3 = vadd.f32 %v880_v2, %v1476_v0  ;;  %v949_v4 = vadd.f32 %v948_v1, %v918_v29 }
 0x12e   : > { %v950_v6 = vadd.f32 %v949_v4, %v919_v44  ;;  %v882_v51 = vadd.f32 %v881_v3, %v1486_v7  ;;  %v924_v7 = vmul.f32 %v715_v30, %v715_v30 }
 0x130   : > { %v883_v9 = vadd.f32 %v1471_v62, %v882_v51  ;;  %v951_v10 = vadd.f32 %v950_v6, %v920_v8 }
 0x132   : > { %v952_v11 = vadd.f32 %v951_v10, %v921_v42  ;;  %v884_v0 = vadd.f32 %v1481_v5, %v883_v9 }
 0x134   : > { %v885_v13 = vadd.f32 %v884_v0, %v712_v20  ;;  %v953_v14 = vadd.f32 %v952_v11, %v922_v49 }
 0x136   : > { %v954_v15 = vadd.f32 %v953_v14, %v923_v12  ;;  %v886_v16 = vadd.f32 %v885_v13, %v715_v30 }
 0x138   : > { %v887_v62 = vadd.f32 %v1491_v18, %v886_v16  ;;  %v955_v19 = vadd.f32 %v954_v15, %v924_v7 }
 0x13a   : > { %v888_v22 = vadd.f32 %v1242_v26, %v887_v62  ;;  %v956_v23 = vadd.f32 %v955_v19, %v925_v17 }
 0x13c   : > { %v889_v24 = vrot.slane %v888_v22, 4  ;;  %v957_v28 = vadd.f32 %v956_v23, %v926_v21 }
 0x13e   : > { %v890_v5 = vadd.f32 %v889_v24, %v888_v22  ;;  %v958_v32 = vrot.slane %v957_v28, 4 }
 0x140   : > { %v891_v20 = vrot.slane %v890_v5, 2  ;;  %v959_v33 = vadd.f32 %v958_v32, %v957_v28 }
 0x142   : > { %v892_v34 = vadd.f32 %v891_v20, %v890_v5  ;;  %v960_v35 = vrot.slane %v959_v33, 2 }
 0x144   : > { %v893_v30 = vrot.slane %v892_v34, 1  ;;  %v961_v36 = vadd.f32 %v960_v35, %v959_v33 }
 0x146   : > { %v894_v18 = vadd.f32 %v893_v30, %v892_v34  ;;  %v962_v37 = vrot.slane %v961_v36, 1 }
 0x148   : > { %v963_v26 = vadd.f32 %v962_v37, %v961_v36  ;;  %964 = vst [vmem:[%s298_s24] sm:$0x1] %v894_v18 }
 0x14a   : > { %965 = vst [vmem:[%s304_s27] sm:$0x1] %v963_v26 }
 0x14b PF: > { %s15_s17 = sadd.s32 1, %s1329_s17   ;;  %s1563_s15 = smov %s1325_s16 }
 0x14c   : > { %p12_p6 = scmp.ge.s32.totalorder %s15_s17, 4   ;;  %s1564_s16 = smov %s1566_s18 }
 0x14e   :  { %14 = sbr.rel (!%p12_p6) target bundleno = 2 (0x2), region = 93 }

// kernel: residual_forward.9
= control target key start
LH: loop header
LB: loop body
LE: loop exit
PB: predicated region body
PF: predicated region fallthrough
CT: control target
= control target key end

     0   :  { %s1224_s0 = inlined_call_operand.vmem [shape: f32[512,128], index: 0, kind: input, shape index: {}, may-alias: {0,4}]   ;;  %s1225_s1 = inlined_call_operand.vmem [shape: f32[512,128], index: 1, kind: input, shape index: {}]   ;;  %s1226_s2 = inlined_call_operand.vmem [shape: f32[1,128], index: 2, kind: input, shape index: {}]   ;;  %s1227_s3 = inlined_call_operand.vmem [shape: f32[1,128], index: 3, kind: input, shape index: {}]   ;;  %s1228_s4 = inlined_call_operand.vmem [shape: f32[512,128], index: 4, kind: output, shape index: {}, may-alias: {0,4}]  }
   0x1   :  { %v17_v0 = vld [vmem:[%s1224_s0] sm:$0xff]  ;;  %v18_v4 = vld [vmem:[%s1224_s0 + $0x8] sm:$0xff]  ;;  %v19_v7 = vld [vmem:[%s1224_s0 + $0x10] sm:$0xff] }
   0x2   :  { %v516_v1 = vld [vmem:[%s1226_s2] ss:$0 sm:$0xff]  ;;  %v20_v8 = vld [vmem:[%s1224_s0 + $0x18] sm:$0xff]  ;;  %v224_v10 = vld [vmem:[%s1225_s1 + $0x8] sm:$0xff] }
   0x3   :  { %v521_v2 = vld [vmem:[%s1227_s3] ss:$0 sm:$0xff]  ;;  %v88_v3 = vmul.f32 %v516_v1, %v17_v0  ;;  %v89_v6 = vmul.f32 %v516_v1, %v18_v4  ;;  %v90_v11 = vmul.f32 %v516_v1, %v19_v7  ;;  %v225_v12 = vld [vmem:[%s1225_s1 + $0x10] sm:$0xff]  ;;  %v91_v13 = vmul.f32 %v516_v1, %v20_v8  ;;  %v226_v16 = vld [vmem:[%s1225_s1 + $0x18] sm:$0xff] }
   0x4   :  { %v223_v5 = vld [vmem:[%s1225_s1] sm:$0xff]  ;;  %v22_v18 = vld [vmem:[%s1224_s0 + $0x28] sm:$0xff]  ;;  %v23_v19 = vld [vmem:[%s1224_s0 + $0x30] sm:$0xff] }
   0x5   :  { %v159_v9 = vadd.f32 %v521_v2, %v88_v3  ;;  %v21_v14 = vld [vmem:[%s1224_s0 + $0x20] sm:$0xff]  ;;  %v160_v15 = vadd.f32 %v521_v2, %v89_v6  ;;  %v161_v21 = vadd.f32 %v521_v2, %v90_v11  ;;  %v162_v22 = vadd.f32 %v521_v2, %v91_v13  ;;  %v24_v25 = vld [vmem:[%s1224_s0 + $0x38] sm:$0xff]  ;;  %v228_v28 = vld [vmem:[%s1225_s1 + $0x28] sm:$0xff] }
   0x6   :  { %v92_v17 = vmul.f32 %v516_v1, %v21_v14  ;;  %v227_v23 = vld [vmem:[%s1225_s1 + $0x20] sm:$0xff]  ;;  %v93_v24 = vmul.f32 %v516_v1, %v22_v18  ;;  %v94_v29 = vmul.f32 %v516_v1, %v23_v19  ;;  %v95_v30 = vmul.f32 %v516_v1, %v24_v25  ;;  %v229_v36 = vld [vmem:[%s1225_s1 + $0x30] sm:$0xff]  ;;  %v230_v37 = vld [vmem:[%s1225_s1 + $0x38] sm:$0xff] }
   0x7   :  { %v287_v20 = vadd.f32 %v223_v5, %v159_v9  ;;  %v288_v26 = vadd.f32 %v224_v10, %v160_v15  ;;  %v25_v31 = vld [vmem:[%s1224_s0 + $0x40] sm:$0xff]  ;;  %v289_v33 = vadd.f32 %v225_v12, %v161_v21  ;;  %v290_v34 = vadd.f32 %v226_v16, %v162_v22  ;;  %v26_v38 = vld [vmem:[%s1224_s0 + $0x48] sm:$0xff]  ;;  %v27_v43 = vld [vmem:[%s1224_s0 + $0x50] sm:$0xff] }
   0x8   :  { %v163_v27 = vadd.f32 %v521_v2, %v92_v17  ;;  %v164_v35 = vadd.f32 %v521_v2, %v93_v24  ;;  %v165_v41 = vadd.f32 %v521_v2, %v94_v29  ;;  %v166_v42 = vadd.f32 %v521_v2, %v95_v30  ;;  %v28_v44 = vld [vmem:[%s1224_s0 + $0x58] sm:$0xff]  ;;  %v231_v53 = vld [vmem:[%s1225_s1 + $0x40] sm:$0xff]  ;;  %v232_v58 = vld [vmem:[%s1225_s1 + $0x48] sm:$0xff] }
   0x9   :  { %v351_v32 = vmax.f32 %v287_v20, 0.0  ;;  %v352_v39 = vmax.f32 %v288_v26, 0.0  ;;  %v353_v45 = vmax.f32 %v289_v33, 0.0  ;;  %v354_v46 = vmax.f32 %v290_v34, 0.0  ;;  %v233_v4 = vld [vmem:[%s1225_s1 + $0x50] sm:$0xff]  ;;  %v234_v5 = vld [vmem:[%s1225_s1 + $0x58] sm:$0xff] }
   0xa   :  { %v291_v40 = vadd.f32 %v227_v23, %v163_v27  ;;  %v292_v47 = vadd.f32 %v228_v28, %v164_v35  ;;  %v96_v48 = vmul.f32 %v516_v1, %v25_v31  ;;  %v293_v51 = vadd.f32 %v229_v36, %v165_v41  ;;  %v235_v10 = vld [vmem:[%s1225_s1 + $0x60] sm:$0xff]  ;;  %v236_v14 = vld [vmem:[%s1225_s1 + $0x68] sm:$0xff]  ;;  %v237_v22 = vld [vmem:[%s1225_s1 + $0x70] sm:$0xff] }
   0xb   :  { %415 = vst [vmem:[%s1228_s4] sm:$0xff] %v351_v32  ;;  %v294_v52 = vadd.f32 %v230_v37, %v166_v42  ;;  %v97_v54 = vmul.f32 %v516_v1, %v26_v38  ;;  %v98_v59 = vmul.f32 %v516_v1, %v27_v43  ;;  %v99_v60 = vmul.f32 %v516_v1, %v28_v44  ;;  %v238_v23 = vld [vmem:[%s1225_s1 + $0x78] sm:$0xff]  ;;  %v240_v44 = vld [vmem:[%s1225_s1 + $0x88] sm:$0xff] }
   0xc   :  { %v355_v50 = vmax.f32 %v291_v40, 0.0  ;;  %v356_v56 = vmax.f32 %v292_v47, 0.0  ;;  %v167_v57 = vadd.f32 %v521_v2, %v96_v48  ;;  %v357_v63 = vmax.f32 %v293_v51, 0.0 }
   0xd   :  { %v358_v0 = vmax.f32 %v294_v52, 0.0  ;;  %v168_v3 = vadd.f32 %v521_v2, %v97_v54  ;;  %v169_v8 = vadd.f32 %v521_v2, %v98_v59  ;;  %v170_v9 = vadd.f32 %v521_v2, %v99_v60  ;;  %v241_v52 = vld [vmem:[%s1225_s1 + $0x90] sm:$0xff] }
   0xe   :  { %v295_v7 = vadd.f32 %v231_v53, %v167_v57  ;;  %v242_v53 = vld [vmem:[%s1225_s1 + $0x98] sm:$0xff] }
   0xf   :  { %v296_v12 = vadd.f32 %v232_v58, %v168_v3  ;;  %v297_v19 = vadd.f32 %v233_v4, %v169_v8  ;;  %v298_v20 = vadd.f32 %v234_v5, %v170_v9  ;;  %v243_v58 = vld [vmem:[%s1225_s1 + $0xa0] sm:$0xff]  ;;  %v245_v8 = vld [vmem:[%s1225_s1 + $0xb0] sm:$0xff]  ;;  %v246_v9 = vld [vmem:[%s1225_s1 + $0xb8] sm:$0xff] }
  0x10   :  { %v359_v18 = vmax.f32 %v295_v7, 0.0 }
  0x11   :  { %v360_v25 = vmax.f32 %v296_v12, 0.0  ;;  %v361_v31 = vmax.f32 %v297_v19, 0.0  ;;  %v362_v32 = vmax.f32 %v298_v20, 0.0 }
  0x12   :  { %v29_v49 = vld [vmem:[%s1224_s0 + $0x60] sm:$0xff] }
  0x13   :  { %416 = vst [vmem:[%s1228_s4 + $0x8] sm:$0xff] %v352_v39  ;;  %v100_v6 = vmul.f32 %v516_v1, %v29_v49  ;;  %v239_v39 = vld [vmem:[%s1225_s1 + $0x80] sm:$0xff] }
  0x15   :  { %v171_v13 = vadd.f32 %v521_v2, %v100_v6 }
  0x17   :  { %v299_v26 = vadd.f32 %v235_v10, %v171_v13 }
  0x19   :  { %v363_v36 = vmax.f32 %v299_v26, 0.0 }
  0x1a   :  { %v30_v55 = vld [vmem:[%s1224_s0 + $0x68] sm:$0xff] }
  0x1b   :  { %417 = vst [vmem:[%s1228_s4 + $0x10] sm:$0xff] %v353_v45  ;;  %418 = vst [vmem:[%s1228_s4 + $0x18] sm:$0xff] %v354_v46  ;;  %v101_v11 = vmul.f32 %v516_v1, %v30_v55 }
  0x1d   :  { %v172_v21 = vadd.f32 %v521_v2, %v101_v11 }
  0x1f   :  { %v300_v33 = vadd.f32 %v236_v14, %v172_v21 }
  0x21   :  { %v364_v42 = vmax.f32 %v300_v33, 0.0 }
  0x22   :  { %v31_v61 = vld [vmem:[%s1224_s0 + $0x70] sm:$0xff]  ;;  %v32_v62 = vld [vmem:[%s1224_s0 + $0x78] sm:$0xff] }
  0x23   :  { %419 = vst [vmem:[%s1228_s4 + $0x20] sm:$0xff] %v355_v50  ;;  %420 = vst [vmem:[%s1228_s4 + $0x28] sm:$0xff] %v356_v56  ;;  %v102_v15 = vmul.f32 %v516_v1, %v31_v61  ;;  %v103_v16 = vmul.f32 %v516_v1, %v32_v62  ;;  %v244_v62 = vld [vmem:[%s1225_s1 + $0xa8] sm:$0xff] }
  0x24   :  { %421 = vst [vmem:[%s1228_s4 + $0x30] sm:$0xff] %v357_v63  ;;  %422 = vst [vmem:[%s1228_s4 + $0x38] sm:$0xff] %v358_v0 }
  0x25   :  { %v173_v27 = vadd.f32 %v521_v2, %v102_v15  ;;  %v174_v28 = vadd.f32 %v521_v2, %v103_v16 }
  0x27   :  { %v301_v37 = vadd.f32 %v237_v22, %v173_v27  ;;  %v302_v38 = vadd.f32 %v238_v23, %v174_v28 }
  0x29   :  { %v365_v49 = vmax.f32 %v301_v37, 0.0  ;;  %v366_v50 = vmax.f32 %v302_v38, 0.0  ;;  %v249_v38 = vld [vmem:[%s1225_s1 + $0xd0] sm:$0xff] }
  0x2b   :  { %v33_v17 = vld [vmem:[%s1224_s0 + $0x80] sm:$0xff]  ;;  %v34_v24 = vld [vmem:[%s1224_s0 + $0x88] sm:$0xff]  ;;  %v35_v29 = vld [vmem:[%s1224_s0 + $0x90] sm:$0xff] }
  0x2c   :  { %v36_v30 = vld [vmem:[%s1224_s0 + $0x98] sm:$0xff]  ;;  %v104_v34 = vmul.f32 %v516_v1, %v33_v17  ;;  %v105_v40 = vmul.f32 %v516_v1, %v34_v24  ;;  %v106_v45 = vmul.f32 %v516_v1, %v35_v29 }
  0x2d   :  { %423 = vst [vmem:[%s1228_s4 + $0x40] sm:$0xff] %v359_v18  ;;  %v107_v46 = vmul.f32 %v516_v1, %v36_v30  ;;  %v248_v30 = vld [vmem:[%s1225_s1 + $0xc8] sm:$0xff] }
  0x2e   :  { %v175_v43 = vadd.f32 %v521_v2, %v104_v34  ;;  %v176_v51 = vadd.f32 %v521_v2, %v105_v40  ;;  %v177_v56 = vadd.f32 %v521_v2, %v106_v45 }
  0x2f   :  { %v178_v57 = vadd.f32 %v521_v2, %v107_v46 }
  0x30   :  { %v303_v55 = vadd.f32 %v239_v39, %v175_v43  ;;  %v304_v60 = vadd.f32 %v240_v44, %v176_v51  ;;  %v305_v5 = vadd.f32 %v241_v52, %v177_v56  ;;  %v250_v39 = vld [vmem:[%s1225_s1 + $0xd8] sm:$0xff]  ;;  %v251_v44 = vld [vmem:[%s1225_s1 + $0xe0] sm:$0xff]  ;;  %v253_v56 = vld [vmem:[%s1225_s1 + $0xf0] sm:$0xff] }
  0x31   :  { %v306_v6 = vadd.f32 %v242_v53, %v178_v57  ;;  %v254_v57 = vld [vmem:[%s1225_s1 + $0xf8] sm:$0xff] }
  0x32   :  { %v367_v4 = vmax.f32 %v303_v55, 0.0  ;;  %v368_v11 = vmax.f32 %v304_v60, 0.0  ;;  %v369_v17 = vmax.f32 %v305_v5, 0.0 }
  0x33   :  { %v370_v18 = vmax.f32 %v306_v6, 0.0 }
  0x34   :  { %v37_v35 = vld [vmem:[%s1224_s0 + $0xa0] sm:$0xff] }
  0x35   :  { %424 = vst [vmem:[%s1228_s4 + $0x48] sm:$0xff] %v360_v25  ;;  %v108_v54 = vmul.f32 %v516_v1, %v37_v35  ;;  %v247_v25 = vld [vmem:[%s1225_s1 + $0xc0] sm:$0xff] }
  0x37   :  { %v179_v61 = vadd.f32 %v521_v2, %v108_v54 }
  0x39   :  { %v307_v12 = vadd.f32 %v243_v58, %v179_v61 }
  0x3b   :  { %v371_v22 = vmax.f32 %v307_v12, 0.0 }
  0x3c   :  { %v38_v41 = vld [vmem:[%s1224_s0 + $0xa8] sm:$0xff] }
  0x3d   :  { %425 = vst [vmem:[%s1228_s4 + $0x50] sm:$0xff] %v361_v31  ;;  %426 = vst [vmem:[%s1228_s4 + $0x58] sm:$0xff] %v362_v32  ;;  %v109_v59 = vmul.f32 %v516_v1, %v38_v41 }
  0x3f   :  { %v180_v7 = vadd.f32 %v521_v2, %v109_v59 }
  0x41   :  { %v308_v19 = vadd.f32 %v244_v62, %v180_v7 }
  0x43   :  { %v372_v28 = vmax.f32 %v308_v19, 0.0 }
  0x44   :  { %v39_v47 = vld [vmem:[%s1224_s0 + $0xb0] sm:$0xff]  ;;  %v40_v48 = vld [vmem:[%s1224_s0 + $0xb8] sm:$0xff] }
  0x45   :  { %427 = vst [vmem:[%s1228_s4 + $0x60] sm:$0xff] %v363_v36  ;;  %428 = vst [vmem:[%s1228_s4 + $0x68] sm:$0xff] %v364_v42  ;;  %v110_v63 = vmul.f32 %v516_v1, %v39_v47  ;;  %v111_v0 = vmul.f32 %v516_v1, %v40_v48  ;;  %v252_v48 = vld [vmem:[%s1225_s1 + $0xe8] sm:$0xff] }
  0x46   :  { %429 = vst [vmem:[%s1228_s4 + $0x70] sm:$0xff] %v365_v49  ;;  %430 = vst [vmem:[%s1228_s4 + $0x78] sm:$0xff] %v366_v50 }
  0x47   :  { %v181_v13 = vadd.f32 %v521_v2, %v110_v63  ;;  %v182_v14 = vadd.f32 %v521_v2, %v111_v0 }
  0x49   :  { %v309_v23 = vadd.f32 %v245_v8, %v181_v13  ;;  %v310_v24 = vadd.f32 %v246_v9, %v182_v14 }
  0x4b   :  { %v373_v35 = vmax.f32 %v309_v23, 0.0  ;;  %v374_v36 = vmax.f32 %v310_v24, 0.0  ;;  %v257_v24 = vld [vmem:[%s1225_s1 + $0x110] sm:$0xff] }
  0x4d   :  { %v41_v3 = vld [vmem:[%s1224_s0 + $0xc0] sm:$0xff]  ;;  %v42_v10 = vld [vmem:[%s1224_s0 + $0xc8] sm:$0xff]  ;;  %v43_v15 = vld [vmem:[%s1224_s0 + $0xd0] sm:$0xff] }
  0x4e   :  { %v44_v16 = vld [vmem:[%s1224_s0 + $0xd8] sm:$0xff]  ;;  %v112_v20 = vmul.f32 %v516_v1, %v41_v3  ;;  %v113_v26 = vmul.f32 %v516_v1, %v42_v10  ;;  %v114_v31 = vmul.f32 %v516_v1, %v43_v15 }
  0x4f   :  { %431 = vst [vmem:[%s1228_s4 + $0x80] sm:$0xff] %v367_v4  ;;  %v115_v32 = vmul.f32 %v516_v1, %v44_v16  ;;  %v256_v16 = vld [vmem:[%s1225_s1 + $0x108] sm:$0xff] }
  0x50   :  { %v183_v29 = vadd.f32 %v521_v2, %v112_v20  ;;  %v184_v37 = vadd.f32 %v521_v2, %v113_v26  ;;  %v185_v42 = vadd.f32 %v521_v2, %v114_v31 }
  0x51   :  { %v186_v43 = vadd.f32 %v521_v2, %v115_v32 }
  0x52   :  { %v311_v41 = vadd.f32 %v247_v25, %v183_v29  ;;  %v312_v46 = vadd.f32 %v248_v30, %v184_v37  ;;  %v313_v53 = vadd.f32 %v249_v38, %v185_v42  ;;  %v258_v25 = vld [vmem:[%s1225_s1 + $0x118] sm:$0xff]  ;;  %v259_v30 = vld [vmem:[%s1225_s1 + $0x120] sm:$0xff]  ;;  %v261_v42 = vld [vmem:[%s1225_s1 + $0x130] sm:$0xff] }
  0x53   :  { %v314_v54 = vadd.f32 %v250_v39, %v186_v43  ;;  %v262_v43 = vld [vmem:[%s1225_s1 + $0x138] sm:$0xff] }
  0x54   :  { %v375_v52 = vmax.f32 %v311_v41, 0.0  ;;  %v376_v59 = vmax.f32 %v312_v46, 0.0  ;;  %v377_v3 = vmax.f32 %v313_v53, 0.0 }
  0x55   :  { %v378_v4 = vmax.f32 %v314_v54, 0.0 }
  0x56   :  { %v45_v21 = vld [vmem:[%s1224_s0 + $0xe0] sm:$0xff] }
  0x57   :  { %432 = vst [vmem:[%s1228_s4 + $0x88] sm:$0xff] %v368_v11  ;;  %v116_v40 = vmul.f32 %v516_v1, %v45_v21  ;;  %v255_v11 = vld [vmem:[%s1225_s1 + $0x100] sm:$0xff] }
  0x59   :  { %v187_v47 = vadd.f32 %v521_v2, %v116_v40 }
  0x5b   :  { %v315_v60 = vadd.f32 %v251_v44, %v187_v47 }
  0x5d   :  { %v379_v8 = vmax.f32 %v315_v60, 0.0 }
  0x5e   :  { %v46_v27 = vld [vmem:[%s1224_s0 + $0xe8] sm:$0xff] }
  0x5f   :  { %433 = vst [vmem:[%s1228_s4 + $0x90] sm:$0xff] %v369_v17  ;;  %434 = vst [vmem:[%s1228_s4 + $0x98] sm:$0xff] %v370_v18  ;;  %v117_v45 = vmul.f32 %v516_v1, %v46_v27 }
  0x61   :  { %v188_v55 = vadd.f32 %v521_v2, %v117_v45 }
  0x63   :  { %v316_v5 = vadd.f32 %v252_v48, %v188_v55 }
  0x65   :  { %v380_v14 = vmax.f32 %v316_v5, 0.0 }
  0x66   :  { %v47_v33 = vld [vmem:[%s1224_s0 + $0xf0] sm:$0xff]  ;;  %v48_v34 = vld [vmem:[%s1224_s0 + $0xf8] sm:$0xff] }
  0x67   :  { %435 = vst [vmem:[%s1228_s4 + $0xa0] sm:$0xff] %v371_v22  ;;  %436 = vst [vmem:[%s1228_s4 + $0xa8] sm:$0xff] %v372_v28  ;;  %v118_v49 = vmul.f32 %v516_v1, %v47_v33  ;;  %v119_v50 = vmul.f32 %v516_v1, %v48_v34  ;;  %v260_v34 = vld [vmem:[%s1225_s1 + $0x128] sm:$0xff] }
  0x68   :  { %437 = vst [vmem:[%s1228_s4 + $0xb0] sm:$0xff] %v373_v35  ;;  %438 = vst [vmem:[%s1228_s4 + $0xb8] sm:$0xff] %v374_v36 }
  0x69   :  { %v189_v61 = vadd.f32 %v521_v2, %v118_v49  ;;  %v190_v62 = vadd.f32 %v521_v2, %v119_v50 }
  0x6b   :  { %v317_v9 = vadd.f32 %v253_v56, %v189_v61  ;;  %v318_v10 = vadd.f32 %v254_v57, %v190_v62 }
  0x6d   :  { %v381_v21 = vmax.f32 %v317_v9, 0.0  ;;  %v382_v22 = vmax.f32 %v318_v10, 0.0  ;;  %v265_v10 = vld [vmem:[%s1225_s1 + $0x150] sm:$0xff] }
  0x6f   :  { %v49_v51 = vld [vmem:[%s1224_s0 + $0x100] sm:$0xff]  ;;  %v50_v58 = vld [vmem:[%s1224_s0 + $0x108] sm:$0xff]  ;;  %v51_v63 = vld [vmem:[%s1224_s0 + $0x110] sm:$0xff] }
  0x70   :  { %v52_v0 = vld [vmem:[%s1224_s0 + $0x118] sm:$0xff]  ;;  %v120_v6 = vmul.f32 %v516_v1, %v49_v51  ;;  %v121_v12 = vmul.f32 %v516_v1, %v50_v58  ;;  %v122_v17 = vmul.f32 %v516_v1, %v51_v63 }
  0x71   :  { %439 = vst [vmem:[%s1228_s4 + $0xc0] sm:$0xff] %v375_v52  ;;  %v123_v18 = vmul.f32 %v516_v1, %v52_v0  ;;  %v264_v0 = vld [vmem:[%s1225_s1 + $0x148] sm:$0xff] }
  0x72   :  { %v191_v15 = vadd.f32 %v521_v2, %v120_v6  ;;  %v192_v23 = vadd.f32 %v521_v2, %v121_v12  ;;  %v193_v28 = vadd.f32 %v521_v2, %v122_v17 }
  0x73   :  { %v194_v29 = vadd.f32 %v521_v2, %v123_v18 }
  0x74   :  { %v319_v27 = vadd.f32 %v255_v11, %v191_v15  ;;  %v320_v32 = vadd.f32 %v256_v16, %v192_v23  ;;  %v321_v39 = vadd.f32 %v257_v24, %v193_v28  ;;  %v266_v11 = vld [vmem:[%s1225_s1 + $0x158] sm:$0xff]  ;;  %v267_v16 = vld [vmem:[%s1225_s1 + $0x160] sm:$0xff]  ;;  %v269_v28 = vld [vmem:[%s1225_s1 + $0x170] sm:$0xff] }
  0x75   :  { %v322_v40 = vadd.f32 %v258_v25, %v194_v29  ;;  %v270_v29 = vld [vmem:[%s1225_s1 + $0x178] sm:$0xff] }
  0x76   :  { %v383_v38 = vmax.f32 %v319_v27, 0.0  ;;  %v384_v45 = vmax.f32 %v320_v32, 0.0  ;;  %v385_v51 = vmax.f32 %v321_v39, 0.0 }
  0x77   :  { %v386_v52 = vmax.f32 %v322_v40, 0.0 }
  0x78   :  { %v53_v7 = vld [vmem:[%s1224_s0 + $0x120] sm:$0xff] }
  0x79   :  { %440 = vst [vmem:[%s1228_s4 + $0xc8] sm:$0xff] %v376_v59  ;;  %v124_v26 = vmul.f32 %v516_v1, %v53_v7  ;;  %v263_v59 = vld [vmem:[%s1225_s1 + $0x140] sm:$0xff] }
  0x7b   :  { %v195_v33 = vadd.f32 %v521_v2, %v124_v26 }
  0x7d   :  { %v323_v46 = vadd.f32 %v259_v30, %v195_v33 }
  0x7f   :  { %v387_v56 = vmax.f32 %v323_v46, 0.0 }
  0x80   :  { %v54_v13 = vld [vmem:[%s1224_s0 + $0x128] sm:$0xff] }
  0x81   :  { %441 = vst [vmem:[%s1228_s4 + $0xd0] sm:$0xff] %v377_v3  ;;  %442 = vst [vmem:[%s1228_s4 + $0xd8] sm:$0xff] %v378_v4  ;;  %v125_v31 = vmul.f32 %v516_v1, %v54_v13 }
  0x83   :  { %v196_v41 = vadd.f32 %v521_v2, %v125_v31 }
  0x85   :  { %v324_v53 = vadd.f32 %v260_v34, %v196_v41 }
  0x87   :  { %v388_v62 = vmax.f32 %v324_v53, 0.0 }
  0x88   :  { %v55_v19 = vld [vmem:[%s1224_s0 + $0x130] sm:$0xff]  ;;  %v56_v20 = vld [vmem:[%s1224_s0 + $0x138] sm:$0xff] }
  0x89   :  { %443 = vst [vmem:[%s1228_s4 + $0xe0] sm:$0xff] %v379_v8  ;;  %444 = vst [vmem:[%s1228_s4 + $0xe8] sm:$0xff] %v380_v14  ;;  %v126_v35 = vmul.f32 %v516_v1, %v55_v19  ;;  %v127_v36 = vmul.f32 %v516_v1, %v56_v20  ;;  %v268_v20 = vld [vmem:[%s1225_s1 + $0x168] sm:$0xff] }
  0x8a   :  { %445 = vst [vmem:[%s1228_s4 + $0xf0] sm:$0xff] %v381_v21  ;;  %446 = vst [vmem:[%s1228_s4 + $0xf8] sm:$0xff] %v382_v22 }
  0x8b   :  { %v197_v47 = vadd.f32 %v521_v2, %v126_v35  ;;  %v198_v48 = vadd.f32 %v521_v2, %v127_v36 }
  0x8d   :  { %v325_v57 = vadd.f32 %v261_v42, %v197_v47  ;;  %v326_v58 = vadd.f32 %v262_v43, %v198_v48 }
  0x8f   :  { %v389_v7 = vmax.f32 %v325_v57, 0.0  ;;  %v390_v8 = vmax.f32 %v326_v58, 0.0  ;;  %v273_v58 = vld [vmem:[%s1225_s1 + $0x190] sm:$0xff] }
  0x91   :  { %v57_v37 = vld [vmem:[%s1224_s0 + $0x140] sm:$0xff]  ;;  %v58_v44 = vld [vmem:[%s1224_s0 + $0x148] sm:$0xff]  ;;  %v59_v49 = vld [vmem:[%s1224_s0 + $0x150] sm:$0xff] }
  0x92   :  { %v60_v50 = vld [vmem:[%s1224_s0 + $0x158] sm:$0xff]  ;;  %v128_v54 = vmul.f32 %v516_v1, %v57_v37  ;;  %v129_v60 = vmul.f32 %v516_v1, %v58_v44  ;;  %v130_v3 = vmul.f32 %v516_v1, %v59_v49 }
  0x93   :  { %447 = vst [vmem:[%s1228_s4 + $0x100] sm:$0xff] %v383_v38  ;;  %v131_v4 = vmul.f32 %v516_v1, %v60_v50  ;;  %v272_v50 = vld [vmem:[%s1225_s1 + $0x188] sm:$0xff] }
  0x94   :  { %v199_v63 = vadd.f32 %v521_v2, %v128_v54  ;;  %v200_v9 = vadd.f32 %v521_v2, %v129_v60  ;;  %v201_v14 = vadd.f32 %v521_v2, %v130_v3 }
  0x95   :  { %v202_v15 = vadd.f32 %v521_v2, %v131_v4 }
  0x96   :  { %v327_v13 = vadd.f32 %v263_v59, %v199_v63  ;;  %v328_v18 = vadd.f32 %v264_v0, %v200_v9  ;;  %v329_v25 = vadd.f32 %v265_v10, %v201_v14  ;;  %v274_v59 = vld [vmem:[%s1225_s1 + $0x198] sm:$0xff]  ;;  %v275_v0 = vld [vmem:[%s1225_s1 + $0x1a0] sm:$0xff]  ;;  %v277_v14 = vld [vmem:[%s1225_s1 + $0x1b0] sm:$0xff] }
  0x97   :  { %v330_v26 = vadd.f32 %v266_v11, %v202_v15  ;;  %v278_v15 = vld [vmem:[%s1225_s1 + $0x1b8] sm:$0xff] }
  0x98   :  { %v391_v24 = vmax.f32 %v327_v13, 0.0  ;;  %v392_v31 = vmax.f32 %v328_v18, 0.0  ;;  %v393_v37 = vmax.f32 %v329_v25, 0.0 }
  0x99   :  { %v394_v38 = vmax.f32 %v330_v26, 0.0 }
  0x9a   :  { %v61_v55 = vld [vmem:[%s1224_s0 + $0x160] sm:$0xff] }
  0x9b   :  { %448 = vst [vmem:[%s1228_s4 + $0x108] sm:$0xff] %v384_v45  ;;  %v132_v12 = vmul.f32 %v516_v1, %v61_v55  ;;  %v271_v45 = vld [vmem:[%s1225_s1 + $0x180] sm:$0xff] }
  0x9d   :  { %v203_v19 = vadd.f32 %v521_v2, %v132_v12 }
  0x9f   :  { %v331_v32 = vadd.f32 %v267_v16, %v203_v19 }
  0xa1   :  { %v395_v42 = vmax.f32 %v331_v32, 0.0 }
  0xa2   :  { %v62_v61 = vld [vmem:[%s1224_s0 + $0x168] sm:$0xff] }
  0xa3   :  { %449 = vst [vmem:[%s1228_s4 + $0x110] sm:$0xff] %v385_v51  ;;  %450 = vst [vmem:[%s1228_s4 + $0x118] sm:$0xff] %v386_v52  ;;  %v133_v17 = vmul.f32 %v516_v1, %v62_v61 }
  0xa5   :  { %v204_v27 = vadd.f32 %v521_v2, %v133_v17 }
  0xa7   :  { %v332_v39 = vadd.f32 %v268_v20, %v204_v27 }
  0xa9   :  { %v396_v48 = vmax.f32 %v332_v39, 0.0 }
  0xaa   :  { %v63_v5 = vld [vmem:[%s1224_s0 + $0x170] sm:$0xff]  ;;  %v64_v6 = vld [vmem:[%s1224_s0 + $0x178] sm:$0xff] }
  0xab   :  { %451 = vst [vmem:[%s1228_s4 + $0x120] sm:$0xff] %v387_v56  ;;  %452 = vst [vmem:[%s1228_s4 + $0x128] sm:$0xff] %v388_v62  ;;  %v134_v21 = vmul.f32 %v516_v1, %v63_v5  ;;  %v135_v22 = vmul.f32 %v516_v1, %v64_v6  ;;  %v276_v6 = vld [vmem:[%s1225_s1 + $0x1a8] sm:$0xff] }
  0xac   :  { %453 = vst [vmem:[%s1228_s4 + $0x130] sm:$0xff] %v389_v7  ;;  %454 = vst [vmem:[%s1228_s4 + $0x138] sm:$0xff] %v390_v8 }
  0xad   :  { %v205_v33 = vadd.f32 %v521_v2, %v134_v21  ;;  %v206_v34 = vadd.f32 %v521_v2, %v135_v22 }
  0xaf   :  { %v333_v43 = vadd.f32 %v269_v28, %v205_v33  ;;  %v334_v44 = vadd.f32 %v270_v29, %v206_v34 }
  0xb1   :  { %v397_v55 = vmax.f32 %v333_v43, 0.0  ;;  %v398_v56 = vmax.f32 %v334_v44, 0.0  ;;  %v281_v44 = vld [vmem:[%s1225_s1 + $0x1d0] sm:$0xff] }
  0xb3   :  { %v65_v23 = vld [vmem:[%s1224_s0 + $0x180] sm:$0xff]  ;;  %v66_v30 = vld [vmem:[%s1224_s0 + $0x188] sm:$0xff]  ;;  %v67_v35 = vld [vmem:[%s1224_s0 + $0x190] sm:$0xff] }
  0xb4   :  { %v68_v36 = vld [vmem:[%s1224_s0 + $0x198] sm:$0xff]  ;;  %v136_v40 = vmul.f32 %v516_v1, %v65_v23  ;;  %v137_v46 = vmul.f32 %v516_v1, %v66_v30  ;;  %v138_v51 = vmul.f32 %v516_v1, %v67_v35 }
  0xb5   :  { %455 = vst [vmem:[%s1228_s4 + $0x140] sm:$0xff] %v391_v24  ;;  %v139_v52 = vmul.f32 %v516_v1, %v68_v36  ;;  %v280_v36 = vld [vmem:[%s1225_s1 + $0x1c8] sm:$0xff] }
  0xb6   :  { %v207_v49 = vadd.f32 %v521_v2, %v136_v40  ;;  %v208_v57 = vadd.f32 %v521_v2, %v137_v46  ;;  %v209_v62 = vadd.f32 %v521_v2, %v138_v51 }
  0xb7   :  { %v210_v63 = vadd.f32 %v521_v2, %v139_v52 }
  0xb8   :  { %v335_v61 = vadd.f32 %v271_v45, %v207_v49  ;;  %v336_v4 = vadd.f32 %v272_v50, %v208_v57  ;;  %v337_v11 = vadd.f32 %v273_v58, %v209_v62  ;;  %v282_v45 = vld [vmem:[%s1225_s1 + $0x1d8] sm:$0xff]  ;;  %v283_v50 = vld [vmem:[%s1225_s1 + $0x1e0] sm:$0xff] }
  0xb9   :  { %v338_v12 = vadd.f32 %v274_v59, %v210_v63  ;;  %v286_v62 = vld [vmem:[%s1225_s1 + $0x1f8] sm:$0xff] }
  0xba   :  { %v399_v10 = vmax.f32 %v335_v61, 0.0  ;;  %v400_v17 = vmax.f32 %v336_v4, 0.0  ;;  %v401_v23 = vmax.f32 %v337_v11, 0.0  ;;  %v285_v61 = vld [vmem:[%s1225_s1 + $0x1f0] sm:$0xff] }
  0xbb   :  { %v402_v24 = vmax.f32 %v338_v12, 0.0 }
  0xbc   :  { %v69_v41 = vld [vmem:[%s1224_s0 + $0x1a0] sm:$0xff] }
  0xbd   :  { %456 = vst [vmem:[%s1228_s4 + $0x148] sm:$0xff] %v392_v31  ;;  %v140_v60 = vmul.f32 %v516_v1, %v69_v41  ;;  %v279_v31 = vld [vmem:[%s1225_s1 + $0x1c0] sm:$0xff] }
  0xbf   :  { %v211_v5 = vadd.f32 %v521_v2, %v140_v60 }
  0xc1   :  { %v339_v18 = vadd.f32 %v275_v0, %v211_v5 }
  0xc3   :  { %v403_v28 = vmax.f32 %v339_v18, 0.0 }
  0xc4   :  { %v70_v47 = vld [vmem:[%s1224_s0 + $0x1a8] sm:$0xff] }
  0xc5   :  { %457 = vst [vmem:[%s1228_s4 + $0x150] sm:$0xff] %v393_v37  ;;  %458 = vst [vmem:[%s1228_s4 + $0x158] sm:$0xff] %v394_v38  ;;  %v141_v3 = vmul.f32 %v516_v1, %v70_v47 }
  0xc7   :  { %v212_v13 = vadd.f32 %v521_v2, %v141_v3 }
  0xc9   :  { %v340_v25 = vadd.f32 %v276_v6, %v212_v13 }
  0xcb   :  { %v404_v34 = vmax.f32 %v340_v25, 0.0 }
  0xcc   :  { %v71_v53 = vld [vmem:[%s1224_s0 + $0x1b0] sm:$0xff]  ;;  %v72_v54 = vld [vmem:[%s1224_s0 + $0x1b8] sm:$0xff] }
  0xcd   :  { %459 = vst [vmem:[%s1228_s4 + $0x160] sm:$0xff] %v395_v42  ;;  %460 = vst [vmem:[%s1228_s4 + $0x168] sm:$0xff] %v396_v48  ;;  %v142_v7 = vmul.f32 %v516_v1, %v71_v53  ;;  %v143_v8 = vmul.f32 %v516_v1, %v72_v54  ;;  %v284_v54 = vld [vmem:[%s1225_s1 + $0x1e8] sm:$0xff] }
  0xce   :  { %461 = vst [vmem:[%s1228_s4 + $0x170] sm:$0xff] %v397_v55  ;;  %462 = vst [vmem:[%s1228_s4 + $0x178] sm:$0xff] %v398_v56 }
  0xcf   :  { %v213_v19 = vadd.f32 %v521_v2, %v142_v7  ;;  %v214_v20 = vadd.f32 %v521_v2, %v143_v8 }
  0xd1   :  { %v341_v29 = vadd.f32 %v277_v14, %v213_v19  ;;  %v342_v30 = vadd.f32 %v278_v15, %v214_v20 }
  0xd3   :  { %v405_v41 = vmax.f32 %v341_v29, 0.0  ;;  %v406_v42 = vmax.f32 %v342_v30, 0.0 }
  0xd5   :  { %v73_v9 = vld [vmem:[%s1224_s0 + $0x1c0] sm:$0xff]  ;;  %v74_v16 = vld [vmem:[%s1224_s0 + $0x1c8] sm:$0xff]  ;;  %v75_v21 = vld [vmem:[%s1224_s0 + $0x1d0] sm:$0xff] }
  0xd6   :  { %v76_v22 = vld [vmem:[%s1224_s0 + $0x1d8] sm:$0xff]  ;;  %v144_v26 = vmul.f32 %v516_v1, %v73_v9  ;;  %v145_v32 = vmul.f32 %v516_v1, %v74_v16  ;;  %v146_v37 = vmul.f32 %v516_v1, %v75_v21 }
  0xd7   :  { %463 = vst [vmem:[%s1228_s4 + $0x180] sm:$0xff] %v399_v10  ;;  %v147_v38 = vmul.f32 %v516_v1, %v76_v22 }
  0xd8   :  { %v215_v35 = vadd.f32 %v521_v2, %v144_v26  ;;  %v216_v43 = vadd.f32 %v521_v2, %v145_v32  ;;  %v217_v48 = vadd.f32 %v521_v2, %v146_v37 }
  0xd9   :  { %v218_v49 = vadd.f32 %v521_v2, %v147_v38 }
  0xda   :  { %v343_v47 = vadd.f32 %v279_v31, %v215_v35  ;;  %v344_v52 = vadd.f32 %v280_v36, %v216_v43  ;;  %v345_v58 = vadd.f32 %v281_v44, %v217_v48 }
  0xdb   :  { %v346_v59 = vadd.f32 %v282_v45, %v218_v49 }
  0xdc   :  { %v407_v57 = vmax.f32 %v343_v47, 0.0  ;;  %v408_v63 = vmax.f32 %v344_v52, 0.0 }
  0xdd   :  { %v410_v5 = vmax.f32 %v346_v59, 0.0 }
  0xde   :  { %v77_v27 = vld [vmem:[%s1224_s0 + $0x1e0] sm:$0xff] }
  0xdf   :  { %464 = vst [vmem:[%s1228_s4 + $0x188] sm:$0xff] %v400_v17  ;;  %v148_v46 = vmul.f32 %v516_v1, %v77_v27 }
  0xe1   :  { %v219_v53 = vadd.f32 %v521_v2, %v148_v46 }
  0xe3   :  { %v347_v0 = vadd.f32 %v283_v50, %v219_v53 }
  0xe5   :  { %v411_v7 = vmax.f32 %v347_v0, 0.0 }
  0xe6   :  { %v78_v33 = vld [vmem:[%s1224_s0 + $0x1e8] sm:$0xff] }
  0xe7   :  { %465 = vst [vmem:[%s1228_s4 + $0x190] sm:$0xff] %v401_v23  ;;  %466 = vst [vmem:[%s1228_s4 + $0x198] sm:$0xff] %v402_v24  ;;  %v149_v51 = vmul.f32 %v516_v1, %v78_v33 }
  0xe9   :  { %v220_v60 = vadd.f32 %v521_v2, %v149_v51 }
  0xeb   :  { %v348_v6 = vadd.f32 %v284_v54, %v220_v60 }
  0xee   :  { %v79_v39 = vld [vmem:[%s1224_s0 + $0x1f0] sm:$0xff]  ;;  %v80_v40 = vld [vmem:[%s1224_s0 + $0x1f8] sm:$0xff] }
  0xef   :  { %467 = vst [vmem:[%s1228_s4 + $0x1a0] sm:$0xff] %v403_v28  ;;  %468 = vst [vmem:[%s1228_s4 + $0x1a8] sm:$0xff] %v404_v34  ;;  %v150_v55 = vmul.f32 %v516_v1, %v79_v39  ;;  %v151_v56 = vmul.f32 %v516_v1, %v80_v40  ;;  %v409_v1 = vmax.f32 %v345_v58, 0.0 }
  0xf0   :  { %469 = vst [vmem:[%s1228_s4 + $0x1b0] sm:$0xff] %v405_v41  ;;  %470 = vst [vmem:[%s1228_s4 + $0x1b8] sm:$0xff] %v406_v42 }
  0xf1   :  { %v221_v3 = vadd.f32 %v521_v2, %v150_v55  ;;  %v222_v4 = vadd.f32 %v521_v2, %v151_v56  ;;  %471 = vst [vmem:[%s1228_s4 + $0x1c0] sm:$0xff] %v407_v57  ;;  %472 = vst [vmem:[%s1228_s4 + $0x1c8] sm:$0xff] %v408_v63  ;;  %v412_v2 = vmax.f32 %v348_v6, 0.0 }
  0xf2   :  { %473 = vst [vmem:[%s1228_s4 + $0x1d0] sm:$0xff] %v409_v1  ;;  %474 = vst [vmem:[%s1228_s4 + $0x1d8] sm:$0xff] %v410_v5 }
  0xf3   :  { %v349_v8 = vadd.f32 %v285_v61, %v221_v3  ;;  %v350_v9 = vadd.f32 %v286_v62, %v222_v4  ;;  %475 = vst [vmem:[%s1228_s4 + $0x1e0] sm:$0xff] %v411_v7  ;;  %476 = vst [vmem:[%s1228_s4 + $0x1e8] sm:$0xff] %v412_v2 }
  0xf5   :  { %v413_v10 = vmax.f32 %v349_v8, 0.0  ;;  %v414_v11 = vmax.f32 %v350_v9, 0.0 }
  0xf7   :  { %477 = vst [vmem:[%s1228_s4 + $0x1f0] sm:$0xff] %v413_v10  ;;  %478 = vst [vmem:[%s1228_s4 + $0x1f8] sm:$0xff] %v414_v11 }

// kernel: residual_forward.8
= control target key start
LH: loop header
LB: loop body
LE: loop exit
PB: predicated region body
PF: predicated region fallthrough
CT: control target
= control target key end

     0   :  { %10 = vsyncpa [#allocation4], 0  ;;  %s1808_s0 = inlined_call_operand.vmem [shape: bf16[512,128], index: 0, kind: input, shape index: {}]   ;;  %s1809_s1 = inlined_call_operand.vmem [shape: bf16[128,128], index: 1, kind: input, shape index: {}]   ;;  %s1810_s2 = inlined_call_operand.vmem [shape: f32[512,128], index: 2, kind: output, shape index: {0}]   ;;  %s1811_s3 = inlined_call_operand.hbm [shape: f32[2,1,128], index: 3, kind: output, shape index: {1}]   ;;  %s1812_s4 = inlined_call_operand.hbm [shape: f32[2,1,128], index: 4, kind: output, shape index: {2}]  }
   0x1   :  { %12 = vsyncpa [#allocation4 + $0x1], 0 }
   0x2   :  { %13 = vsyncpa [#allocation6], 0 }
   0x3   :  { %15 = vsyncpa [#allocation6 + $0x1], 0  ;;  %s1498_s15 = smov 0   ;;  %s1500_s16 = smov 0  }
   0x4   :  { %s1502_s17 = smov 0   ;;  %s1504_s18 = smov 0  }
   0x5   :  { %s1506_s19 = smov 0   ;;  %s1508_s20 = smov 0  }
   0x6 LB: > { %s1149_s21 = sadd.s32 4294967295, %s1469_s20   ;;  %s1150_s22 = sadd.s32 4294967294, %s1469_s20   ;;  %s1469_s20 = sphi %s1508_s20, %s21_s20   ;;  %s1465_s19 = sphi %s1506_s19, %s1819_s19   ;;  %s1461_s18 = sphi %s1504_s18, %s1818_s18   ;;  %s1457_s17 = sphi %s1502_s17, %s1817_s17   ;;  %s1453_s16 = sphi %s1500_s16, %s1816_s16   ;;  %s1449_s15 = sphi %s1498_s15, %s1815_s15  }
   0x7   : > { %s40_s23 = sadd.s32 1, %s1465_s19  ;;  %s133_s24 = sadd.s32 1, %s1457_s17 }
   0x8   : > { %p42_p0 = scmp.ge.s32.totalorder %s40_s23, 2  ;;  %p143_p1 = scmp.ne.s32.totalorder %s1457_s17, %s1453_s16 }
   0x9   : > { %p144_p2 = scmp.eq.s32.totalorder %s1149_s21, 1  ;;  %p149_p3 = scmp.ne.s32.totalorder %s1453_s16, %s1449_s15 }
   0xa   : > { %s1821_s23 = smov (%p42_p0, %s40_s23), 0  ;;  %p150_p5 = scmp.eq.s32.totalorder %s1150_s22, 1 }
   0xb   : > { %p1538_p4 = por %p144_p2, %p143_p1  ;;  %s128_s26 = ssub.s32 %s1465_s19, %s1821_s23 }
   0xc   : > { %p1154_p6 = scmp.ge.s32.totalorder %s1469_s20, 1  ;;  %p131_p7 = scmp.eq.s32.totalorder %s128_s26, 0 }
   0xd   : > { %p1545_p8 = por %p150_p5, %p149_p3  ;;  %p220_p9 = scmp.lt.s32.totalorder %s1469_s20, 3 }
   0xe   : > { %s1551_s28 = scalar_select %p131_p7, %s1457_s17, %s133_s24  }
   0xf   : > { %p221_p10 = pnand %p1154_p6, %p220_p9 }
  0x10   : > { %v1335_v0 = vld [vmem:[%s1809_s1] sm:$0xff] (!%p221_p10)   ;;  %s1155_s5 = sshll.u32 (!%p221_p10), %s1461_s18, 5  ;;  %v1336_v1 = vld [vmem:[%s1809_s1 + $0x8] sm:$0xff] (!%p221_p10)   ;;  %v1337_v2 = vld [vmem:[%s1809_s1 + $0x10] sm:$0xff] (!%p221_p10)  }
  0x11   : > { %224 = sbr.rel (%p221_p10) target bundleno = 375 (0x177), region = 28  ;;  %p269_p11 = scmp.lt.s32.totalorder (!%p221_p10), %s1155_s5, 63  ;;  %1211 = vmatprep.subr.bf16.mxu0 (!%p221_p10), %v1335_v0  ;;  %1259 = vmatprep.subr.bf16.mxu1 (!%p221_p10), %v1335_v0  ;;  %v1338_v3 = vld [vmem:[%s1809_s1 + $0x18] sm:$0xff] (!%p221_p10)   ;;  %v1339_v5 = vld [vmem:[%s1809_s1 + $0x20] sm:$0xff] (!%p221_p10)   ;;  %v1340_v6 = vld [vmem:[%s1809_s1 + $0x28] sm:$0xff] (!%p221_p10)  }
  0x12   : > { %1212 = vmatpush3.bf16.msra.mxu0 (!%p221_p10), %v1335_v0  ;;  %1267 = vmatpush3.bf16.msra.mxu1 (!%p221_p10), %v1335_v0  ;;  %v1341_v8 = vld [vmem:[%s1809_s1 + $0x30] sm:$0xff] (!%p221_p10)   ;;  %v1342_v9 = vld [vmem:[%s1809_s1 + $0x38] sm:$0xff] (!%p221_p10)  }
  0x13   : > { %1213 = vmatprep.subr.bf16.mxu0 (!%p221_p10), %v1336_v1  ;;  %1260 = vmatprep.subr.bf16.mxu1 (!%p221_p10), %v1336_v1 }
  0x16   : > { %1214 = vmatpush3.bf16.msra.mxu0 (!%p221_p10), %v1336_v1  ;;  %1268 = vmatpush3.bf16.msra.mxu1 (!%p221_p10), %v1336_v1 }
  0x17   : > { %1215 = vmatprep.subr.bf16.mxu0 (!%p221_p10), %v1337_v2  ;;  %1261 = vmatprep.subr.bf16.mxu1 (!%p221_p10), %v1337_v2 }
  0x18   : > { %s1823_s5 = smov (!%p269_p11, %s1155_s5), 63 }
  0x19   : > { %s1156_s10 = sshll.u32 %s1823_s5, 2  ;;  %s1158_s9 = sshll.u32 %s1823_s5, 3 }
  0x1a   : > { %s1569_s13 = scalar_lea.vmem %s1808_s0, %s1156_s10  ;;  %1216 = vmatpush3.bf16.msra.mxu0 %v1337_v2  ;;  %1269 = vmatpush3.bf16.msra.mxu1 %v1337_v2  ;;  %s1606_s12 = scalar_lea.vmem %s1810_s2, %s1158_s9 }
  0x1b   : > { %v1343_v4 = vld [vmem:[%s1569_s13] sm:$0xff]   ;;  %1217 = vmatprep.subr.bf16.mxu0 %v1338_v3  ;;  %1262 = vmatprep.subr.bf16.mxu1 %v1338_v3  ;;  %v1344_v10 = vld [vmem:[%s1569_s13 + $0x8] sm:$0xff]   ;;  %v1345_v12 = vld [vmem:[%s1569_s13 + $0x10] sm:$0xff]   ;;  %s1719_s5 = sand.u32 1, %s1453_s16   ;;  %s1471_s10 = smov [#allocation3]  }
  0x1c   : > { %1227 = vmatprep.mubr.bf16.mxu0 %v1343_v4  ;;  %v1351_v7 = vld [vmem:[%s1569_s13 + $0x40] sm:$0xff]   ;;  %v1352_v11 = vld [vmem:[%s1569_s13 + $0x48] sm:$0xff]   ;;  %v1353_v13 = vld [vmem:[%s1569_s13 + $0x50] sm:$0xff]   ;;  %s261_s14 = scalar_lea.vmem [#allocation3], %s1719_s5  ;;  %s267_s22 = scalar_lea.vmem [#allocation5], %s1719_s5 }
  0x1d   : > { %1243 = vmatprep.mubr.bf16.mxu1 %v1351_v7  ;;  %v1346_v14 = vld [vmem:[%s1569_s13 + $0x18] sm:$0xff]   ;;  %v1347_v16 = vld [vmem:[%s1569_s13 + $0x20] sm:$0xff]   ;;  %v1348_v18 = vld [vmem:[%s1569_s13 + $0x28] sm:$0xff]   ;;  %s986_s21 = sshll.u32 %s261_s14, 4  ;;  %s1000_s24 = sshll.u32 %s267_s22, 4  ;;  %s1731_s21 = int_to_ptr.vmem [resolvable:$true] %s986_s21  ;;  %s1738_s24 = int_to_ptr.vmem [resolvable:$true] %s1000_s24 }
  0x1e   : > { %1218 = vmatpush3.bf16.msra.mxu0 %v1338_v3  ;;  %1270 = vmatpush3.bf16.msra.mxu1 %v1338_v3  ;;  %v1354_v15 = vld [vmem:[%s1569_s13 + $0x58] sm:$0xff]   ;;  %v1355_v17 = vld [vmem:[%s1569_s13 + $0x60] sm:$0xff]   ;;  %v1356_v19 = vld [vmem:[%s1569_s13 + $0x68] sm:$0xff]   ;;  %s965_s8 = scalar_lea.sflag [#allocation4], %s1719_s5  ;;  %s1359_s9 = scalar_lea.vmem %s1731_s21, 16 }
  0x1f   : > { %1219 = vmatprep.subr.bf16.mxu0 %v1339_v5  ;;  %1263 = vmatprep.subr.bf16.mxu1 %v1339_v5  ;;  %v1349_v20 = vld [vmem:[%s1569_s13 + $0x30] sm:$0xff]   ;;  %v1350_v22 = vld [vmem:[%s1569_s13 + $0x38] sm:$0xff]   ;;  %p1360_p12 = scmp.ne.s32.totalorder %s1731_s21, %s1359_s9  ;;  %s1363_s11 = sshll.u32 %s1471_s10, 4  ;;  %s1364_s11 = int_to_ptr.vmem [resolvable:$false] %s1363_s11 }
  0x20   : > { %v1357_v21 = vld [vmem:[%s1569_s13 + $0x70] sm:$0xff]   ;;  %v1358_v23 = vld [vmem:[%s1569_s13 + $0x78] sm:$0xff]   ;;  %s1183_s13 = sshll.u32 %s1461_s18, 4  ;;  %p1366_p1 = scmp.lt.s32.totalorder %s1731_s21, %s1364_s11 }
  0x21   : > { %s1729_s30 = scalar_lea.hbm %s1811_s3, %s1183_s13  ;;  %s1736_s7 = scalar_lea.hbm %s1812_s4, %s1183_s13 }
  0x22   : > { %1220 = vmatpush3.bf16.msra.mxu0 %v1339_v5  ;;  %1271 = vmatpush3.bf16.msra.mxu1 %v1339_v5  ;;  %p1361_p13 = pnand %p1360_p12, %p1538_p4 }
  0x23   : > { %1221 = vmatprep.subr.bf16.mxu0 %v1340_v6  ;;  %1264 = vmatprep.subr.bf16.mxu1 %v1340_v6 }
  0x24   : > { %p1362_p0 = pneg %p1361_p13 }
  0x26   : > { %1222 = vmatpush3.bf16.msra.mxu0 %v1340_v6  ;;  %1272 = vmatpush3.bf16.msra.mxu1 %v1340_v6 }
  0x27   : > { %1223 = vmatprep.subr.bf16.mxu0 %v1341_v8  ;;  %1265 = vmatprep.subr.bf16.mxu1 %v1341_v8 }
  0x2a   : > { %1224 = vmatpush3.bf16.msra.mxu0 %v1341_v8  ;;  %1273 = vmatpush3.bf16.msra.mxu1 %v1341_v8 }
  0x2b   : > { %1225 = vmatprep.subr.bf16.mxu0 %v1342_v9  ;;  %1266 = vmatprep.subr.bf16.mxu1 %v1342_v9 }
  0x2e   : > { %1226 = vmatpush3.bf16.msra.mxu0 %v1342_v9  ;;  %1274 = vmatpush3.bf16.msra.mxu1 %v1342_v9 }
  0x31   : > { %1228 = vmatmul.mubr.bf16.vlgmr.msra.gmra.mrb[0].mxu0 %v1344_v10  ;;  %1244 = vmatmul.mubr.bf16.vlgmr.msra.gmra.mrb[0].mxu1 %v1352_v11 }
  0x32   : > { %1231 = vmatprep.mubr.bf16.mxu0 %v1345_v12  ;;  %1247 = vmatprep.mubr.bf16.mxu1 %v1353_v13 }
  0x39   : > { %1232 = vmatmul.mubr.bf16.gmra.mrb[4].mxu0 %v1346_v14  ;;  %1248 = vmatmul.mubr.bf16.gmra.mrb[4].mxu1 %v1354_v15 }
  0x3a   : > { %1235 = vmatprep.mubr.bf16.mxu0 %v1347_v16  ;;  %1251 = vmatprep.mubr.bf16.mxu1 %v1355_v17 }
  0x41   : > { %1236 = vmatmul.mubr.bf16.gmra.mrb[8].mxu0 %v1348_v18  ;;  %1252 = vmatmul.mubr.bf16.gmra.mrb[8].mxu1 %v1356_v19 }
  0x42   : > { %1239 = vmatprep.mubr.bf16.mxu0 %v1349_v20  ;;  %1255 = vmatprep.mubr.bf16.mxu1 %v1357_v21 }
  0x49   : > { %1240 = vmatmul.mubr.bf16.gmra.mrb[12].mxu0 %v1350_v22  ;;  %1256 = vmatmul.mubr.bf16.gmra.mrb[12].mxu1 %v1358_v23 }
 0x104   : > { %v1229_v24 = vpop.f32.mrb[0].mxu0  ;;  %v1608_v25 = vpop.f32.mrb[0].mxu1 }
 0x105   : > { %818 = vst [vmem:[%s1606_s12 + $0x10] sm:$0xff] %v1229_v24  ;;  %v590_v26 = vpop.f32.mrb[1].mxu0  ;;  %834 = vst [vmem:[%s1606_s12 + $0x90] sm:$0xff] %v1608_v25  ;;  %v1613_v27 = vpop.f32.mrb[1].mxu1  ;;  %v887_v35 = vmul.f32 %v1229_v24, %v1229_v24 }
 0x106   : > { %816 = vst [vmem:[%s1606_s12] sm:$0xff] %v590_v26  ;;  %v1230_v28 = vpop.f32.mrb[2].mxu0  ;;  %832 = vst [vmem:[%s1606_s12 + $0x80] sm:$0xff] %v1613_v27  ;;  %v1618_v29 = vpop.f32.mrb[2].mxu1  ;;  %v885_v32 = vmul.f32 %v590_v26, %v590_v26 }
 0x107   : > { %819 = vst [vmem:[%s1606_s12 + $0x18] sm:$0xff] %v1230_v28  ;;  %v593_v30 = vpop.f32.mrb[3].mxu0  ;;  %835 = vst [vmem:[%s1606_s12 + $0x98] sm:$0xff] %v1618_v29  ;;  %v1623_v31 = vpop.f32.mrb[3].mxu1  ;;  %v888_v38 = vmul.f32 %v1230_v28, %v1230_v28 }
 0x108   : > { %817 = vst [vmem:[%s1606_s12 + $0x8] sm:$0xff] %v593_v30  ;;  %v848_v33 = vadd.f32 %v593_v30, %v590_v26  ;;  %v886_v34 = vmul.f32 %v593_v30, %v593_v30  ;;  %833 = vst [vmem:[%s1606_s12 + $0x88] sm:$0xff] %v1623_v31 }
 0x10a   : > { %v849_v36 = vadd.f32 %v1229_v24, %v848_v33  ;;  %v917_v37 = vadd.f32 %v886_v34, %v885_v32 }
 0x10c   : > { %v918_v39 = vadd.f32 %v917_v37, %v887_v35  ;;  %v1233_v40 = vpop.f32.mrb[4].mxu0  ;;  %v850_v41 = vadd.f32 %v1230_v28, %v849_v36  ;;  %v1628_v42 = vpop.f32.mrb[4].mxu1 }
 0x10d   : > { %822 = vst [vmem:[%s1606_s12 + $0x30] sm:$0xff] %v1233_v40  ;;  %v606_v43 = vpop.f32.mrb[5].mxu0  ;;  %838 = vst [vmem:[%s1606_s12 + $0xb0] sm:$0xff] %v1628_v42  ;;  %v1633_v44 = vpop.f32.mrb[5].mxu1  ;;  %v891_v55 = vmul.f32 %v1233_v40, %v1233_v40 }
 0x10e   : > { %820 = vst [vmem:[%s1606_s12 + $0x20] sm:$0xff] %v606_v43  ;;  %v851_v45 = vadd.f32 %v850_v41, %v606_v43  ;;  %v889_v46 = vmul.f32 %v606_v43, %v606_v43  ;;  %v919_v47 = vadd.f32 %v918_v39, %v888_v38  ;;  %v1234_v48 = vpop.f32.mrb[6].mxu0  ;;  %836 = vst [vmem:[%s1606_s12 + $0xa0] sm:$0xff] %v1633_v44  ;;  %v1638_v49 = vpop.f32.mrb[6].mxu1 }
 0x10f   : > { %823 = vst [vmem:[%s1606_s12 + $0x38] sm:$0xff] %v1234_v48  ;;  %v609_v50 = vpop.f32.mrb[7].mxu0  ;;  %839 = vst [vmem:[%s1606_s12 + $0xb8] sm:$0xff] %v1638_v49  ;;  %v1643_v51 = vpop.f32.mrb[7].mxu1  ;;  %v892_v58 = vmul.f32 %v1234_v48, %v1234_v48  ;;  %v901_v41 = vmul.f32 %v1613_v27, %v1613_v27 }
 0x110   : > { %v920_v52 = vadd.f32 %v919_v47, %v889_v46  ;;  %821 = vst [vmem:[%s1606_s12 + $0x28] sm:$0xff] %v609_v50  ;;  %v852_v53 = vadd.f32 %v851_v45, %v609_v50  ;;  %v890_v54 = vmul.f32 %v609_v50, %v609_v50  ;;  %837 = vst [vmem:[%s1606_s12 + $0xa8] sm:$0xff] %v1643_v51 }
 0x111   : > { %v903_v50 = vmul.f32 %v1608_v25, %v1608_v25 }
 0x112   : > { %v853_v56 = vadd.f32 %v1233_v40, %v852_v53  ;;  %v921_v57 = vadd.f32 %v920_v52, %v890_v54  ;;  %v904_v54 = vmul.f32 %v1618_v29, %v1618_v29 }
 0x114   : > { %v922_v59 = vadd.f32 %v921_v57, %v891_v55  ;;  %v1237_v60 = vpop.f32.mrb[8].mxu0  ;;  %v854_v61 = vadd.f32 %v1234_v48, %v853_v56  ;;  %v1648_v62 = vpop.f32.mrb[8].mxu1  ;;  %v902_v48 = vmul.f32 %v1623_v31, %v1623_v31 }
 0x115   : > { %826 = vst [vmem:[%s1606_s12 + $0x50] sm:$0xff] %v1237_v60  ;;  %v622_v63 = vpop.f32.mrb[9].mxu0  ;;  %842 = vst [vmem:[%s1606_s12 + $0xd0] sm:$0xff] %v1648_v62  ;;  %v1653_v0 = vpop.f32.mrb[9].mxu1  ;;  %v895_v11 = vmul.f32 %v1237_v60, %v1237_v60 }
 0x116   : > { %824 = vst [vmem:[%s1606_s12 + $0x40] sm:$0xff] %v622_v63  ;;  %v855_v1 = vadd.f32 %v854_v61, %v622_v63  ;;  %v893_v2 = vmul.f32 %v622_v63, %v622_v63  ;;  %v923_v3 = vadd.f32 %v922_v59, %v892_v58  ;;  %v1238_v4 = vpop.f32.mrb[10].mxu0  ;;  %840 = vst [vmem:[%s1606_s12 + $0xc0] sm:$0xff] %v1653_v0  ;;  %v1658_v5 = vpop.f32.mrb[10].mxu1 }
 0x117   : > { %827 = vst [vmem:[%s1606_s12 + $0x58] sm:$0xff] %v1238_v4  ;;  %v625_v6 = vpop.f32.mrb[11].mxu0  ;;  %843 = vst [vmem:[%s1606_s12 + $0xd8] sm:$0xff] %v1658_v5  ;;  %v1663_v7 = vpop.f32.mrb[11].mxu1  ;;  %v896_v14 = vmul.f32 %v1238_v4, %v1238_v4 }
 0x118   : > { %v924_v8 = vadd.f32 %v923_v3, %v893_v2  ;;  %825 = vst [vmem:[%s1606_s12 + $0x48] sm:$0xff] %v625_v6  ;;  %v856_v9 = vadd.f32 %v855_v1, %v625_v6  ;;  %v894_v10 = vmul.f32 %v625_v6, %v625_v6  ;;  %841 = vst [vmem:[%s1606_s12 + $0xc8] sm:$0xff] %v1663_v7 }
 0x11a   : > { %v857_v12 = vadd.f32 %v1237_v60, %v856_v9  ;;  %v925_v13 = vadd.f32 %v924_v8, %v894_v10  ;;  %v906_v60 = vmul.f32 %v1643_v51, %v1643_v51  ;;  %v910_v8 = vmul.f32 %v1663_v7, %v1663_v7 }
 0x11c   : > { %v926_v15 = vadd.f32 %v925_v13, %v895_v11  ;;  %v1241_v16 = vpop.f32.mrb[12].mxu0  ;;  %v858_v17 = vadd.f32 %v1238_v4, %v857_v12  ;;  %v1668_v18 = vpop.f32.mrb[12].mxu1 }
 0x11d   : > { %830 = vst [vmem:[%s1606_s12 + $0x70] sm:$0xff] %v1241_v16  ;;  %v638_v19 = vpop.f32.mrb[13].mxu0  ;;  %846 = vst [vmem:[%s1606_s12 + $0xf0] sm:$0xff] %v1668_v18  ;;  %v702_v20 = vpop.f32.mrb[13].mxu1  ;;  %v899_v35 = vmul.f32 %v1241_v16, %v1241_v16 }
 0x11e   : > { %828 = vst [vmem:[%s1606_s12 + $0x60] sm:$0xff] %v638_v19  ;;  %v859_v21 = vadd.f32 %v858_v17, %v638_v19  ;;  %v897_v22 = vmul.f32 %v638_v19, %v638_v19  ;;  %v927_v23 = vadd.f32 %v926_v15, %v896_v14  ;;  %v1242_v24 = vpop.f32.mrb[14].mxu0  ;;  %844 = vst [vmem:[%s1606_s12 + $0xe0] sm:$0xff] %v702_v20  ;;  %v1258_v26 = vpop.f32.mrb[14].mxu1 }
 0x11f   : > { %831 = vst [vmem:[%s1606_s12 + $0x78] sm:$0xff] %v1242_v24  ;;  %v641_v28 = vpop.f32.mrb[15].mxu0  ;;  %847 = vst [vmem:[%s1606_s12 + $0xf8] sm:$0xff] %v1258_v26  ;;  %v705_v30 = vpop.f32.mrb[15].mxu1  ;;  %v900_v38 = vmul.f32 %v1242_v24, %v1242_v24  ;;  %v913_v12 = vmul.f32 %v702_v20, %v702_v20 }
 0x120   : > { %v928_v32 = vadd.f32 %v927_v23, %v897_v22  ;;  %829 = vst [vmem:[%s1606_s12 + $0x68] sm:$0xff] %v641_v28  ;;  %v860_v33 = vadd.f32 %v859_v21, %v641_v28  ;;  %v898_v34 = vmul.f32 %v641_v28, %v641_v28  ;;  %845 = vst [vmem:[%s1606_s12 + $0xe8] sm:$0xff] %v705_v30  ;;  %s1365_s12 = scalar_lea.vmem %s1364_s11, 32 }
 0x121   : > { %v914_v17 = vmul.f32 %v705_v30, %v705_v30  ;;  %v916_v21 = vmul.f32 %v1258_v26, %v1258_v26  ;;  %p1367_p2 = scmp.lt.s32.totalorder %s1365_s12, %s1359_s9 }
 0x122   : > { %v861_v36 = vadd.f32 %v1241_v16, %v860_v33  ;;  %v929_v37 = vadd.f32 %v928_v32, %v898_v34 }
 0x123   : > { %p1368_p3 = por %p1367_p2, %p1366_p1 }
 0x124   : > { %v930_v39 = vadd.f32 %v929_v37, %v899_v35  ;;  %v862_v40 = vadd.f32 %v1242_v24, %v861_v36 }
 0x125   : > { %p1369_p5 = pnand %p1368_p3, %p1362_p0 }
 0x126   : > { %v863_v43 = vadd.f32 %v862_v40, %v1613_v27  ;;  %v931_v45 = vadd.f32 %v930_v39, %v900_v38  ;;  %v905_v27 = vmul.f32 %v1633_v44, %v1633_v44 }
 0x128   : > { %v932_v46 = vadd.f32 %v931_v45, %v901_v41  ;;  %v864_v47 = vadd.f32 %v863_v43, %v1623_v31 }
 0x12a   : > { %v865_v52 = vadd.f32 %v1608_v25, %v864_v47  ;;  %v933_v53 = vadd.f32 %v932_v46, %v902_v48  ;;  %v907_v25 = vmul.f32 %v1628_v42, %v1628_v42 }
 0x12c   : > { %v934_v55 = vadd.f32 %v933_v53, %v903_v50  ;;  %v866_v56 = vadd.f32 %v1618_v29, %v865_v52  ;;  %v908_v29 = vmul.f32 %v1638_v49, %v1638_v49 }
 0x12e   : > { %v867_v57 = vadd.f32 %v866_v56, %v1633_v44  ;;  %v935_v58 = vadd.f32 %v934_v55, %v904_v54  ;;  %v909_v44 = vmul.f32 %v1653_v0, %v1653_v0 }
 0x130   : > { %v936_v59 = vadd.f32 %v935_v58, %v905_v27  ;;  %v868_v31 = vadd.f32 %v867_v57, %v1643_v51 }
 0x132   : > { %v869_v61 = vadd.f32 %v1628_v42, %v868_v31  ;;  %v937_v63 = vadd.f32 %v936_v59, %v906_v60  ;;  %v911_v42 = vmul.f32 %v1648_v62, %v1648_v62 }
 0x134   : > { %v938_v1 = vadd.f32 %v937_v63, %v907_v25  ;;  %v870_v2 = vadd.f32 %v1638_v49, %v869_v61  ;;  %v912_v49 = vmul.f32 %v1658_v5, %v1658_v5 }
 0x136   : > { %v871_v3 = vadd.f32 %v870_v2, %v1653_v0  ;;  %v939_v4 = vadd.f32 %v938_v1, %v908_v29 }
 0x138   : > { %v940_v6 = vadd.f32 %v939_v4, %v909_v44  ;;  %v872_v51 = vadd.f32 %v871_v3, %v1663_v7  ;;  %v915_v7 = vmul.f32 %v1668_v18, %v1668_v18 }
 0x13a   : > { %v873_v9 = vadd.f32 %v1648_v62, %v872_v51  ;;  %v941_v10 = vadd.f32 %v940_v6, %v910_v8 }
 0x13c   : > { %v942_v11 = vadd.f32 %v941_v10, %v911_v42  ;;  %v874_v0 = vadd.f32 %v1658_v5, %v873_v9 }
 0x13e   : > { %v875_v13 = vadd.f32 %v874_v0, %v702_v20  ;;  %v943_v14 = vadd.f32 %v942_v11, %v912_v49 }
 0x140   : > { %v944_v15 = vadd.f32 %v943_v14, %v913_v12  ;;  %v876_v16 = vadd.f32 %v875_v13, %v705_v30 }
 0x142   : > { %v877_v62 = vadd.f32 %v1668_v18, %v876_v16  ;;  %v945_v19 = vadd.f32 %v944_v15, %v914_v17 }
 0x144   : > { %v878_v22 = vadd.f32 %v1258_v26, %v877_v62  ;;  %v946_v23 = vadd.f32 %v945_v19, %v915_v7 }
 0x146   : > { %v879_v24 = vrot.slane %v878_v22, 4  ;;  %v947_v28 = vadd.f32 %v946_v23, %v916_v21 }
 0x148   : > { %v880_v5 = vadd.f32 %v879_v24, %v878_v22  ;;  %v948_v20 = vrot.slane %v947_v28, 4 }
 0x14a   : > { %v881_v30 = vrot.slane %v880_v5, 2  ;;  %v949_v32 = vadd.f32 %v948_v20, %v947_v28 }
 0x14c   : > { %v882_v33 = vadd.f32 %v881_v30, %v880_v5  ;;  %v950_v34 = vrot.slane %v949_v32, 2 }
 0x14e   : > { %v883_v18 = vrot.slane %v882_v33, 1  ;;  %v951_v26 = vadd.f32 %v950_v34, %v949_v32 }
 0x150   : > { %v884_v35 = vadd.f32 %v883_v18, %v882_v33  ;;  %v952_v36 = vrot.slane %v951_v26, 1 }
 0x152   : > { %954 = vst [vmem:[%s261_s14] sm:$0x1] %v884_v35  ;;  %v953_v37 = vadd.f32 %v952_v36, %v951_v26 }
 0x153   : > { %1372 = shalt.err (!%p1369_p5)
}
 0x154   : > { %s1373_s13 = scalar_lea.hbm %s1729_s30, 16  ;;  %s1377_s29 = scalar_lea.hbm %s1811_s3, 32 }
 0x155   : > { %p1374_p6 = scmp.ne.s32.totalorder %s1729_s30, %s1373_s13  ;;  %p1378_p10 = scmp.lt.u32.totalorder %s1729_s30, %s1811_s3 }
 0x156   : > { %p1379_p11 = scmp.lt.u32.totalorder %s1377_s29, %s1373_s13  ;;  %p1381_p13 = scmp.lt.u32.totalorder %s1373_s13, %s1729_s30 }
 0x157   : > { %p1375_p7 = pnand %p1374_p6, %p1538_p4 }
 0x158   : > { %p1380_p12 = por %p1379_p11, %p1378_p10 }
 0x159   : > { %p1376_p9 = pneg %p1375_p7 }
 0x15a   : > { %p1382_p0 = por %p1381_p13, %p1380_p12 }
 0x15c   : > { %p1383_p1 = pnand %p1382_p0, %p1376_p9 }
 0x15e   : > { %1386 = shalt.err (!%p1383_p1)
}
 0x15f   : > { %1275 = dma.vmem_to_hbm [thread:$0]  (%p1538_p4), %s1731_s21, 16, %s1729_s30, %s965_s8   ;;  %955 = vst [vmem:[%s267_s22] sm:$0x1] %v953_v37 }
 0x160   : > { %s969_s9 = scalar_lea.sflag [#allocation6], %s1719_s5  ;;  %s1387_s10 = scalar_lea.vmem %s1738_s24, 16 }
 0x161   : > { %p1388_p2 = scmp.ne.s32.totalorder %s1738_s24, %s1387_s10  ;;  %s1472_s11 = smov [#allocation5]  }
 0x162   : > { %s1391_s12 = sshll.u32 %s1472_s11, 4  ;;  %s1392_s12 = int_to_ptr.vmem [resolvable:$false] %s1391_s12 }
 0x163   : > { %p1389_p3 = pnand %p1388_p2, %p1538_p4  ;;  %s1393_s13 = scalar_lea.vmem %s1392_s12, 32 }
 0x164   : > { %p1394_p6 = scmp.lt.s32.totalorder %s1738_s24, %s1392_s12  ;;  %p1395_p7 = scmp.lt.s32.totalorder %s1393_s13, %s1387_s10 }
 0x165   : > { %p1390_p5 = pneg %p1389_p3 }
 0x166   : > { %p1396_p9 = por %p1395_p7, %p1394_p6 }
 0x168   : > { %p1397_p10 = pnand %p1396_p9, %p1390_p5 }
 0x16a   : > { %1400 = shalt.err (!%p1397_p10)
}
 0x16b   : > { %s1401_s5 = scalar_lea.hbm %s1736_s7, 16  ;;  %s1405_s30 = scalar_lea.hbm %s1812_s4, 32 }
 0x16c   : > { %p1402_p11 = scmp.ne.s32.totalorder %s1736_s7, %s1401_s5  ;;  %p1406_p0 = scmp.lt.u32.totalorder %s1736_s7, %s1812_s4 }
 0x16d   : > { %p1407_p1 = scmp.lt.u32.totalorder %s1405_s30, %s1401_s5  ;;  %p1409_p3 = scmp.lt.u32.totalorder %s1401_s5, %s1736_s7 }
 0x16e   : > { %p1403_p12 = pnand %p1402_p11, %p1538_p4 }
 0x16f   : > { %p1408_p2 = por %p1407_p1, %p1406_p0 }
 0x170   : > { %p1404_p13 = pneg %p1403_p12 }
 0x171   : > { %p1410_p5 = por %p1409_p3, %p1408_p2 }
 0x173   : > { %p1411_p6 = pnand %p1410_p5, %p1404_p13 }
 0x175   : > { %1414 = shalt.err (!%p1411_p6)
}
 0x176   : > { %1276 = dma.vmem_to_hbm [thread:$0]  (%p1538_p4), %s1738_s24, 16, %s1736_s7, %s969_s9  }
 0x177 PF: > { %p1286_p7 = scmp.ge.s32.totalorder %s1469_s20, 2  ;;  %s1023_s26 = sand.u32 1, %s1449_s15  }
 0x178   : > { %s1024_s29 = scalar_lea.sflag [#allocation4], %s1023_s26 }
 0x179   : > { %p1280_p9 = pnand %p1286_p7, %p1545_p8 }
 0x17b   : > { %1440 = dma.done.wait (!%p1280_p9), %s1024_s29, 16  }
 0x17c   : > { %1442 = vsyncadd (!%p1280_p9), %s1024_s29, 4294967280  ;;  %s1032_s18 = scalar_lea.sflag [#allocation6], %s1023_s26 }
 0x17d   : > { %1444 = dma.done.wait (!%p1280_p9), %s1032_s18, 16  }
 0x17e   : > { %1446 = vsyncadd (!%p1280_p9), %s1032_s18, 4294967280  ;;  %s21_s20 = sadd.s32 1, %s1469_s20   ;;  %s1815_s15 = smov %s1453_s16 }
 0x17f   : > { %p18_p10 = scmp.ge.s32.totalorder %s21_s20, 4   ;;  %s1816_s16 = smov %s1457_s17 }
 0x180   : > { %s1817_s17 = smov %s1551_s28  ;;  %s1818_s18 = smov %s1465_s19 }
 0x181   : > { %s1819_s19 = smov %s1821_s23  ;;  %20 = sbr.rel (!%p18_p10) target bundleno = 6 (0x6), region = 103 }
 0x188   :  { %1036 = vsyncpa [#allocation4], 1 }
 0x189   :  { %1038 = vsyncpa [#allocation4 + $0x1], 1 }
 0x18a   :  { %1039 = vsyncpa [#allocation6], 1 }
 0x18b   :  { %1041 = vsyncpa [#allocation6 + $0x1], 1 }

// kernel: residual_forward.7
= control target key start
LH: loop header
LB: loop body
LE: loop exit
PB: predicated region body
PF: predicated region fallthrough
CT: control target
= control target key end

     0   :  { %s2357_s15 = smov 0   ;;  %s2359_s16 = smov 0   ;;  %s2901_s0 = inlined_call_operand.vmem [shape: bf16[512,1152], index: 0, kind: input, shape index: {}]   ;;  %s2902_s1 = inlined_call_operand.vmem [shape: bf16[1152,128], index: 1, kind: input, shape index: {}]   ;;  %s2903_s2 = inlined_call_operand.vmem [shape: f32[512,128], index: 2, kind: output, shape index: {0}]   ;;  %s2904_s3 = inlined_call_operand.vmem [shape: f32[2,1,128], index: 3, kind: output, shape index: {1}]   ;;  %s2905_s4 = inlined_call_operand.vmem [shape: f32[2,1,128], index: 4, kind: output, shape index: {2}]  }
   0x1   :  { %s2361_s17 = smov 0   ;;  %s2363_s18 = smov 0  }
   0x2   :  { %s2365_s19 = smov 0   ;;  %s2367_s20 = smov 0  }
   0x3   :  { %s2369_s21 = smov 0  }
   0x4 LB: > { %s27_s22 = sadd.s32 1, %s2321_s19  ;;  %s34_s23 = sadd.s32 1, %s2325_s20  ;;  %s2329_s21 = sphi %s2369_s21, %s15_s21   ;;  %s2325_s20 = sphi %s2367_s20, %s2911_s20   ;;  %s2321_s19 = sphi %s2365_s19, %s2910_s19   ;;  %s2317_s18 = sphi %s2363_s18, %s2909_s18   ;;  %s2313_s17 = sphi %s2361_s17, %s2908_s17   ;;  %s2309_s16 = sphi %s2359_s16, %s2907_s16   ;;  %s2305_s15 = sphi %s2357_s15, %s2906_s15  }
   0x5   : > { %p28_p0 = scmp.ge.s32.totalorder %s27_s22, 3  ;;  %p50_p1 = scmp.ne.s32.totalorder %s2309_s16, %s2305_s15 }
   0x6   : > { %p51_p2 = scmp.eq.s32.totalorder %s2329_s21, 0  ;;  %s43_s27 = sadd.s32 1, %s2309_s16 }
   0x7   : > { %s2913_s22 = smov (%p28_p0, %s27_s22), 0  ;;  %s2915_s23 = smov (!%p28_p0, %s34_s23), %s2325_s20 }
   0x8   : > { %p52_p3 = por %p51_p2, %p50_p1  ;;  %p36_p4 = scmp.ge.s32.totalorder %s2915_s23, 2 }
   0x9   : > { %s39_s24 = ssub.s32 %s2321_s19, %s2913_s22  ;;  %p1779_p6 = scmp.ge.s32.totalorder %s2329_s21, 6 }
   0xa   : > { %s2917_s23 = smov (%p36_p4, %s2915_s23), 0 }
   0xb   : > { %s38_s25 = ssub.s32 %s2325_s20, %s2917_s23  ;;  %188 = sbr.rel (%p1779_p6) target bundleno = 64 (0x40), region = 16 }
   0xc   : > { %s40_s26 = sor.u32 %s39_s24, %s38_s25 }
   0xd   : > { %p41_p5 = scmp.eq.s32.totalorder %s40_s26, 0 }
   0xf   : > { %s2408_s28 = scalar_select %p41_p5, %s2309_s16, %s43_s27  }
  0x12   : > { %191 = sbr.rel (!%p52_p3) target bundleno = 64 (0x40), region = 20  ;;  %s193_s29 = sand.u32 (%p52_p3), 1, %s2309_s16  }
  0x13   : > { %s197_s30 = smul.u32 (%p52_p3), 3, %s2321_s19 }
  0x14   : > { %s2127_s5 = smul.u32 (%p52_p3), 384, %s193_s29 }
  0x15   : > { %s2128_s6 = smul.u32 (%p52_p3), 288, %s2325_s20 }
  0x16   : > { %s2422_s12 = scalar_lea.vmem (%p52_p3), [#allocation3], %s2127_s5 }
  0x17   : > { %s199_s7 = sadd.s32 (%p52_p3), %s2128_s6, %s197_s30 }
  0x18   : > { %s1782_s8 = sshll.u32 (%p52_p3), %s199_s7, 2 }
  0x19   : > { %s2417_s11 = scalar_lea.vmem %s2901_s0, %s1782_s8 }
  0x1a   : > { %v216_v0 = vld [vmem:[%s2417_s11] sm:$0xff]  ;;  %v220_v2 = vld [vmem:[%s2417_s11 + $0x48] sm:$0xff]  ;;  %v224_v4 = vld [vmem:[%s2417_s11 + $0x90] sm:$0xff] }
  0x1b   : > { %v218_v1 = vld [vmem:[%s2417_s11 + $0x24] sm:$0xff]  ;;  %217 = vst [vmem:[%s2422_s12] sm:$0xff] %v216_v0  ;;  %221 = vst [vmem:[%s2422_s12 + $0x18] sm:$0xff] %v220_v2  ;;  %v222_v3 = vld [vmem:[%s2417_s11 + $0x6c] sm:$0xff] }
  0x1c   : > { %219 = vst [vmem:[%s2422_s12 + $0xc] sm:$0xff] %v218_v1  ;;  %v226_v5 = vld [vmem:[%s2417_s11 + $0xb4] sm:$0xff]  ;;  %223 = vst [vmem:[%s2422_s12 + $0x24] sm:$0xff] %v222_v3  ;;  %v230_v7 = vld [vmem:[%s2417_s11 + $0xfc] sm:$0xff] }
  0x1d   : > { %225 = vst [vmem:[%s2422_s12 + $0x30] sm:$0xff] %v224_v4  ;;  %227 = vst [vmem:[%s2422_s12 + $0x3c] sm:$0xff] %v226_v5  ;;  %v228_v6 = vld [vmem:[%s2417_s11 + $0xd8] sm:$0xff]  ;;  %v232_v8 = vld [vmem:[%s2417_s11 + $0x120] sm:$0xff] }
  0x1e   : > { %229 = vst [vmem:[%s2422_s12 + $0x48] sm:$0xff] %v228_v6  ;;  %231 = vst [vmem:[%s2422_s12 + $0x54] sm:$0xff] %v230_v7  ;;  %v234_v9 = vld [vmem:[%s2417_s11 + $0x144] sm:$0xff]  ;;  %v238_v11 = vld [vmem:[%s2417_s11 + $0x18c] sm:$0xff] }
  0x1f   : > { %233 = vst [vmem:[%s2422_s12 + $0x60] sm:$0xff] %v232_v8  ;;  %v236_v10 = vld [vmem:[%s2417_s11 + $0x168] sm:$0xff]  ;;  %235 = vst [vmem:[%s2422_s12 + $0x6c] sm:$0xff] %v234_v9  ;;  %v240_v12 = vld [vmem:[%s2417_s11 + $0x1b0] sm:$0xff] }
  0x20   : > { %237 = vst [vmem:[%s2422_s12 + $0x78] sm:$0xff] %v236_v10  ;;  %239 = vst [vmem:[%s2422_s12 + $0x84] sm:$0xff] %v238_v11  ;;  %v242_v13 = vld [vmem:[%s2417_s11 + $0x1d4] sm:$0xff]  ;;  %v246_v15 = vld [vmem:[%s2417_s11 + $0x21c] sm:$0xff] }
  0x21   : > { %v244_v14 = vld [vmem:[%s2417_s11 + $0x1f8] sm:$0xff]  ;;  %241 = vst [vmem:[%s2422_s12 + $0x90] sm:$0xff] %v240_v12  ;;  %243 = vst [vmem:[%s2422_s12 + $0x9c] sm:$0xff] %v242_v13  ;;  %v248_v16 = vld [vmem:[%s2417_s11 + $0x240] sm:$0xff] }
  0x22   : > { %245 = vst [vmem:[%s2422_s12 + $0xa8] sm:$0xff] %v244_v14  ;;  %v250_v17 = vld [vmem:[%s2417_s11 + $0x264] sm:$0xff]  ;;  %247 = vst [vmem:[%s2422_s12 + $0xb4] sm:$0xff] %v246_v15  ;;  %v254_v19 = vld [vmem:[%s2417_s11 + $0x2ac] sm:$0xff] }
  0x23   : > { %249 = vst [vmem:[%s2422_s12 + $0xc0] sm:$0xff] %v248_v16  ;;  %251 = vst [vmem:[%s2422_s12 + $0xcc] sm:$0xff] %v250_v17  ;;  %v252_v18 = vld [vmem:[%s2417_s11 + $0x288] sm:$0xff]  ;;  %v256_v20 = vld [vmem:[%s2417_s11 + $0x2d0] sm:$0xff] }
  0x24   : > { %253 = vst [vmem:[%s2422_s12 + $0xd8] sm:$0xff] %v252_v18  ;;  %255 = vst [vmem:[%s2422_s12 + $0xe4] sm:$0xff] %v254_v19  ;;  %v258_v21 = vld [vmem:[%s2417_s11 + $0x2f4] sm:$0xff]  ;;  %v262_v23 = vld [vmem:[%s2417_s11 + $0x33c] sm:$0xff] }
  0x25   : > { %257 = vst [vmem:[%s2422_s12 + $0xf0] sm:$0xff] %v256_v20  ;;  %v260_v22 = vld [vmem:[%s2417_s11 + $0x318] sm:$0xff]  ;;  %259 = vst [vmem:[%s2422_s12 + $0xfc] sm:$0xff] %v258_v21  ;;  %v264_v24 = vld [vmem:[%s2417_s11 + $0x360] sm:$0xff] }
  0x26   : > { %261 = vst [vmem:[%s2422_s12 + $0x108] sm:$0xff] %v260_v22  ;;  %263 = vst [vmem:[%s2422_s12 + $0x114] sm:$0xff] %v262_v23  ;;  %v266_v25 = vld [vmem:[%s2417_s11 + $0x384] sm:$0xff]  ;;  %v270_v27 = vld [vmem:[%s2417_s11 + $0x3cc] sm:$0xff] }
  0x27   : > { %v268_v26 = vld [vmem:[%s2417_s11 + $0x3a8] sm:$0xff]  ;;  %265 = vst [vmem:[%s2422_s12 + $0x120] sm:$0xff] %v264_v24  ;;  %267 = vst [vmem:[%s2422_s12 + $0x12c] sm:$0xff] %v266_v25  ;;  %v272_v28 = vld [vmem:[%s2417_s11 + $0x3f0] sm:$0xff] }
  0x28   : > { %269 = vst [vmem:[%s2422_s12 + $0x138] sm:$0xff] %v268_v26  ;;  %v274_v29 = vld [vmem:[%s2417_s11 + $0x414] sm:$0xff]  ;;  %271 = vst [vmem:[%s2422_s12 + $0x144] sm:$0xff] %v270_v27  ;;  %v278_v31 = vld [vmem:[%s2417_s11 + $0x45c] sm:$0xff] }
  0x29   : > { %273 = vst [vmem:[%s2422_s12 + $0x150] sm:$0xff] %v272_v28  ;;  %275 = vst [vmem:[%s2422_s12 + $0x15c] sm:$0xff] %v274_v29  ;;  %v276_v30 = vld [vmem:[%s2417_s11 + $0x438] sm:$0xff]  ;;  %v1783_v32 = vld [vmem:[%s2417_s11 + $0x8] sm:$0xf] }
  0x2a   : > { %277 = vst [vmem:[%s2422_s12 + $0x168] sm:$0xff] %v276_v30  ;;  %279 = vst [vmem:[%s2422_s12 + $0x174] sm:$0xff] %v278_v31  ;;  %v1785_v33 = vld [vmem:[%s2417_s11 + $0x2c] sm:$0xf]  ;;  %v1787_v34 = vld [vmem:[%s2417_s11 + $0x50] sm:$0xf] }
  0x2b   : > { %1784 = vst [vmem:[%s2422_s12 + $0x8] sm:$0xf] %v1783_v32  ;;  %v1789_v35 = vld [vmem:[%s2417_s11 + $0x74] sm:$0xf]  ;;  %1786 = vst [vmem:[%s2422_s12 + $0x14] sm:$0xf] %v1785_v33 }
  0x2c   : > { %1788 = vst [vmem:[%s2422_s12 + $0x20] sm:$0xf] %v1787_v34  ;;  %1790 = vst [vmem:[%s2422_s12 + $0x2c] sm:$0xf] %v1789_v35  ;;  %v1791_v36 = vld [vmem:[%s2417_s11 + $0x98] sm:$0xf] }
  0x2d   : > { %v1793_v37 = vld [vmem:[%s2417_s11 + $0xbc] sm:$0xf]  ;;  %v1795_v38 = vld [vmem:[%s2417_s11 + $0xe0] sm:$0xf]  ;;  %1792 = vst [vmem:[%s2422_s12 + $0x38] sm:$0xf] %v1791_v36 }
  0x2e   : > { %1794 = vst [vmem:[%s2422_s12 + $0x44] sm:$0xf] %v1793_v37  ;;  %1796 = vst [vmem:[%s2422_s12 + $0x50] sm:$0xf] %v1795_v38  ;;  %v1797_v39 = vld [vmem:[%s2417_s11 + $0x104] sm:$0xf] }
  0x2f   : > { %v1799_v40 = vld [vmem:[%s2417_s11 + $0x128] sm:$0xf]  ;;  %v1801_v41 = vld [vmem:[%s2417_s11 + $0x14c] sm:$0xf]  ;;  %1798 = vst [vmem:[%s2422_s12 + $0x5c] sm:$0xf] %v1797_v39 }
  0x30   : > { %1800 = vst [vmem:[%s2422_s12 + $0x68] sm:$0xf] %v1799_v40  ;;  %1802 = vst [vmem:[%s2422_s12 + $0x74] sm:$0xf] %v1801_v41  ;;  %v1803_v42 = vld [vmem:[%s2417_s11 + $0x170] sm:$0xf] }
  0x31   : > { %v1805_v43 = vld [vmem:[%s2417_s11 + $0x194] sm:$0xf]  ;;  %v1807_v44 = vld [vmem:[%s2417_s11 + $0x1b8] sm:$0xf]  ;;  %1804 = vst [vmem:[%s2422_s12 + $0x80] sm:$0xf] %v1803_v42 }
  0x32   : > { %1806 = vst [vmem:[%s2422_s12 + $0x8c] sm:$0xf] %v1805_v43  ;;  %1808 = vst [vmem:[%s2422_s12 + $0x98] sm:$0xf] %v1807_v44  ;;  %v1809_v45 = vld [vmem:[%s2417_s11 + $0x1dc] sm:$0xf] }
  0x33   : > { %v1811_v46 = vld [vmem:[%s2417_s11 + $0x200] sm:$0xf]  ;;  %v1813_v47 = vld [vmem:[%s2417_s11 + $0x224] sm:$0xf]  ;;  %1810 = vst [vmem:[%s2422_s12 + $0xa4] sm:$0xf] %v1809_v45 }
  0x34   : > { %1812 = vst [vmem:[%s2422_s12 + $0xb0] sm:$0xf] %v1811_v46  ;;  %1814 = vst [vmem:[%s2422_s12 + $0xbc] sm:$0xf] %v1813_v47  ;;  %v1815_v48 = vld [vmem:[%s2417_s11 + $0x248] sm:$0xf] }
  0x35   : > { %v1817_v49 = vld [vmem:[%s2417_s11 + $0x26c] sm:$0xf]  ;;  %v1819_v50 = vld [vmem:[%s2417_s11 + $0x290] sm:$0xf]  ;;  %1816 = vst [vmem:[%s2422_s12 + $0xc8] sm:$0xf] %v1815_v48 }
  0x36   : > { %1818 = vst [vmem:[%s2422_s12 + $0xd4] sm:$0xf] %v1817_v49  ;;  %1820 = vst [vmem:[%s2422_s12 + $0xe0] sm:$0xf] %v1819_v50  ;;  %v1821_v51 = vld [vmem:[%s2417_s11 + $0x2b4] sm:$0xf] }
  0x37   : > { %v1823_v52 = vld [vmem:[%s2417_s11 + $0x2d8] sm:$0xf]  ;;  %v1825_v53 = vld [vmem:[%s2417_s11 + $0x2fc] sm:$0xf]  ;;  %1822 = vst [vmem:[%s2422_s12 + $0xec] sm:$0xf] %v1821_v51 }
  0x38   : > { %1824 = vst [vmem:[%s2422_s12 + $0xf8] sm:$0xf] %v1823_v52  ;;  %1826 = vst [vmem:[%s2422_s12 + $0x104] sm:$0xf] %v1825_v53  ;;  %v1827_v54 = vld [vmem:[%s2417_s11 + $0x320] sm:$0xf] }
  0x39   : > { %v1829_v55 = vld [vmem:[%s2417_s11 + $0x344] sm:$0xf]  ;;  %v1831_v56 = vld [vmem:[%s2417_s11 + $0x368] sm:$0xf]  ;;  %1828 = vst [vmem:[%s2422_s12 + $0x110] sm:$0xf] %v1827_v54 }
  0x3a   : > { %1830 = vst [vmem:[%s2422_s12 + $0x11c] sm:$0xf] %v1829_v55  ;;  %1832 = vst [vmem:[%s2422_s12 + $0x128] sm:$0xf] %v1831_v56  ;;  %v1833_v57 = vld [vmem:[%s2417_s11 + $0x38c] sm:$0xf] }
  0x3b   : > { %v1835_v58 = vld [vmem:[%s2417_s11 + $0x3b0] sm:$0xf]  ;;  %v1837_v59 = vld [vmem:[%s2417_s11 + $0x3d4] sm:$0xf]  ;;  %1834 = vst [vmem:[%s2422_s12 + $0x134] sm:$0xf] %v1833_v57 }
  0x3c   : > { %1836 = vst [vmem:[%s2422_s12 + $0x140] sm:$0xf] %v1835_v58  ;;  %1838 = vst [vmem:[%s2422_s12 + $0x14c] sm:$0xf] %v1837_v59  ;;  %v1839_v60 = vld [vmem:[%s2417_s11 + $0x3f8] sm:$0xf] }
  0x3d   : > { %v1841_v61 = vld [vmem:[%s2417_s11 + $0x41c] sm:$0xf]  ;;  %v1843_v62 = vld [vmem:[%s2417_s11 + $0x440] sm:$0xf]  ;;  %1840 = vst [vmem:[%s2422_s12 + $0x158] sm:$0xf] %v1839_v60 }
  0x3e   : > { %1842 = vst [vmem:[%s2422_s12 + $0x164] sm:$0xf] %v1841_v61  ;;  %1844 = vst [vmem:[%s2422_s12 + $0x170] sm:$0xf] %v1843_v62  ;;  %v1845_v63 = vld [vmem:[%s2417_s11 + $0x464] sm:$0xf] }
  0x3f   : > { %1846 = vst [vmem:[%s2422_s12 + $0x17c] sm:$0xf] %v1845_v63 }
  0x40 PF: > { %p1847_p7 = scmp.ge.s32.totalorder %s2329_s21, 1  ;;  %p367_p8 = scmp.lt.s32.totalorder %s2329_s21, 7 }
  0x42   : > { %p368_p9 = pnand %p1847_p7, %p367_p8 }
  0x43   : > { %s374_s13 = sand.u32 (!%p368_p9), 1, %s2305_s15   ;;  %s424_s14 = smul.u32 (!%p368_p9), 48, %s2313_s17 }
  0x44   : > { %371 = sbr.rel (%p368_p9) target bundleno = 508 (0x1fc), region = 50  ;;  %s1849_s25 = sshll.u32 (!%p368_p9), %s2317_s18, 5 }
  0x45   : > { %s2129_s24 = smul.u32 (!%p368_p9), 384, %s374_s13  ;;  %p425_p10 = scmp.lt.s32.totalorder (!%p368_p9), %s424_s14, 143 }
  0x46   : > { %p434_p11 = scmp.lt.s32.totalorder (!%p368_p9), %s1849_s25, 63  ;;  %p442_p12 = scmp.lt.s32.totalorder (!%p368_p9), %s2317_s18, 1 }
  0x47   : > { %p1851_p13 = scmp.ne.s32.totalorder (!%p368_p9), %s2313_s17, 0 }
  0x4b   : > { %s2919_s14 = smov (!%p425_p10, %s424_s14), 143  ;;  %s2921_s25 = smov (!%p434_p11, %s1849_s25), 63 }
  0x4c   : > { %s1848_s26 = sshll.u32 %s2919_s14, 2  ;;  %s1850_s5 = sshll.u32 %s2921_s25, 3  ;;  %v2331_v0 = vmov (!%p1851_p13), 0.0  }
  0x4d   : > { %s2558_s30 = scalar_lea.vmem %s2902_s1, %s1848_s26  ;;  %s2563_s8 = scalar_lea.vmem %s2903_s2, %s1850_s5  ;;  %459 = vst [vmem:[#allocation2] sm:$0xff] (!%p1851_p13), %v2331_v0  ;;  %460 = vst [vmem:[#allocation2 + $0x8] sm:$0xff] (!%p1851_p13), %v2331_v0 }
  0x4e   : > { %s2923_s18 = smov (!%p442_p12, %s2317_s18), 1  ;;  %s2576_s14 = scalar_lea.vmem [#allocation3], %s2129_s24  ;;  %461 = vst [vmem:[#allocation2 + $0x10] sm:$0xff] (!%p1851_p13), %v2331_v0  ;;  %462 = vst [vmem:[#allocation2 + $0x18] sm:$0xff] (!%p1851_p13), %v2331_v0 }
  0x4f   : > { %s447_s10 = scalar_lea.vmem %s2904_s3, %s2923_s18  ;;  %s453_s13 = scalar_lea.vmem %s2905_s4, %s2923_s18  ;;  %463 = vst [vmem:[#allocation2 + $0x20] sm:$0xff] (!%p1851_p13), %v2331_v0  ;;  %464 = vst [vmem:[#allocation2 + $0x28] sm:$0xff] (!%p1851_p13), %v2331_v0 }
  0x50   : > { %458 = sbr.rel (%p1851_p13) target bundleno = 93 (0x5d), region = 58  ;;  %465 = vst [vmem:[#allocation2 + $0x30] sm:$0xff] (!%p1851_p13), %v2331_v0  ;;  %466 = vst [vmem:[#allocation2 + $0x38] sm:$0xff] (!%p1851_p13), %v2331_v0 }
  0x51   : > { %467 = vst [vmem:[#allocation2 + $0x40] sm:$0xff] (!%p1851_p13), %v2331_v0  ;;  %468 = vst [vmem:[#allocation2 + $0x48] sm:$0xff] (!%p1851_p13), %v2331_v0 }
  0x52   : > { %469 = vst [vmem:[#allocation2 + $0x50] sm:$0xff] (!%p1851_p13), %v2331_v0  ;;  %470 = vst [vmem:[#allocation2 + $0x58] sm:$0xff] (!%p1851_p13), %v2331_v0 }
  0x53   : > { %471 = vst [vmem:[#allocation2 + $0x60] sm:$0xff] (!%p1851_p13), %v2331_v0  ;;  %472 = vst [vmem:[#allocation2 + $0x68] sm:$0xff] (!%p1851_p13), %v2331_v0 }
  0x54   : > { %473 = vst [vmem:[#allocation2 + $0x70] sm:$0xff] (!%p1851_p13), %v2331_v0  ;;  %474 = vst [vmem:[#allocation2 + $0x78] sm:$0xff] (!%p1851_p13), %v2331_v0 }
  0x55   : > { %475 = vst [vmem:[#allocation2 + $0x80] sm:$0xff] (!%p1851_p13), %v2331_v0  ;;  %476 = vst [vmem:[#allocation2 + $0x88] sm:$0xff] (!%p1851_p13), %v2331_v0 }
  0x56   : > { %477 = vst [vmem:[#allocation2 + $0x90] sm:$0xff] (!%p1851_p13), %v2331_v0  ;;  %478 = vst [vmem:[#allocation2 + $0x98] sm:$0xff] (!%p1851_p13), %v2331_v0 }
  0x57   : > { %479 = vst [vmem:[#allocation2 + $0xa0] sm:$0xff] %v2331_v0  ;;  %480 = vst [vmem:[#allocation2 + $0xa8] sm:$0xff] %v2331_v0 }
  0x58   : > { %481 = vst [vmem:[#allocation2 + $0xb0] sm:$0xff] %v2331_v0  ;;  %482 = vst [vmem:[#allocation2 + $0xb8] sm:$0xff] %v2331_v0 }
  0x59   : > { %483 = vst [vmem:[#allocation2 + $0xc0] sm:$0xff] %v2331_v0  ;;  %484 = vst [vmem:[#allocation2 + $0xc8] sm:$0xff] %v2331_v0 }
  0x5a   : > { %485 = vst [vmem:[#allocation2 + $0xd0] sm:$0xff] %v2331_v0  ;;  %486 = vst [vmem:[#allocation2 + $0xd8] sm:$0xff] %v2331_v0 }
  0x5b   : > { %487 = vst [vmem:[#allocation2 + $0xe0] sm:$0xff] %v2331_v0  ;;  %488 = vst [vmem:[#allocation2 + $0xe8] sm:$0xff] %v2331_v0 }
  0x5c   : > { %489 = vst [vmem:[#allocation2 + $0xf0] sm:$0xff] %v2331_v0  ;;  %490 = vst [vmem:[#allocation2 + $0xf8] sm:$0xff] %v2331_v0 }
  0x5d PF: > { %v2187_v1 = vld [vmem:[%s2558_s30 + $0x40] sm:$0xff]   ;;  %v2189_v3 = vld [vmem:[%s2558_s30 + $0x48] sm:$0xff]   ;;  %v2191_v5 = vld [vmem:[%s2558_s30 + $0x50] sm:$0xff]   ;;  %p1924_p0 = scmp.ne.s32.totalorder %s2313_s17, 2 }
  0x5e   : > { %v2188_v2 = vld [vmem:[%s2558_s30] sm:$0xff]   ;;  %1927 = vmatprep.subr.bf16.mxu0 %v2187_v1  ;;  %2111 = vmatprep.subr.bf16.mxu1 %v2187_v1  ;;  %v2190_v4 = vld [vmem:[%s2558_s30 + $0x8] sm:$0xff]   ;;  %v2192_v6 = vld [vmem:[%s2558_s30 + $0x10] sm:$0xff]  }
  0x5f   : > { %1928 = vmatpush3.bf16.msra.mxu0 %v2188_v2  ;;  %2119 = vmatpush3.bf16.msra.mxu1 %v2188_v2  ;;  %v2193_v7 = vld [vmem:[%s2558_s30 + $0x58] sm:$0xff]   ;;  %v2195_v9 = vld [vmem:[%s2558_s30 + $0x60] sm:$0xff]   ;;  %v2197_v11 = vld [vmem:[%s2558_s30 + $0x68] sm:$0xff]  }
  0x60   : > { %1929 = vmatprep.subr.bf16.mxu0 %v2189_v3  ;;  %2112 = vmatprep.subr.bf16.mxu1 %v2189_v3  ;;  %v2194_v8 = vld [vmem:[%s2558_s30 + $0x18] sm:$0xff]   ;;  %v2196_v10 = vld [vmem:[%s2558_s30 + $0x20] sm:$0xff]   ;;  %v2198_v14 = vld [vmem:[%s2558_s30 + $0x28] sm:$0xff]  }
  0x61   : > { %v2205_v12 = vld [vmem:[%s2576_s14 + $0x4] ss:$12 sps:$4 sm:$0xff]   ;;  %v2201_v17 = vld [vmem:[%s2558_s30 + $0x78] sm:$0xff]   ;;  %v2203_v20 = vld [vmem:[%s2576_s14] ss:$12 sps:$4 sm:$0xff]  }
  0x62   : > { %v2208_v13 = vld [vmem:[%s2576_s14 + $0x124] ss:$12 sps:$4 sm:$0xff]   ;;  %1067 = vmatprep.mubr.bf16.mxu0 %v2205_v12  ;;  %v2202_v18 = vld [vmem:[%s2558_s30 + $0x38] sm:$0xff]   ;;  %v2206_v21 = vld [vmem:[%s2576_s14 + $0x120] ss:$12 sps:$4 sm:$0xff]  }
  0x63   : > { %1930 = vmatpush3.bf16.msra.mxu0 %v2190_v4  ;;  %2120 = vmatpush3.bf16.msra.mxu1 %v2190_v4  ;;  %v2199_v15 = vld [vmem:[%s2558_s30 + $0x70] sm:$0xff]   ;;  %v2209_v19 = vld [vmem:[%s2558_s30 + $0x80] sm:$0xff]   ;;  %v2211_v22 = vld [vmem:[%s2576_s14 + $0x1c] ss:$12 sps:$4 sm:$0xff]  }
  0x64   : > { %1931 = vmatprep.subr.bf16.mxu0 %v2191_v5  ;;  %2113 = vmatprep.subr.bf16.mxu1 %v2191_v5  ;;  %v2200_v16 = vld [vmem:[%s2558_s30 + $0x30] sm:$0xff]   ;;  %v2210_v23 = vld [vmem:[%s2558_s30 + $0x88] sm:$0xff]   ;;  %v2215_v25 = vld [vmem:[%s2576_s14 + $0x18] ss:$12 sps:$4 sm:$0xff]  }
  0x65   : > { %1163 = vmatprep.mubr.bf16.mxu1 %v2208_v13  ;;  %v2213_v24 = vld [vmem:[%s2576_s14 + $0x13c] ss:$12 sps:$4 sm:$0xff]   ;;  %v2217_v26 = vld [vmem:[%s2558_s30 + $0x90] sm:$0xff]   ;;  %v2216_v27 = vld [vmem:[%s2576_s14 + $0x138] ss:$12 sps:$4 sm:$0xff]  }
  0x66   : > { %v2218_v28 = vld [vmem:[%s2558_s30 + $0x98] sm:$0xff]   ;;  %v2219_v29 = vld [vmem:[%s2576_s14 + $0x34] ss:$12 sps:$4 sm:$0xff]   ;;  %v2226_v34 = vld [vmem:[%s2558_s30 + $0xa8] sm:$0xff]  }
  0x67   : > { %1932 = vmatpush3.bf16.msra.mxu0 %v2192_v6  ;;  %2121 = vmatpush3.bf16.msra.mxu1 %v2192_v6  ;;  %v2221_v30 = vld [vmem:[%s2576_s14 + $0x154] ss:$12 sps:$4 sm:$0xff]   ;;  %v2223_v32 = vld [vmem:[%s2576_s14 + $0x30] ss:$12 sps:$4 sm:$0xff]   ;;  %v2227_v35 = vld [vmem:[%s2576_s14 + $0x4c] ss:$12 sps:$4 sm:$0xff]  }
  0x68   : > { %1933 = vmatprep.subr.bf16.mxu0 %v2193_v7  ;;  %2114 = vmatprep.subr.bf16.mxu1 %v2193_v7  ;;  %v2225_v31 = vld [vmem:[%s2558_s30 + $0xa0] sm:$0xff]   ;;  %v2224_v33 = vld [vmem:[%s2576_s14 + $0x150] ss:$12 sps:$4 sm:$0xff]   ;;  %v2229_v36 = vld [vmem:[%s2576_s14 + $0x16c] ss:$12 sps:$4 sm:$0xff]  }
  0x69   : > { %v2233_v37 = vld [vmem:[%s2558_s30 + $0xb0] sm:$0xff]   ;;  %v2234_v41 = vld [vmem:[%s2558_s30 + $0xb8] sm:$0xff]   ;;  %v2238_v43 = vld [vmem:[%s2576_s14 + $0x60] ss:$12 sps:$4 sm:$0xff]  }
  0x6a   : > { %v2231_v38 = vld [vmem:[%s2576_s14 + $0x48] ss:$12 sps:$4 sm:$0xff]   ;;  %v2235_v40 = vld [vmem:[%s2576_s14 + $0x64] ss:$12 sps:$4 sm:$0xff]   ;;  %v2239_v44 = vld [vmem:[%s2576_s14 + $0x20] ss:$12 sps:$4 sm:$0xff]  }
  0x6b   : > { %1934 = vmatpush3.bf16.msra.mxu0 %v2194_v8  ;;  %2122 = vmatpush3.bf16.msra.mxu1 %v2194_v8  ;;  %v2232_v39 = vld [vmem:[%s2576_s14 + $0x168] ss:$12 sps:$4 sm:$0xff]   ;;  %v2242_v46 = vld [vmem:[%s2576_s14 + $0x38] ss:$12 sps:$4 sm:$0xff]   ;;  %v2244_v48 = vld [vmem:[%s2576_s14 + $0x50] ss:$12 sps:$4 sm:$0xff]  }
  0x6c   : > { %1935 = vmatprep.subr.bf16.mxu0 %v2195_v9  ;;  %2115 = vmatprep.subr.bf16.mxu1 %v2195_v9  ;;  %v2237_v42 = vld [vmem:[%s2576_s14 + $0x8] ss:$12 sps:$4 sm:$0xff]   ;;  %v2243_v47 = vld [vmem:[%s2576_s14 + $0x78] ss:$12 sps:$4 sm:$0xff]   ;;  %v2248_v51 = vld [vmem:[%s2576_s14 + $0x90] ss:$12 sps:$4 sm:$0xff]  }
  0x6d   : > { %v2240_v45 = vld [vmem:[%s2576_s14 + $0x7c] ss:$12 sps:$4 sm:$0xff]   ;;  %v2245_v49 = vld [vmem:[%s2576_s14 + $0x94] ss:$12 sps:$4 sm:$0xff]   ;;  %v2250_v53 = vld [vmem:[%s2576_s14 + $0xac] ss:$12 sps:$4 sm:$0xff]  }
  0x6e   : > { %v2247_v50 = vld [vmem:[%s2576_s14 + $0x68] ss:$12 sps:$4 sm:$0xff]   ;;  %v2249_v52 = vld [vmem:[%s2576_s14 + $0x80] ss:$12 sps:$4 sm:$0xff]   ;;  %v2252_v54 = vld [vmem:[%s2576_s14 + $0x98] ss:$12 sps:$4 sm:$0xff]  }
  0x6f   : > { %1936 = vmatpush3.bf16.msra.mxu0 %v2196_v10  ;;  %2123 = vmatpush3.bf16.msra.mxu1 %v2196_v10  ;;  %v2253_v55 = vld [vmem:[%s2576_s14 + $0xa8] ss:$12 sps:$4 sm:$0xff]   ;;  %v2254_v56 = vld [vmem:[%s2576_s14 + $0xb0] ss:$12 sps:$4 sm:$0xff]   ;;  %v2258_v59 = vld [vmem:[%s2576_s14 + $0xc0] ss:$12 sps:$4 sm:$0xff]  }
  0x70   : > { %1937 = vmatprep.subr.bf16.mxu0 %v2197_v11  ;;  %2116 = vmatprep.subr.bf16.mxu1 %v2197_v11  ;;  %v2255_v57 = vld [vmem:[%s2576_s14 + $0xc4] ss:$12 sps:$4 sm:$0xff]   ;;  %v2257_v58 = vld [vmem:[%s2576_s14 + $0xc8] ss:$12 sps:$4 sm:$0xff]   ;;  %v2259_v60 = vld [vmem:[%s2576_s14 + $0xe0] ss:$12 sps:$4 sm:$0xff]  }
  0x71   : > { %v2260_v61 = vld [vmem:[%s2576_s14 + $0xdc] ss:$12 sps:$4 sm:$0xff]   ;;  %v2262_v62 = vld [vmem:[%s2576_s14 + $0xf8] ss:$12 sps:$4 sm:$0xff]   ;;  %v2265_v1 = vld [vmem:[%s2576_s14 + $0xf4] ss:$12 sps:$4 sm:$0xff]  }
  0x72   : > { %v2263_v63 = vld [vmem:[%s2576_s14 + $0xd8] ss:$12 sps:$4 sm:$0xff]   ;;  %v2264_v0 = vld [vmem:[%s2576_s14 + $0x110] ss:$12 sps:$4 sm:$0xff]   ;;  %v2267_v2 = vld [vmem:[%s2576_s14 + $0x128] ss:$12 sps:$4 sm:$0xff]  }
  0x73   : > { %1938 = vmatpush3.bf16.msra.mxu0 %v2198_v14  ;;  %2124 = vmatpush3.bf16.msra.mxu1 %v2198_v14  ;;  %v2268_v3 = vld [vmem:[%s2576_s14 + $0xf0] ss:$12 sps:$4 sm:$0xff]   ;;  %v2269_v4 = vld [vmem:[%s2576_s14 + $0x140] ss:$12 sps:$4 sm:$0xff]   ;;  %v2272_v6 = vld [vmem:[%s2576_s14 + $0x158] ss:$12 sps:$4 sm:$0xff]  }
  0x74   : > { %1939 = vmatprep.subr.bf16.mxu0 %v2199_v15  ;;  %2117 = vmatprep.subr.bf16.mxu1 %v2199_v15  ;;  %v2270_v5 = vld [vmem:[%s2576_s14 + $0x10c] ss:$12 sps:$4 sm:$0xff]   ;;  %v2273_v7 = vld [vmem:[%s2576_s14 + $0x108] ss:$12 sps:$4 sm:$0xff]   ;;  %v2274_v8 = vld [vmem:[%s2576_s14 + $0x170] ss:$12 sps:$4 sm:$0xff]  }
  0x77   : > { %1940 = vmatpush3.bf16.msra.mxu0 %v2200_v16  ;;  %2125 = vmatpush3.bf16.msra.mxu1 %v2200_v16 }
  0x78   : > { %1941 = vmatprep.subr.bf16.mxu0 %v2201_v17  ;;  %2118 = vmatprep.subr.bf16.mxu1 %v2201_v17 }
  0x7b   : > { %1942 = vmatpush3.bf16.msra.mxu0 %v2202_v18  ;;  %2126 = vmatpush3.bf16.msra.mxu1 %v2202_v18 }
  0x7c   : > { %2063 = vmatprep.subr.bf16.mxu1 %v2209_v19 }
  0x7e   : > { %1068 = vmatmul.mubr.bf16.vlgmr.msra.gmra.mrb[0].mxu0 %v2203_v20  ;;  %1164 = vmatmul.mubr.bf16.vlgmr.msra.gmra.mrb[0].mxu1 %v2206_v21 }
  0x7f   : > { %2064 = vmatpush3.bf16.msra.mxu1 %v2209_v19  ;;  %1075 = vmatprep.mubr.bf16.mxu0 %v2211_v22 }
  0x80   : > { %2065 = vmatprep.subr.bf16.mxu1 %v2210_v23  ;;  %1171 = vmatprep.mubr.bf16.mxu1 %v2213_v24 }
  0x83   : > { %2066 = vmatpush3.bf16.msra.mxu1 %v2210_v23 }
  0x84   : > { %2067 = vmatprep.subr.bf16.mxu1 %v2217_v26 }
  0x86   : > { %1076 = vmatmul.mubr.bf16.gmra.mrb[4].mxu0 %v2215_v25  ;;  %1172 = vmatmul.mubr.bf16.gmra.mrb[4].mxu1 %v2216_v27 }
  0x87   : > { %2068 = vmatpush3.bf16.msra.mxu1 %v2217_v26  ;;  %1083 = vmatprep.mubr.bf16.mxu0 %v2219_v29 }
  0x88   : > { %2069 = vmatprep.subr.bf16.mxu1 %v2218_v28  ;;  %1179 = vmatprep.mubr.bf16.mxu1 %v2221_v30 }
  0x8b   : > { %2070 = vmatpush3.bf16.msra.mxu1 %v2218_v28 }
  0x8c   : > { %2071 = vmatprep.subr.bf16.mxu1 %v2225_v31 }
  0x8e   : > { %1084 = vmatmul.mubr.bf16.gmra.mrb[8].mxu0 %v2223_v32  ;;  %1180 = vmatmul.mubr.bf16.gmra.mrb[8].mxu1 %v2224_v33 }
  0x8f   : > { %2072 = vmatpush3.bf16.msra.mxu1 %v2225_v31  ;;  %1091 = vmatprep.mubr.bf16.mxu0 %v2227_v35 }
  0x90   : > { %2073 = vmatprep.subr.bf16.mxu1 %v2226_v34  ;;  %1187 = vmatprep.mubr.bf16.mxu1 %v2229_v36 }
  0x93   : > { %2074 = vmatpush3.bf16.msra.mxu1 %v2226_v34 }
  0x94   : > { %2075 = vmatprep.subr.bf16.mxu1 %v2233_v37 }
  0x96   : > { %1092 = vmatmul.mubr.bf16.gmra.mrb[12].mxu0 %v2231_v38  ;;  %1188 = vmatmul.mubr.bf16.gmra.mrb[12].mxu1 %v2232_v39 }
  0x97   : > { %2076 = vmatpush3.bf16.msra.mxu1 %v2233_v37  ;;  %1099 = vmatprep.mubr.bf16.mxu0 %v2235_v40 }
  0x98   : > { %2077 = vmatprep.subr.bf16.mxu1 %v2234_v41  ;;  %2079 = vmatprep.mubr.bf16.mxu1 %v2237_v42 }
  0x9b   : > { %2078 = vmatpush3.bf16.msra.mxu1 %v2234_v41 }
  0x9e   : > { %1100 = vmatmul.mubr.bf16.gmra.mrb[16].mxu0 %v2238_v43  ;;  %2080 = vmatmul.mubr.bf16.vlgmr.msra.gmra.mrb[16].mxu1 %v2239_v44 }
  0x9f   : > { %1107 = vmatprep.mubr.bf16.mxu0 %v2240_v45  ;;  %2083 = vmatprep.mubr.bf16.mxu1 %v2242_v46 }
  0xa6   : > { %1108 = vmatmul.mubr.bf16.gmra.mrb[20].mxu0 %v2243_v47  ;;  %2084 = vmatmul.mubr.bf16.gmra.mrb[20].mxu1 %v2244_v48 }
  0xa7   : > { %1115 = vmatprep.mubr.bf16.mxu0 %v2245_v49  ;;  %2087 = vmatprep.mubr.bf16.mxu1 %v2247_v50 }
  0xae   : > { %1116 = vmatmul.mubr.bf16.gmra.mrb[24].mxu0 %v2248_v51  ;;  %2088 = vmatmul.mubr.bf16.gmra.mrb[24].mxu1 %v2249_v52 }
  0xaf   : > { %1123 = vmatprep.mubr.bf16.mxu0 %v2250_v53  ;;  %2091 = vmatprep.mubr.bf16.mxu1 %v2252_v54 }
  0xb6   : > { %1124 = vmatmul.mubr.bf16.gmra.mrb[28].mxu0 %v2253_v55  ;;  %2092 = vmatmul.mubr.bf16.gmra.mrb[28].mxu1 %v2254_v56 }
  0xb7   : > { %1131 = vmatprep.mubr.bf16.mxu0 %v2255_v57  ;;  %2095 = vmatprep.mubr.bf16.mxu1 %v2257_v58  ;;  %v493_v58 = vld [vmem:[#allocation2 + $0x10] sm:$0xff] }
  0xbe   : > { %1132 = vmatmul.mubr.bf16.gmra.mrb[32].mxu0 %v2258_v59  ;;  %2096 = vmatmul.mubr.bf16.gmra.mrb[32].mxu1 %v2259_v60 }
  0xbf   : > { %1139 = vmatprep.mubr.bf16.mxu0 %v2260_v61  ;;  %2099 = vmatprep.mubr.bf16.mxu1 %v2262_v62  ;;  %v491_v62 = vld [vmem:[#allocation2] sm:$0xff] }
  0xc6   : > { %1140 = vmatmul.mubr.bf16.gmra.mrb[36].mxu0 %v2263_v63  ;;  %2100 = vmatmul.mubr.bf16.gmra.mrb[36].mxu1 %v2264_v0 }
  0xc7   : > { %1147 = vmatprep.mubr.bf16.mxu0 %v2265_v1  ;;  %2103 = vmatprep.mubr.bf16.mxu1 %v2267_v2 }
  0xce   : > { %1148 = vmatmul.mubr.bf16.gmra.mrb[40].mxu0 %v2268_v3  ;;  %2104 = vmatmul.mubr.bf16.gmra.mrb[40].mxu1 %v2269_v4  ;;  %v494_v3 = vld [vmem:[#allocation2 + $0x18] sm:$0xff] }
  0xcf   : > { %1155 = vmatprep.mubr.bf16.mxu0 %v2270_v5  ;;  %2107 = vmatprep.mubr.bf16.mxu1 %v2272_v6 }
  0xd6   : > { %1156 = vmatmul.mubr.bf16.gmra.mrb[44].mxu0 %v2273_v7  ;;  %2108 = vmatmul.mubr.bf16.gmra.mrb[44].mxu1 %v2274_v8  ;;  %v492_v8 = vld [vmem:[#allocation2 + $0x8] sm:$0xff] }
 0x151   : > { %v1943_v9 = vpop.f32.mrb[0].mxu0  ;;  %v2015_v10 = vpop.f32.mrb[0].mxu1 }
 0x152   : > { %v1944_v11 = vpop.f32.mrb[1].mxu0  ;;  %v2016_v12 = vpop.f32.mrb[1].mxu1 }
 0x153   : > { %v1945_v13 = vadd.f32 %v1944_v11, %v1943_v9  ;;  %v2651_v14 = vadd.f32 %v2016_v12, %v2015_v10  ;;  %v1946_v15 = vpop.f32.mrb[2].mxu0  ;;  %v2018_v16 = vpop.f32.mrb[2].mxu1 }
 0x154   : > { %v1947_v17 = vpop.f32.mrb[3].mxu0  ;;  %v2019_v18 = vpop.f32.mrb[3].mxu1 }
 0x155   : > { %v1948_v19 = vadd.f32 %v1947_v17, %v1946_v15  ;;  %v2653_v20 = vadd.f32 %v2019_v18, %v2018_v16  ;;  %v497_v18 = vld [vmem:[#allocation2 + $0x30] sm:$0xff] }
 0x159   : > { %v1949_v21 = vpop.f32.mrb[4].mxu0  ;;  %v2021_v22 = vpop.f32.mrb[4].mxu1 }
 0x15a   : > { %v1950_v23 = vpop.f32.mrb[5].mxu0  ;;  %v2022_v24 = vpop.f32.mrb[5].mxu1 }
 0x15b   : > { %v1951_v25 = vadd.f32 %v1950_v23, %v1949_v21  ;;  %v2655_v26 = vadd.f32 %v2022_v24, %v2021_v22  ;;  %v1952_v27 = vpop.f32.mrb[6].mxu0  ;;  %v2024_v28 = vpop.f32.mrb[6].mxu1  ;;  %v495_v23 = vld [vmem:[#allocation2 + $0x20] sm:$0xff] }
 0x15c   : > { %v1953_v29 = vpop.f32.mrb[7].mxu0  ;;  %v2025_v30 = vpop.f32.mrb[7].mxu1 }
 0x15d   : > { %v1954_v31 = vadd.f32 %v1953_v29, %v1952_v27  ;;  %v2657_v32 = vadd.f32 %v2025_v30, %v2024_v28  ;;  %v498_v29 = vld [vmem:[#allocation2 + $0x38] sm:$0xff] }
 0x161   : > { %v1955_v33 = vpop.f32.mrb[8].mxu0  ;;  %v2027_v34 = vpop.f32.mrb[8].mxu1 }
 0x162   : > { %v1956_v35 = vpop.f32.mrb[9].mxu0  ;;  %v2028_v36 = vpop.f32.mrb[9].mxu1 }
 0x163   : > { %v1957_v37 = vadd.f32 %v1956_v35, %v1955_v33  ;;  %v2659_v38 = vadd.f32 %v2028_v36, %v2027_v34  ;;  %v1958_v39 = vpop.f32.mrb[10].mxu0  ;;  %v2030_v40 = vpop.f32.mrb[10].mxu1  ;;  %v496_v34 = vld [vmem:[#allocation2 + $0x28] sm:$0xff] }
 0x164   : > { %v1959_v41 = vpop.f32.mrb[11].mxu0  ;;  %v2031_v42 = vpop.f32.mrb[11].mxu1 }
 0x165   : > { %v1960_v43 = vadd.f32 %v1959_v41, %v1958_v39  ;;  %v2661_v44 = vadd.f32 %v2031_v42, %v2030_v40 }
 0x169   : > { %v1961_v45 = vpop.f32.mrb[12].mxu0  ;;  %v2033_v46 = vpop.f32.mrb[12].mxu1 }
 0x16a   : > { %v1962_v47 = vpop.f32.mrb[13].mxu0  ;;  %v2034_v48 = vpop.f32.mrb[13].mxu1 }
 0x16b   : > { %v1963_v49 = vadd.f32 %v1962_v47, %v1961_v45  ;;  %v2663_v50 = vadd.f32 %v2034_v48, %v2033_v46  ;;  %v1964_v51 = vpop.f32.mrb[14].mxu0  ;;  %v2036_v52 = vpop.f32.mrb[14].mxu1  ;;  %v501_v46 = vld [vmem:[#allocation2 + $0x50] sm:$0xff] }
 0x16c   : > { %v1965_v53 = vpop.f32.mrb[15].mxu0  ;;  %v2037_v54 = vpop.f32.mrb[15].mxu1 }
 0x16d   : > { %v1966_v55 = vadd.f32 %v1965_v53, %v1964_v51  ;;  %v2665_v56 = vadd.f32 %v2037_v54, %v2036_v52 }
 0x171   : > { %v1967_v57 = vpop.f32.mrb[16].mxu0  ;;  %v2081_v59 = vpop.f32.mrb[16].mxu1 }
 0x172   : > { %v1239_v60 = vadd.f32 %v2081_v59, %v1951_v25  ;;  %v1968_v61 = vpop.f32.mrb[17].mxu0  ;;  %v1230_v63 = vpop.f32.mrb[17].mxu1 }
 0x173   : > { %v1969_v0 = vadd.f32 %v1968_v61, %v1967_v57  ;;  %v1231_v1 = vadd.f32 %v1945_v13, %v1230_v63  ;;  %v1970_v2 = vpop.f32.mrb[18].mxu0  ;;  %v2082_v4 = vpop.f32.mrb[18].mxu1 }
 0x174   : > { %v1359_v5 = vadd.f32 %v1239_v60, %v493_v58  ;;  %v1242_v6 = vadd.f32 %v2082_v4, %v1954_v31  ;;  %v1971_v7 = vpop.f32.mrb[19].mxu0  ;;  %v1233_v9 = vpop.f32.mrb[19].mxu1  ;;  %v500_v60 = vld [vmem:[#allocation2 + $0x48] sm:$0xff] }
 0x175   : > { %v1357_v10 = vadd.f32 %v1231_v1, %v491_v62  ;;  %v1972_v11 = vadd.f32 %v1971_v7, %v1970_v2  ;;  %v1234_v12 = vadd.f32 %v1948_v19, %v1233_v9 }
 0x176   : > { %1391 = vst [vmem:[#allocation2 + $0x10] sm:$0xff] %v1359_v5  ;;  %v1360_v15 = vadd.f32 %v1242_v6, %v494_v3  ;;  %v503_v6 = vld [vmem:[#allocation2 + $0x60] sm:$0xff] }
 0x177   : > { %1389 = vst [vmem:[#allocation2] sm:$0xff] %v1357_v10  ;;  %v1358_v16 = vadd.f32 %v1234_v12, %v492_v8 }
 0x178   : > { %1392 = vst [vmem:[#allocation2 + $0x18] sm:$0xff] %v1360_v15  ;;  %v505_v15 = vld [vmem:[#allocation2 + $0x70] sm:$0xff] }
 0x179   : > { %1390 = vst [vmem:[#allocation2 + $0x8] sm:$0xff] %v1358_v16  ;;  %v1973_v17 = vpop.f32.mrb[20].mxu0  ;;  %v2085_v13 = vpop.f32.mrb[20].mxu1 }
 0x17a   : > { %v1255_v21 = vadd.f32 %v2085_v13, %v1963_v49  ;;  %v1974_v22 = vpop.f32.mrb[21].mxu0  ;;  %v1246_v24 = vpop.f32.mrb[21].mxu1  ;;  %v499_v49 = vld [vmem:[#allocation2 + $0x40] sm:$0xff] }
 0x17b   : > { %v1975_v25 = vadd.f32 %v1974_v22, %v1973_v17  ;;  %v1247_v27 = vadd.f32 %v1957_v37, %v1246_v24  ;;  %v1976_v28 = vpop.f32.mrb[22].mxu0  ;;  %v2086_v30 = vpop.f32.mrb[22].mxu1  ;;  %v504_v17 = vld [vmem:[#allocation2 + $0x68] sm:$0xff] }
 0x17c   : > { %v1363_v31 = vadd.f32 %v1255_v21, %v497_v18  ;;  %v1258_v19 = vadd.f32 %v2086_v30, %v1966_v55  ;;  %v1977_v33 = vpop.f32.mrb[23].mxu0  ;;  %v1249_v35 = vpop.f32.mrb[23].mxu1  ;;  %v502_v55 = vld [vmem:[#allocation2 + $0x58] sm:$0xff] }
 0x17d   : > { %v1361_v36 = vadd.f32 %v1247_v27, %v495_v23  ;;  %v1978_v39 = vadd.f32 %v1977_v33, %v1976_v28  ;;  %v1250_v40 = vadd.f32 %v1960_v43, %v1249_v35  ;;  %v506_v23 = vld [vmem:[#allocation2 + $0x78] sm:$0xff] }
 0x17e   : > { %1395 = vst [vmem:[#allocation2 + $0x30] sm:$0xff] %v1363_v31  ;;  %v1364_v41 = vadd.f32 %v1258_v19, %v498_v29 }
 0x17f   : > { %1393 = vst [vmem:[#allocation2 + $0x20] sm:$0xff] %v1361_v36  ;;  %v1362_v42 = vadd.f32 %v1250_v40, %v496_v34  ;;  %v507_v36 = vld [vmem:[#allocation2 + $0x80] sm:$0xff] }
 0x180   : > { %1396 = vst [vmem:[#allocation2 + $0x38] sm:$0xff] %v1364_v41 }
 0x181   : > { %1394 = vst [vmem:[#allocation2 + $0x28] sm:$0xff] %v1362_v42  ;;  %v1979_v45 = vpop.f32.mrb[24].mxu0  ;;  %v2089_v37 = vpop.f32.mrb[24].mxu1 }
 0x182   : > { %v1271_v47 = vadd.f32 %v2089_v37, %v1975_v25  ;;  %v1980_v48 = vpop.f32.mrb[25].mxu0  ;;  %v1262_v51 = vpop.f32.mrb[25].mxu1 }
 0x183   : > { %v1981_v52 = vadd.f32 %v1980_v48, %v1979_v45  ;;  %v1263_v53 = vadd.f32 %v1969_v0, %v1262_v51  ;;  %v1982_v54 = vpop.f32.mrb[26].mxu0  ;;  %v2090_v57 = vpop.f32.mrb[26].mxu1  ;;  %v508_v45 = vld [vmem:[#allocation2 + $0x88] sm:$0xff] }
 0x184   : > { %v1367_v58 = vadd.f32 %v1271_v47, %v501_v46  ;;  %v1274_v43 = vadd.f32 %v2090_v57, %v1978_v39  ;;  %v1983_v59 = vpop.f32.mrb[27].mxu0  ;;  %v1265_v61 = vpop.f32.mrb[27].mxu1  ;;  %v509_v57 = vld [vmem:[#allocation2 + $0x90] sm:$0xff] }
 0x185   : > { %v1365_v62 = vadd.f32 %v1263_v53, %v499_v49  ;;  %v1984_v63 = vadd.f32 %v1983_v59, %v1982_v54  ;;  %v1266_v1 = vadd.f32 %v1972_v11, %v1265_v61  ;;  %v510_v61 = vld [vmem:[#allocation2 + $0x98] sm:$0xff] }
 0x186   : > { %1399 = vst [vmem:[#allocation2 + $0x50] sm:$0xff] %v1367_v58  ;;  %v1368_v2 = vadd.f32 %v1274_v43, %v502_v55 }
 0x187   : > { %1397 = vst [vmem:[#allocation2 + $0x40] sm:$0xff] %v1365_v62  ;;  %v1366_v3 = vadd.f32 %v1266_v1, %v500_v60 }
 0x188   : > { %1400 = vst [vmem:[#allocation2 + $0x58] sm:$0xff] %v1368_v2 }
 0x189   : > { %1398 = vst [vmem:[#allocation2 + $0x48] sm:$0xff] %v1366_v3  ;;  %v1985_v4 = vpop.f32.mrb[28].mxu0  ;;  %v2093_v5 = vpop.f32.mrb[28].mxu1  ;;  %v517_v3 = vld [vmem:[#allocation2 + $0xd0] sm:$0xff] }
 0x18a   : > { %v1986_v0 = vpop.f32.mrb[29].mxu0  ;;  %v1278_v7 = vpop.f32.mrb[29].mxu1 }
 0x18b   : > { %v1987_v8 = vadd.f32 %v1986_v0, %v1985_v4  ;;  %v1279_v9 = vadd.f32 %v1981_v52, %v1278_v7  ;;  %v1988_v10 = vpop.f32.mrb[30].mxu0  ;;  %v2094_v12 = vpop.f32.mrb[30].mxu1 }
 0x18c   : > { %v1989_v16 = vpop.f32.mrb[31].mxu0  ;;  %v1281_v18 = vpop.f32.mrb[31].mxu1 }
 0x18d   : > { %v1287_v11 = vadd.f32 %v2093_v5, %v1987_v8  ;;  %v1369_v13 = vadd.f32 %v1279_v9, %v503_v6  ;;  %v1990_v21 = vadd.f32 %v1989_v16, %v1988_v10  ;;  %v1282_v22 = vadd.f32 %v1984_v63, %v1281_v18  ;;  %v515_v6 = vld [vmem:[#allocation2 + $0xc0] sm:$0xff] }
 0x18f   : > { %v1371_v24 = vadd.f32 %v1287_v11, %v505_v15  ;;  %1401 = vst [vmem:[#allocation2 + $0x60] sm:$0xff] %v1369_v13  ;;  %v1290_v25 = vadd.f32 %v2094_v12, %v1990_v21  ;;  %v1370_v27 = vadd.f32 %v1282_v22, %v504_v17  ;;  %v518_v12 = vld [vmem:[#allocation2 + $0xd8] sm:$0xff]  ;;  %v511_v17 = vld [vmem:[#allocation2 + $0xa0] sm:$0xff]  ;;  %v516_v13 = vld [vmem:[#allocation2 + $0xc8] sm:$0xff] }
 0x191   : > { %1403 = vst [vmem:[#allocation2 + $0x70] sm:$0xff] %v1371_v24  ;;  %v1372_v28 = vadd.f32 %v1290_v25, %v506_v23  ;;  %1402 = vst [vmem:[#allocation2 + $0x68] sm:$0xff] %v1370_v27  ;;  %v1991_v29 = vpop.f32.mrb[32].mxu0  ;;  %v2097_v30 = vpop.f32.mrb[32].mxu1  ;;  %v512_v27 = vld [vmem:[#allocation2 + $0xa8] sm:$0xff] }
 0x192   : > { %v1992_v31 = vpop.f32.mrb[33].mxu0  ;;  %v1294_v19 = vpop.f32.mrb[33].mxu1 }
 0x193   : > { %1404 = vst [vmem:[#allocation2 + $0x78] sm:$0xff] %v1372_v28  ;;  %v1993_v33 = vadd.f32 %v1992_v31, %v1991_v29  ;;  %v1994_v34 = vpop.f32.mrb[34].mxu0  ;;  %v2098_v35 = vpop.f32.mrb[34].mxu1  ;;  %v521_v31 = vld [vmem:[#allocation2 + $0xf0] sm:$0xff] }
 0x194   : > { %v1995_v39 = vpop.f32.mrb[35].mxu0  ;;  %v1297_v40 = vpop.f32.mrb[35].mxu1 }
 0x195   : > { %v1295_v41 = vadd.f32 %v1993_v33, %v1294_v19  ;;  %v1996_v42 = vadd.f32 %v1995_v39, %v1994_v34 }
 0x197   : > { %v1373_v46 = vadd.f32 %v1295_v41, %v507_v36  ;;  %v1298_v37 = vadd.f32 %v1996_v42, %v1297_v40  ;;  %v522_v41 = vld [vmem:[#allocation2 + $0xf8] sm:$0xff] }
 0x199   : > { %1405 = vst [vmem:[#allocation2 + $0x80] sm:$0xff] %v1373_v46  ;;  %v1374_v47 = vadd.f32 %v1298_v37, %v508_v45  ;;  %v1997_v48 = vpop.f32.mrb[36].mxu0  ;;  %v2667_v49 = vpop.f32.mrb[36].mxu1  ;;  %v513_v46 = vld [vmem:[#allocation2 + $0xb0] sm:$0xff] }
 0x19a   : > { %v1998_v51 = vpop.f32.mrb[37].mxu0  ;;  %v1310_v52 = vpop.f32.mrb[37].mxu1 }
 0x19b   : > { %1406 = vst [vmem:[#allocation2 + $0x88] sm:$0xff] %v1374_v47  ;;  %v1999_v53 = vadd.f32 %v1998_v51, %v1997_v48  ;;  %v2000_v54 = vpop.f32.mrb[38].mxu0  ;;  %v2669_v55 = vpop.f32.mrb[38].mxu1  ;;  %v520_v48 = vld [vmem:[#allocation2 + $0xe8] sm:$0xff] }
 0x19c   : > { %v2001_v58 = vpop.f32.mrb[39].mxu0  ;;  %v1313_v43 = vpop.f32.mrb[39].mxu1 }
 0x19d   : > { %v1303_v59 = vadd.f32 %v2097_v30, %v1999_v53  ;;  %v2002_v60 = vadd.f32 %v2001_v58, %v2000_v54  ;;  %v514_v58 = vld [vmem:[#allocation2 + $0xb8] sm:$0xff] }
 0x19f   : > { %v1375_v62 = vadd.f32 %v1303_v59, %v509_v57  ;;  %v1306_v63 = vadd.f32 %v2098_v35, %v2002_v60  ;;  %v519_v35 = vld [vmem:[#allocation2 + $0xe0] sm:$0xff]  ;;  %v1427_v60 = vld [vmem:[#allocation2 + $0x10] sm:$0xff] (!%p1924_p0) }
 0x1a0   : > { %1459 = vst [vmem:[%s2563_s8 + $0x10] sm:$0xff] (!%p1924_p0), %v1427_v60 }
 0x1a1   : > { %1407 = vst [vmem:[#allocation2 + $0x90] sm:$0xff] %v1375_v62  ;;  %v1376_v1 = vadd.f32 %v1306_v63, %v510_v61  ;;  %v2003_v2 = vpop.f32.mrb[40].mxu0  ;;  %v2105_v4 = vpop.f32.mrb[40].mxu1  ;;  %v1528_v63 = vmul.f32 (!%p1924_p0), %v1427_v60, %v1427_v60 }
 0x1a2   : > { %v1335_v5 = vadd.f32 %v2105_v4, %v2655_v26  ;;  %v2004_v0 = vpop.f32.mrb[41].mxu0  ;;  %v1326_v7 = vpop.f32.mrb[41].mxu1  ;;  %v2688_v4 = vld [vmem:[#allocation2 + $0x30] sm:$0xff] (!%p1924_p0) }
 0x1a3   : > { %1408 = vst [vmem:[#allocation2 + $0x98] sm:$0xff] %v1376_v1  ;;  %v2005_v8 = vadd.f32 %v2004_v0, %v2003_v2  ;;  %v1327_v9 = vadd.f32 %v2651_v14, %v1326_v7  ;;  %v2006_v10 = vpop.f32.mrb[42].mxu0  ;;  %v2106_v15 = vpop.f32.mrb[42].mxu1  ;;  %v1428_v1 = vld [vmem:[#allocation2 + $0x18] sm:$0xff] (!%p1924_p0)  ;;  %v1429_v2 = vld [vmem:[#allocation2 + $0x20] sm:$0xff] (!%p1924_p0)  ;;  %1463 = vst [vmem:[%s2563_s8 + $0x30] sm:$0xff] (!%p1924_p0), %v2688_v4 }
 0x1a4   : > { %v1383_v16 = vadd.f32 %v1335_v5, %v517_v3  ;;  %v1338_v18 = vadd.f32 %v2106_v15, %v2657_v32  ;;  %v2007_v11 = vpop.f32.mrb[43].mxu0  ;;  %v1329_v21 = vpop.f32.mrb[43].mxu1  ;;  %v1430_v3 = vld [vmem:[#allocation2 + $0x28] sm:$0xff] (!%p1924_p0)  ;;  %1460 = vst [vmem:[%s2563_s8 + $0x18] sm:$0xff] (!%p1924_p0), %v1428_v1  ;;  %1461 = vst [vmem:[%s2563_s8 + $0x20] sm:$0xff] (!%p1924_p0), %v1429_v2  ;;  %v2690_v5 = vld [vmem:[#allocation2 + $0x38] sm:$0xff] (!%p1924_p0) }
 0x1a5   : > { %v1311_v22 = vadd.f32 %v2005_v8, %v1310_v52  ;;  %v1381_v23 = vadd.f32 %v1327_v9, %v515_v6  ;;  %v2008_v26 = vadd.f32 %v2007_v11, %v2006_v10  ;;  %v1330_v24 = vadd.f32 %v2653_v20, %v1329_v21  ;;  %1462 = vst [vmem:[%s2563_s8 + $0x28] sm:$0xff] (!%p1924_p0), %v1430_v3  ;;  %v2692_v0 = vld [vmem:[#allocation2 + $0x40] sm:$0xff] (!%p1924_p0)  ;;  %v2700_v9 = vld [vmem:[#allocation2 + $0x48] sm:$0xff] (!%p1924_p0)  ;;  %v2702_v10 = vld [vmem:[#allocation2 + $0x50] sm:$0xff] (!%p1924_p0) }
 0x1a6   : > { %1415 = vst [vmem:[#allocation2 + $0xd0] sm:$0xff] %v1383_v16  ;;  %v1384_v25 = vadd.f32 %v1338_v18, %v518_v12  ;;  %v1529_v8 = vmul.f32 (!%p1924_p0), %v1428_v1, %v1428_v1  ;;  %1464 = vst [vmem:[%s2563_s8 + $0x38] sm:$0xff] (!%p1924_p0), %v2690_v5  ;;  %v2704_v12 = vld [vmem:[#allocation2 + $0x58] sm:$0xff] (!%p1924_p0)  ;;  %v2712_v15 = vld [vmem:[#allocation2 + $0x60] sm:$0xff] (!%p1924_p0) }
 0x1a7   : > { %v1377_v28 = vadd.f32 %v1311_v22, %v511_v17  ;;  %1413 = vst [vmem:[#allocation2 + $0xc0] sm:$0xff] %v1381_v23  ;;  %v1314_v14 = vadd.f32 %v2008_v26, %v1313_v43  ;;  %v1382_v29 = vadd.f32 %v1330_v24, %v516_v13  ;;  %1465 = vst [vmem:[%s2563_s8 + $0x40] sm:$0xff] (!%p1924_p0), %v2692_v0  ;;  %v2714_v16 = vld [vmem:[#allocation2 + $0x68] sm:$0xff] (!%p1924_p0)  ;;  %v2716_v17 = vld [vmem:[#allocation2 + $0x70] sm:$0xff] (!%p1924_p0) }
 0x1a8   : > { %1416 = vst [vmem:[#allocation2 + $0xd8] sm:$0xff] %v1384_v25  ;;  %1466 = vst [vmem:[%s2563_s8 + $0x48] sm:$0xff] (!%p1924_p0), %v2700_v9  ;;  %v1530_v13 = vmul.f32 (!%p1924_p0), %v1429_v2, %v1429_v2  ;;  %v2724_v21 = vld [vmem:[#allocation2 + $0x78] sm:$0xff] (!%p1924_p0)  ;;  %v2726_v22 = vld [vmem:[#allocation2 + $0x80] sm:$0xff] (!%p1924_p0) }
 0x1a9   : > { %1409 = vst [vmem:[#allocation2 + $0xa0] sm:$0xff] %v1377_v28  ;;  %v1378_v30 = vadd.f32 %v1314_v14, %v512_v27  ;;  %1414 = vst [vmem:[#allocation2 + $0xc8] sm:$0xff] %v1382_v29  ;;  %v2009_v32 = vpop.f32.mrb[44].mxu0  ;;  %v2109_v19 = vpop.f32.mrb[44].mxu1  ;;  %v2728_v23 = vld [vmem:[#allocation2 + $0x88] sm:$0xff] (!%p1924_p0)  ;;  %v2736_v26 = vld [vmem:[#allocation2 + $0x90] sm:$0xff] (!%p1924_p0)  ;;  %v1531_v14 = vmul.f32 (!%p1924_p0), %v1430_v3, %v1430_v3 }
 0x1aa   : > { %v1351_v33 = vadd.f32 %v2109_v19, %v2663_v50  ;;  %v2010_v34 = vpop.f32.mrb[45].mxu0  ;;  %v1342_v36 = vpop.f32.mrb[45].mxu1  ;;  %1467 = vst [vmem:[%s2563_s8 + $0x50] sm:$0xff] (!%p1924_p0), %v2702_v10  ;;  %1468 = vst [vmem:[%s2563_s8 + $0x58] sm:$0xff] (!%p1924_p0), %v2704_v12  ;;  %v2738_v24 = vld [vmem:[#allocation2 + $0x98] sm:$0xff] (!%p1924_p0) }
 0x1ab   : > { %1410 = vst [vmem:[#allocation2 + $0xa8] sm:$0xff] %v1378_v30  ;;  %v2011_v20 = vadd.f32 %v2010_v34, %v2009_v32  ;;  %v1343_v39 = vadd.f32 %v2659_v38, %v1342_v36  ;;  %v2012_v40 = vpop.f32.mrb[46].mxu0  ;;  %v2110_v42 = vpop.f32.mrb[46].mxu1  ;;  %1469 = vst [vmem:[%s2563_s8 + $0x60] sm:$0xff] (!%p1924_p0), %v2712_v15  ;;  %v1532_v36 = vmul.f32 (!%p1924_p0), %v2688_v4, %v2688_v4 }
 0x1ac   : > { %v1387_v45 = vadd.f32 %v1351_v33, %v521_v31  ;;  %v1354_v37 = vadd.f32 %v2110_v42, %v2665_v56  ;;  %v2013_v47 = vpop.f32.mrb[47].mxu0  ;;  %v1345_v51 = vpop.f32.mrb[47].mxu1  ;;  %1470 = vst [vmem:[%s2563_s8 + $0x68] sm:$0xff] (!%p1924_p0), %v2714_v16  ;;  %1471 = vst [vmem:[%s2563_s8 + $0x70] sm:$0xff] (!%p1924_p0), %v2716_v17 }
 0x1ad   : > { %v1319_v52 = vadd.f32 %v2667_v49, %v2011_v20  ;;  %v1385_v50 = vadd.f32 %v1343_v39, %v519_v35  ;;  %v2014_v53 = vadd.f32 %v2013_v47, %v2012_v40  ;;  %v1346_v54 = vadd.f32 %v2661_v44, %v1345_v51  ;;  %1424 = sbr.rel (%p1924_p0) target bundleno = 508 (0x1fc), region = 62  ;;  %v1425_v49 = vld [vmem:[#allocation2] sm:$0xff] (!%p1924_p0)  ;;  %v1426_v44 = vld [vmem:[#allocation2 + $0x8] sm:$0xff] (!%p1924_p0)  ;;  %1472 = vst [vmem:[%s2563_s8 + $0x78] sm:$0xff] (!%p1924_p0), %v2724_v21  ;;  %v2764_v33 = vld [vmem:[#allocation2 + $0xd0] sm:$0xff] (!%p1924_p0) }
 0x1ae   : > { %1419 = vst [vmem:[#allocation2 + $0xf0] sm:$0xff] %v1387_v45  ;;  %v1388_v57 = vadd.f32 %v1354_v37, %v522_v41  ;;  %1457 = vst [vmem:[%s2563_s8] sm:$0xff] (!%p1924_p0), %v1425_v49  ;;  %v1489_v61 = vadd.f32 (!%p1924_p0), %v1426_v44, %v1425_v49  ;;  %v1527_v62 = vmul.f32 (!%p1924_p0), %v1426_v44, %v1426_v44  ;;  %v2760_v31 = vld [vmem:[#allocation2 + $0xc0] sm:$0xff] (!%p1924_p0) }
 0x1af   : > { %v1379_v38 = vadd.f32 %v1319_v52, %v513_v46  ;;  %1417 = vst [vmem:[#allocation2 + $0xe0] sm:$0xff] %v1385_v50  ;;  %v1322_v43 = vadd.f32 %v2669_v55, %v2014_v53  ;;  %v1386_v59 = vadd.f32 %v1346_v54, %v520_v48  ;;  %v1526_v55 = vmul.f32 (!%p1924_p0), %v1425_v49, %v1425_v49  ;;  %v2774_v20 = vld [vmem:[#allocation2 + $0xd8] sm:$0xff] (!%p1924_p0) }
 0x1b0   : > { %1420 = vst [vmem:[#allocation2 + $0xf8] sm:$0xff] %v1388_v57  ;;  %1458 = vst [vmem:[%s2563_s8 + $0x8] sm:$0xff] (!%p1924_p0), %v1426_v44  ;;  %v1490_v7 = vadd.f32 (!%p1924_p0), %v1489_v61, %v1427_v60  ;;  %v2740_v25 = vld [vmem:[#allocation2 + $0xa0] sm:$0xff] (!%p1924_p0)  ;;  %v2762_v19 = vld [vmem:[#allocation2 + $0xc8] sm:$0xff] (!%p1924_p0)  ;;  %v1533_v37 = vmul.f32 (!%p1924_p0), %v2690_v5, %v2690_v5  ;;  %v1534_v51 = vmul.f32 (!%p1924_p0), %v2692_v0, %v2692_v0 }
 0x1b1   : > { %1411 = vst [vmem:[#allocation2 + $0xb0] sm:$0xff] %v1379_v38  ;;  %v1380_v56 = vadd.f32 %v1322_v43, %v514_v58  ;;  %1418 = vst [vmem:[#allocation2 + $0xe8] sm:$0xff] %v1386_v59  ;;  %v1558_v6 = vadd.f32 (!%p1924_p0), %v1527_v62, %v1526_v55  ;;  %v1535_v53 = vmul.f32 (!%p1924_p0), %v2700_v9, %v2700_v9 }
 0x1b2   : > { %v1491_v11 = vadd.f32 (!%p1924_p0), %v1490_v7, %v1428_v1  ;;  %1473 = vst [vmem:[%s2563_s8 + $0x80] sm:$0xff] (!%p1924_p0), %v2726_v22  ;;  %1474 = vst [vmem:[%s2563_s8 + $0x88] sm:$0xff] (!%p1924_p0), %v2728_v23  ;;  %v2748_v29 = vld [vmem:[#allocation2 + $0xa8] sm:$0xff] (!%p1924_p0)  ;;  %v1536_v58 = vmul.f32 (!%p1924_p0), %v2702_v10, %v2702_v10  ;;  %v1537_v59 = vmul.f32 (!%p1924_p0), %v2704_v12, %v2704_v12 }
 0x1b3   : > { %1412 = vst [vmem:[#allocation2 + $0xb8] sm:$0xff] %v1380_v56  ;;  %v1559_v18 = vadd.f32 (!%p1924_p0), %v1558_v6, %v1528_v63  ;;  %1475 = vst [vmem:[%s2563_s8 + $0x90] sm:$0xff] (!%p1924_p0), %v2736_v26  ;;  %v1538_v44 = vmul.f32 (!%p1924_p0), %v2712_v15, %v2712_v15  ;;  %v1539_v61 = vmul.f32 (!%p1924_p0), %v2714_v16, %v2714_v16 }
 0x1b4   : > { %v1492_v28 = vadd.f32 %v1491_v11, %v1429_v2  ;;  %1476 = vst [vmem:[%s2563_s8 + $0x98] sm:$0xff] %v2738_v24  ;;  %1477 = vst [vmem:[%s2563_s8 + $0xa0] sm:$0xff] %v2740_v25  ;;  %v1540_v1 = vmul.f32 %v2716_v17, %v2716_v17  ;;  %v1542_v6 = vmul.f32 %v2726_v22, %v2726_v22 }
 0x1b5   : > { %v1560_v27 = vadd.f32 %v1559_v18, %v1529_v8  ;;  %1478 = vst [vmem:[%s2563_s8 + $0xa8] sm:$0xff] %v2748_v29  ;;  %1481 = vst [vmem:[%s2563_s8 + $0xc0] sm:$0xff] %v2760_v31  ;;  %v2786_v41 = vld [vmem:[#allocation2 + $0xf0] sm:$0xff]  ;;  %v1545_v18 = vmul.f32 %v2738_v24, %v2738_v24 }
 0x1b6   : > { %v1493_v35 = vadd.f32 %v1492_v28, %v1430_v3  ;;  %1482 = vst [vmem:[%s2563_s8 + $0xc8] sm:$0xff] %v2762_v19  ;;  %1483 = vst [vmem:[%s2563_s8 + $0xd0] sm:$0xff] %v2764_v33  ;;  %v2776_v39 = vld [vmem:[#allocation2 + $0xe0] sm:$0xff] }
 0x1b7   : > { %v1561_v34 = vadd.f32 %v1560_v27, %v1530_v13  ;;  %1484 = vst [vmem:[%s2563_s8 + $0xd8] sm:$0xff] %v2774_v20  ;;  %1485 = vst [vmem:[%s2563_s8 + $0xe0] sm:$0xff] %v2776_v39  ;;  %v2788_v42 = vld [vmem:[#allocation2 + $0xf8] sm:$0xff] }
 0x1b8   : > { %v2750_v30 = vld [vmem:[#allocation2 + $0xb0] sm:$0xff]  ;;  %v2778_v40 = vld [vmem:[#allocation2 + $0xe8] sm:$0xff]  ;;  %v1494_v46 = vadd.f32 %v1493_v35, %v2688_v4  ;;  %1487 = vst [vmem:[%s2563_s8 + $0xf0] sm:$0xff] %v2786_v41  ;;  %1488 = vst [vmem:[%s2563_s8 + $0xf8] sm:$0xff] %v2788_v42  ;;  %v1541_v4 = vmul.f32 %v2724_v21, %v2724_v21 }
 0x1b9   : > { %1479 = vst [vmem:[%s2563_s8 + $0xb0] sm:$0xff] %v2750_v30  ;;  %1486 = vst [vmem:[%s2563_s8 + $0xe8] sm:$0xff] %v2778_v40  ;;  %v1562_v45 = vadd.f32 %v1561_v34, %v1531_v14 }
 0x1ba   : > { %v2752_v32 = vld [vmem:[#allocation2 + $0xb8] sm:$0xff]  ;;  %v1495_v48 = vadd.f32 %v1494_v46, %v2690_v5 }
 0x1bb   : > { %1480 = vst [vmem:[%s2563_s8 + $0xb8] sm:$0xff] %v2752_v32  ;;  %v1563_v47 = vadd.f32 %v1562_v45, %v1532_v36 }
 0x1bc   : > { %v1496_v50 = vadd.f32 %v1495_v48, %v2692_v0 }
 0x1bd   : > { %v1564_v52 = vadd.f32 %v1563_v47, %v1533_v37 }
 0x1be   : > { %v1497_v57 = vadd.f32 %v1496_v50, %v2700_v9  ;;  %v1543_v9 = vmul.f32 %v2728_v23, %v2728_v23 }
 0x1bf   : > { %v1565_v54 = vadd.f32 %v1564_v52, %v1534_v51 }
 0x1c0   : > { %v1498_v43 = vadd.f32 %v1497_v57, %v2702_v10 }
 0x1c1   : > { %v1566_v38 = vadd.f32 %v1565_v54, %v1535_v53 }
 0x1c2   : > { %v1499_v49 = vadd.f32 %v1498_v43, %v2704_v12 }
 0x1c3   : > { %v1567_v56 = vadd.f32 %v1566_v38, %v1536_v58 }
 0x1c4   : > { %v1500_v55 = vadd.f32 %v1499_v49, %v2712_v15  ;;  %v1544_v15 = vmul.f32 %v2736_v26, %v2736_v26 }
 0x1c5   : > { %v1568_v60 = vadd.f32 %v1567_v56, %v1537_v59 }
 0x1c6   : > { %v1501_v63 = vadd.f32 %v1500_v55, %v2714_v16 }
 0x1c7   : > { %v1569_v62 = vadd.f32 %v1568_v60, %v1538_v44 }
 0x1c8   : > { %v1502_v3 = vadd.f32 %v1501_v63, %v2716_v17 }
 0x1c9   : > { %v1570_v2 = vadd.f32 %v1569_v62, %v1539_v61 }
 0x1ca   : > { %v1503_v0 = vadd.f32 %v1502_v3, %v2724_v21  ;;  %v1546_v21 = vmul.f32 %v2740_v25, %v2740_v25 }
 0x1cb   : > { %v1571_v5 = vadd.f32 %v1570_v2, %v1540_v1 }
 0x1cc   : > { %v1504_v8 = vadd.f32 %v1503_v0, %v2726_v22 }
 0x1cd   : > { %v1572_v7 = vadd.f32 %v1571_v5, %v1541_v4 }
 0x1ce   : > { %v1505_v12 = vadd.f32 %v1504_v8, %v2728_v23  ;;  %v1547_v23 = vmul.f32 %v2748_v29, %v2748_v29 }
 0x1cf   : > { %v1573_v10 = vadd.f32 %v1572_v7, %v1542_v6 }
 0x1d0   : > { %v1506_v17 = vadd.f32 %v1505_v12, %v2736_v26  ;;  %v1548_v26 = vmul.f32 %v2750_v30, %v2750_v30 }
 0x1d1   : > { %v1574_v16 = vadd.f32 %v1573_v10, %v1543_v9 }
 0x1d2   : > { %v1507_v13 = vadd.f32 %v1506_v17, %v2738_v24  ;;  %v1549_v24 = vmul.f32 %v2752_v32, %v2752_v32 }
 0x1d3   : > { %v1575_v11 = vadd.f32 %v1574_v16, %v1544_v15 }
 0x1d4   : > { %v1508_v27 = vadd.f32 %v1507_v13, %v2740_v25  ;;  %v1550_v25 = vmul.f32 %v2760_v31, %v2760_v31 }
 0x1d5   : > { %v1576_v22 = vadd.f32 %v1575_v11, %v1545_v18 }
 0x1d6   : > { %v1509_v14 = vadd.f32 %v1508_v27, %v2748_v29  ;;  %v1551_v29 = vmul.f32 %v2762_v19, %v2762_v19 }
 0x1d7   : > { %v1577_v28 = vadd.f32 %v1576_v22, %v1546_v21 }
 0x1d8   : > { %v1510_v35 = vadd.f32 %v1509_v14, %v2750_v30  ;;  %v1552_v30 = vmul.f32 %v2764_v33, %v2764_v33 }
 0x1d9   : > { %v1578_v34 = vadd.f32 %v1577_v28, %v1547_v23 }
 0x1da   : > { %v1511_v45 = vadd.f32 %v1510_v35, %v2752_v32  ;;  %v1553_v32 = vmul.f32 %v2774_v20, %v2774_v20 }
 0x1db   : > { %v1579_v36 = vadd.f32 %v1578_v34, %v1548_v26 }
 0x1dc   : > { %v1512_v37 = vadd.f32 %v1511_v45, %v2760_v31  ;;  %v1554_v31 = vmul.f32 %v2776_v39, %v2776_v39 }
 0x1dd   : > { %v1580_v46 = vadd.f32 %v1579_v36, %v1549_v24 }
 0x1de   : > { %v1513_v48 = vadd.f32 %v1512_v37, %v2762_v19  ;;  %v1555_v19 = vmul.f32 %v2778_v40, %v2778_v40 }
 0x1df   : > { %v1581_v47 = vadd.f32 %v1580_v46, %v1550_v25 }
 0x1e0   : > { %v1514_v52 = vadd.f32 %v1513_v48, %v2764_v33  ;;  %v1556_v33 = vmul.f32 %v2786_v41, %v2786_v41 }
 0x1e1   : > { %v1582_v51 = vadd.f32 %v1581_v47, %v1551_v29 }
 0x1e2   : > { %v1515_v53 = vadd.f32 %v1514_v52, %v2774_v20  ;;  %v1557_v20 = vmul.f32 %v2788_v42, %v2788_v42 }
 0x1e3   : > { %v1583_v50 = vadd.f32 %v1582_v51, %v1552_v30 }
 0x1e4   : > { %v1516_v57 = vadd.f32 %v1515_v53, %v2776_v39 }
 0x1e5   : > { %v1584_v54 = vadd.f32 %v1583_v50, %v1553_v32 }
 0x1e6   : > { %v1517_v38 = vadd.f32 %v1516_v57, %v2778_v40 }
 0x1e7   : > { %v1585_v58 = vadd.f32 %v1584_v54, %v1554_v31 }
 0x1e8   : > { %v1518_v59 = vadd.f32 %v1517_v38, %v2786_v41 }
 0x1e9   : > { %v1586_v43 = vadd.f32 %v1585_v58, %v1555_v19 }
 0x1ea   : > { %v1519_v39 = vadd.f32 %v1518_v59, %v2788_v42 }
 0x1eb   : > { %v1587_v56 = vadd.f32 %v1586_v43, %v1556_v33 }
 0x1ec   : > { %v1520_v49 = vrot.slane %v1519_v39, 4 }
 0x1ed   : > { %v1588_v44 = vadd.f32 %v1587_v56, %v1557_v20 }
 0x1ee   : > { %v1521_v60 = vadd.f32 %v1520_v49, %v1519_v39 }
 0x1ef   : > { %v1589_v55 = vrot.slane %v1588_v44, 4 }
 0x1f0   : > { %v1522_v61 = vrot.slane %v1521_v60, 2 }
 0x1f1   : > { %v1590_v40 = vadd.f32 %v1589_v55, %v1588_v44 }
 0x1f2   : > { %v1523_v62 = vadd.f32 %v1522_v61, %v1521_v60 }
 0x1f3   : > { %v1591_v63 = vrot.slane %v1590_v40, 2 }
 0x1f4   : > { %v1524_v1 = vrot.slane %v1523_v62, 1 }
 0x1f5   : > { %v1592_v2 = vadd.f32 %v1591_v63, %v1590_v40 }
 0x1f6   : > { %v1525_v3 = vadd.f32 %v1524_v1, %v1523_v62 }
 0x1f7   : > { %v1593_v41 = vrot.slane %v1592_v2, 1 }
 0x1f8   : > { %1595 = vst [vmem:[%s447_s10] sm:$0x1] %v1525_v3 }
 0x1f9   : > { %v1594_v4 = vadd.f32 %v1593_v41, %v1592_v2 }
 0x1fb   : > { %1596 = vst [vmem:[%s453_s13] sm:$0x1] %v1594_v4 }
 0x1fc PF: > { %s15_s21 = sadd.s32 1, %s2329_s21   ;;  %s2906_s15 = smov %s2309_s16 }
 0x1fd   : > { %p12_p1 = scmp.ge.s32.totalorder %s15_s21, 8   ;;  %s2907_s16 = smov %s2408_s28 }
 0x1fe   : > { %s2908_s17 = smov %s2321_s19  ;;  %s2909_s18 = smov %s2325_s20 }
 0x1ff   : > { %s2910_s19 = smov %s2913_s22  ;;  %s2911_s20 = smov %s2917_s23 }
 0x200   :  { %14 = sbr.rel (!%p12_p1) target bundleno = 4 (0x4), region = 130 }

</bundles_post_ra>
